<compile_context>
chip_gen: v6e
topology: v6e:2x2x1
jax: 0.10.0
libtpu: 0.0.40
codegen_flags: <defaults>
</compile_context>

<pallas_src>
import math

import numpy as np
import jax
import jax.numpy as jnp
from jax.experimental import pallas as pl
from jax.experimental.pallas import tpu as pltpu

# Full-precision f32 matmuls for both the reference and the kernel trace.
jax.config.update("jax_default_matmul_precision", "highest")

# ----------------------------------------------------------------------------
# Hyperparameters (analogue of the PyTorch `params` dict)
# ----------------------------------------------------------------------------
HP = dict(
    num_characters=8,
    seq_length=16,
    num_conv_layers=2,
    layer1_filters=8,
    layer2_filters=16,
    layer3_filters=16,
    layer4_filters=16,
    kernel1_size=3,
    kernel2_size=5,
    kernel3_size=3,
    kernel4_size=3,
    lstm_stack_size=1,
    lstm_num_neurons=32,
    latent_dimensions=16,
    batch_size=2,
)


def _vmem_spec():
    return pl.BlockSpec(memory_space=pltpu.MemorySpace.VMEM)


# ----------------------------------------------------------------------------
# Fused forward kernel
# ----------------------------------------------------------------------------
def make_vae_kernel(n_conv, B, Ld, H, T):
    """Single-invocation fused VAE forward. All shapes are static."""

    def kernel(*refs):
        it = iter(refs)
        x_ref = next(it)                                     # (B, C*L)
        conv_refs = [(next(it), next(it)) for _ in range(n_conv)]
        w_head_ref = next(it)                                # (F, 2*Ld)
        b_head_ref = next(it)                                # (B, 2*Ld)
        eps_ref = next(it)                                   # (B, Ld)
        wih_ref = next(it)                                   # (Ld, 8H)
        whh_ref = next(it)                                   # (2H, 8H) block-diag
        b_lstm_ref = next(it)                                # (B, 8H)
        wfc_ref = next(it)                                   # (2H, L)
        bfc_ref = next(it)                                   # (B*T, L)
        xhat_ref = next(it)                                  # (B*T, L)  output
        enc_ref = next(it)                                   # (B, 3*Ld) output
        hseq = next(it)                                      # (B*T, 2H) scratch

        f32 = jnp.float32

        # -------- encoder: conv stack as banded (Toeplitz) matmuls -----------
        # Each Conv1d('same') has been folded into a (Cin*L, Cout*L) banded
        # weight (built once in prepare_params), so one matmul + bias + ReLU
        # per layer handles the whole batch and the output is already in
        # torch.flatten(start_dim=1) order (feature index = c*L + l).
        h = x_ref[...]                                       # (B, Cin*L)
        for (wr, br) in conv_refs:
            h = jnp.maximum(
                jnp.dot(h, wr[...], preferred_element_type=f32) + br[...], 0.0)

        # -------- fused fc_mu | fc_logvar + reparameterize --------------------
        head = (jnp.dot(h, w_head_ref[...],
                        preferred_element_type=f32) + b_head_ref[...])  # (B, 2Ld)
        mu = head[:, 0:Ld]
        lv = head[:, Ld:2 * Ld]
        z = mu + eps_ref[...] * jnp.exp(0.5 * lv)
        # packed encoder output: [mu | logvar | z]  (one output array / DMA)
        enc_ref[:, 0:2 * Ld] = head
        enc_ref[:, 2 * Ld:3 * Ld] = z

        # -------- decoder: fused bidirectional LSTM ---------------------------
        # LSTM input is z repeated over T steps -> input projection hoisted out
        # of the recurrence.  Gate lane layout (8H):
        #   [i_f,i_r | f_f,f_r | o_f,o_r | g_f,g_r]
        # so ONE sigmoid covers lanes 0:6H and ONE tanh covers 6H:8H per step.
        # State layout: h_st/c_st = [fwd | rev] (B, 2H); W_hh is block-diagonal.
        xproj = (jnp.dot(z, wih_ref[...],
                         preferred_element_type=f32) + b_lstm_ref[...])  # (B, 8H)
        whh = whh_ref[...]

        def lstm_nonlin(gates):
            sig = jax.nn.sigmoid(gates[:, 0:6 * H])
            g_g = jnp.tanh(gates[:, 6 * H:8 * H])
            return sig[:, 0:2 * H], sig[:, 2 * H:4 * H], sig[:, 4 * H:6 * H], g_g

        def store_h(s, h_st):
            # batch-major rows (b*T + t); off the serial dependence chain.
            for b in range(B):
                rf = b * T + s
                rr = b * T + (T - 1 - s)
                hseq[rf:rf + 1, 0:H] = h_st[b:b + 1, 0:H]          # fwd -> t = s
                hseq[rr:rr + 1, H:2 * H] = h_st[b:b + 1, H:2 * H]  # rev -> t = T-1-s

        # step 0 peeled: h0 = c0 = 0 -> no recurrent matmul, c = i*g
        i_g, _f_g, o_g, g_g = lstm_nonlin(xproj)
        c_st = i_g * g_g
        h_st = o_g * jnp.tanh(c_st)
        store_h(0, h_st)
        for s in range(1, T):                                # static unroll (T small)
            gates = xproj + jnp.dot(h_st, whh, preferred_element_type=f32)
            i_g, f_g, o_g, g_g = lstm_nonlin(gates)
            c_st = f_g * c_st + i_g * g_g
            h_st = o_g * jnp.tanh(c_st)
            store_h(s, h_st)

        # -------- decode_FC fused across (batch, time) ------------------------
        xhat_ref[...] = (jnp.dot(hseq[...], wfc_ref[...],
                                 preferred_element_type=f32) + bfc_ref[...])

    return kernel


def vae_forward(prep, x, eps):
    # x: (B, 1, num_characters, seq_length)
    x = jnp.squeeze(x, axis=1)                               # (B, C, L)
    B, C, L = x.shape
    Ld = HP['latent_dimensions']
    H = HP['lstm_num_neurons']
    T = HP['num_characters']
    x_flat = x.reshape(B, C * L)                             # free reshape

    n_conv = len(prep['convs'])
    kernel = make_vae_kernel(n_conv, B, Ld, H, T)

    inputs = [x_flat]
    for (w, b) in prep['convs']:
        inputs += [w, b]
    inputs += [prep['w_head'], prep['b_head'], eps,
               prep['wih'], prep['whh'], prep['b_lstm'],
               prep['wfc'], prep['bfc']]

    out_shape = (
        jax.ShapeDtypeStruct((B * T, L), jnp.float32),       # x_hat (batch-major rows)
        jax.ShapeDtypeStruct((B, 3 * Ld), jnp.float32),      # [mu | logvar | z]
    )

    # TODO(synk): single grid point occupies one TensorCore; on v7x, batching
    # more sequences and adding a parallel batch grid axis would use both TCs.
    xhat_flat, enc = pl.pallas_call(
        kernel,
        out_shape=out_shape,
        in_specs=[_vmem_spec() for _ in inputs],
        out_specs=(_vmem_spec(), _vmem_spec()),
        scratch_shapes=[
            pltpu.VMEM((B * T, 2 * H), jnp.float32),         # LSTM output sequence
        ],
    )(*inputs)

    x_hat = xhat_flat.reshape(B, T, L)                       # metadata-only reshape
    mu = enc[:, 0:Ld]
    logvar = enc[:, Ld:2 * Ld]
    z = enc[:, 2 * Ld:3 * Ld]
    return x_hat, z, mu, logvar


# ----------------------------------------------------------------------------
# Parameter init (deterministic; PyTorch-style uniform(-1/sqrt(fan_in), ...))
# ----------------------------------------------------------------------------
def init_params(key):
    keys = iter(jax.random.split(key, 64))

    def u(shape, fan_in):
        bound = 1.0 / math.sqrt(fan_in)
        return jax.random.uniform(next(keys), shape, jnp.float32, -bound, bound)

    C, L = HP['num_characters'], HP['seq_length']
    filt = [HP['layer1_filters'], HP['layer2_filters'],
            HP['layer3_filters'], HP['layer4_filters']]
    ks = [HP['kernel1_size'], HP['kernel2_size'],
          HP['kernel3_size'], HP['kernel4_size']]

    convs = []
    in_ch = C
    for i in range(HP['num_conv_layers']):
        out_ch, K = filt[i], ks[i]
        fan_in = in_ch * K
        convs.append((u((out_ch, in_ch, K), fan_in), u((out_ch,), fan_in)))
        in_ch = out_ch

    F = in_ch * L
    Ld = HP['latent_dimensions']
    w_mu, b_mu = u((Ld, F), F), u((Ld,), F)
    w_lv, b_lv = u((Ld, F), F), u((Ld,), F)

    H = HP['lstm_num_neurons']
    lstm_layers = []
    in_sz = Ld
    for _ in range(HP['lstm_stack_size']):
        def direction(isz):
            return (u((4 * H, isz), H), u((4 * H, H), H),
                    u((4 * H,), H), u((4 * H,), H))
        lstm_layers.append((direction(in_sz), direction(in_sz)))
        in_sz = 2 * H

    w_fc, b_fc = u((L, 2 * H), 2 * H), u((L,), 2 * H)

    return dict(convs=convs, w_mu=w_mu, b_mu=b_mu, w_lv=w_lv, b_lv=b_lv,
                lstm=lstm_layers, w_fc=w_fc, b_fc=b_fc)


def prepare_params(p, B=None, T=None):
    """One-time host-side re-layout of torch-style params into kernel layout."""
    L = HP['seq_length']
    Ld = HP['latent_dimensions']
    H = HP['lstm_num_neurons']
    if B is None:
        B = HP['batch_size']
    if T is None:
        T = HP['num_characters']

    # ---- conv layers -> banded (Toeplitz) matmul weights over c*L + l -------
    convs = []
    for (w, b) in p['convs']:
        w_np = np.asarray(w, np.float32)
        b_np = np.asarray(b, np.float32)
        Cout, Cin, K = w_np.shape
        pad = K // 2
        # shifted-identity selector per tap: S[k, l_in, l_out] = 1 iff l_in = l_out + k - pad
        S = np.zeros((K, L, L), np.float32)
        lo = np.arange(L)
        for k in range(K):
            li = lo + (k - pad)
            valid = (li >= 0) & (li < L)
            S[k, li[valid], lo[valid]] = 1.0
        # Wfull[ci*L + l_in, c*L + l_out] = sum_k w[c,ci,k] * S[k, l_in, l_out]
        wfull = np.einsum('cik,kpl->ipcl', w_np, S).reshape(Cin * L, Cout * L)
        bias = np.broadcast_to(np.repeat(b_np, L)[None, :], (B, Cout * L))
        convs.append((jnp.asarray(wfull), jnp.asarray(np.ascontiguousarray(bias))))

    # ---- fused fc_mu | fc_logvar head ---------------------------------------
    w_head = jnp.concatenate([p['w_mu'].T, p['w_lv'].T], axis=1)     # (F, 2*Ld)
    b_head_row = np.concatenate([np.asarray(p['b_mu']), np.asarray(p['b_lv'])])
    b_head = jnp.asarray(np.broadcast_to(b_head_row[None, :], (B, 2 * Ld)).copy())

    # ---- bidirectional LSTM (stack size 1) ----------------------------------
    assert HP['lstm_stack_size'] == 1
    # TODO(synk): only lstm_stack_size == 1 is fused; deeper stacks would need
    # per-layer recurrences with time-varying inputs.
    (fwd, rev) = p['lstm'][0]
    wih_f, whh_f, bih_f, bhh_f = (np.asarray(a, np.float32) for a in fwd)
    wih_r, whh_r, bih_r, bhh_r = (np.asarray(a, np.float32) for a in rev)
    b_f = bih_f + bhh_f                                              # pre-summed biases
    b_r = bih_r + bhh_r
    zHH = np.zeros((H, H), np.float32)
    # torch gate order within 4H is [i, f, g, o]; kernel order is [i, f, o, g]
    # so the three sigmoid gates are contiguous and tanh gate is last.
    gate_order = [0, 1, 3, 2]
    wih_blocks, whh_blocks, b_blocks = [], [], []
    for g in gate_order:
        sl = slice(g * H, (g + 1) * H)
        for (wih_d, whh_d, b_d, is_fwd) in ((wih_f, whh_f, b_f, True),
                                            (wih_r, whh_r, b_r, False)):
            wih_blocks.append(wih_d[sl].T)                           # (in, H)
            wt = whh_d[sl].T                                         # (H, H)
            whh_blocks.append(np.concatenate([wt, zHH], axis=0) if is_fwd
                              else np.concatenate([zHH, wt], axis=0))
            b_blocks.append(b_d[sl])
    wih_cat = np.concatenate(wih_blocks, axis=1)                     # (Ld, 8H)
    whh_blk = np.concatenate(whh_blocks, axis=1)                     # (2H, 8H)
    b_cat = np.broadcast_to(np.concatenate(b_blocks)[None, :], (B, 8 * H))

    # ---- decode_FC ------------------------------------------------------------
    wfc = jnp.asarray(np.asarray(p['w_fc'], np.float32).T)           # (2H, L)
    bfc = jnp.asarray(np.broadcast_to(
        np.asarray(p['b_fc'], np.float32)[None, :], (B * T, L)).copy())

    return dict(convs=convs,
                w_head=w_head, b_head=b_head,
                wih=jnp.asarray(wih_cat), whh=jnp.asarray(whh_blk),
                b_lstm=jnp.asarray(np.ascontiguousarray(b_cat)),
                wfc=wfc, bfc=bfc)


# ----------------------------------------------------------------------------
# Pure-JAX reference (torch semantics) for validation
# ----------------------------------------------------------------------------
def vae_reference(p, x, eps):
    x = jnp.squeeze(x, axis=1)
    h = x
    for (w, b) in p['convs']:
        Cout, Cin, K = w.shape
        pad = K // 2
        L = h.shape[2]
        hp = jnp.pad(h, ((0, 0), (0, 0), (pad, pad)))
        out = sum(jnp.einsum('oi,bil->bol', w[:, :, k], hp[:, :, k:k + L])
                  for k in range(K))
        h = jnp.maximum(out + b[None, :, None], 0.0)
    B = h.shape[0]
    flat = h.reshape(B, -1)
    mu = flat @ p['w_mu'].T + p['b_mu']
    lv = flat @ p['w_lv'].T + p['b_lv']
    z = mu + eps * jnp.exp(0.5 * lv)

    H = HP['lstm_num_neurons']
    T = HP['num_characters']

    def run_dir(xs, wih, whh, bih, bhh):
        def step(carry, x_t):
            h_, c_ = carry
            g = x_t @ wih.T + bih + h_ @ whh.T + bhh
            i = jax.nn.sigmoid(g[:, 0:H])
            f = jax.nn.sigmoid(g[:, H:2 * H])
            gg = jnp.tanh(g[:, 2 * H:3 * H])
            o = jax.nn.sigmoid(g[:, 3 * H:4 * H])
            c_ = f * c_ + i * gg
            h_ = o * jnp.tanh(c_)
            return (h_, c_), h_
        init = (jnp.zeros((xs.shape[1], H)), jnp.zeros((xs.shape[1], H)))
        _, hs = jax.lax.scan(step, init, xs)
        return hs

    rz = jnp.repeat(z[:, None, :], T, axis=1)            # (B, T, Ld)
    xs = jnp.transpose(rz, (1, 0, 2))                    # (T, B, Ld)
    (fwd, rev) = p['lstm'][0]
    hf = run_dir(xs, *fwd)
    hr = run_dir(xs[::-1], *rev)[::-1]
    l1 = jnp.transpose(jnp.concatenate([hf, hr], axis=-1), (1, 0, 2))
    x_hat = l1 @ p['w_fc'].T + p['b_fc']
    # Note: self.prob (LogSoftmax) is defined in the module but never used in forward.
    return x_hat, z, mu, lv


if __name__ == "__main__":
    key = jax.random.PRNGKey(0)
    k_param, k_x, k_eps = jax.random.split(key, 3)

    params = init_params(k_param)
    B = HP['batch_size']
    T = HP['num_characters']
    prep = prepare_params(params, B=B, T=T)    # one-time weight re-layout (outside jit)

    x = jax.random.normal(
        k_x, (B, 1, HP['num_characters'], HP['seq_length']), jnp.float32)
    # torch.rand_like -> uniform [0, 1) noise for the reparameterization trick.
    # TODO(synk): RNG stream differs from torch.rand_like (jax.random vs torch RNG);
    # distribution semantics (U[0,1)) are matched.
    eps = jax.random.uniform(k_eps, (B, HP['latent_dimensions']), jnp.float32)

    fwd_fn = jax.jit(vae_forward)
    x_hat, z, mu, logvar = fwd_fn(prep, x, eps)
    jax.block_until_ready((x_hat, z, mu, logvar))

    assert x_hat.shape == (B, HP['num_characters'], HP['seq_length'])
    assert z.shape == (B, HP['latent_dimensions'])
    assert mu.shape == (B, HP['latent_dimensions'])
    assert logvar.shape == (B, HP['latent_dimensions'])

    # Correctness check against the pure-JAX reference (torch-layout weights).
    ref = jax.jit(vae_reference)(params, x, eps)
    jax.block_until_ready(ref)
    for name, got, want in zip(("x_hat", "z", "mu", "logvar"),
                               (x_hat, z, mu, logvar), ref):
        err = float(jnp.max(jnp.abs(got - want)))
        assert err < 1e-4, f"{name} mismatch vs reference: max abs err {err}"

    print("KERNEL_OK")
</pallas_src>

<mosaic_0001>
module attributes {stable_mosaic.version = 11 : i64} {
  func.func @kernel(%arg0: memref<2x128xf32, #tpu.memory_space<vmem>>, %arg1: memref<128x128xf32, #tpu.memory_space<vmem>>, %arg2: memref<2x128xf32, #tpu.memory_space<vmem>>, %arg3: memref<128x256xf32, #tpu.memory_space<vmem>>, %arg4: memref<2x256xf32, #tpu.memory_space<vmem>>, %arg5: memref<256x32xf32, #tpu.memory_space<vmem>>, %arg6: memref<2x32xf32, #tpu.memory_space<vmem>>, %arg7: memref<2x16xf32, #tpu.memory_space<vmem>>, %arg8: memref<16x256xf32, #tpu.memory_space<vmem>>, %arg9: memref<64x256xf32, #tpu.memory_space<vmem>>, %arg10: memref<2x256xf32, #tpu.memory_space<vmem>>, %arg11: memref<64x16xf32, #tpu.memory_space<vmem>>, %arg12: memref<16x16xf32, #tpu.memory_space<vmem>>, %arg13: memref<16x16xf32, #tpu.memory_space<vmem>>, %arg14: memref<2x48xf32, #tpu.memory_space<vmem>>, %arg15: memref<16x64xf32, #tpu.memory_space<vmem>>) attributes {dimension_semantics = [], scalar_prefetch = 0 : i64, scratch_operands = 1 : i64, tpu.core_type = #tpu.core_type<tc>} {
    %c0 = arith.constant 0 : index
    %c0_0 = arith.constant 0 : index
    %0 = vector.load %arg0[%c0, %c0_0] : memref<2x128xf32, #tpu.memory_space<vmem>>, vector<2x128xf32>
    %c0_1 = arith.constant 0 : index
    %c0_2 = arith.constant 0 : index
    %1 = vector.load %arg1[%c0_1, %c0_2] : memref<128x128xf32, #tpu.memory_space<vmem>>, vector<128x128xf32>
    %cst = arith.constant dense<0.000000e+00> : vector<2x128xf32>
    %2 = tpu.matmul %0, %1, %cst {dimension_numbers = #tpu.dot_dimension_numbers<[1], [0], [0], [1], [0, 0, 1, 1], [], []>, precision = #tpu.contract_precision<fp32>} : vector<2x128xf32>, vector<128x128xf32>, vector<2x128xf32> -> vector<2x128xf32>
    %c0_3 = arith.constant 0 : index
    %c0_4 = arith.constant 0 : index
    %3 = vector.load %arg2[%c0_3, %c0_4] : memref<2x128xf32, #tpu.memory_space<vmem>>, vector<2x128xf32>
    %4 = arith.addf %2, %3 : vector<2x128xf32>
    %cst_5 = arith.constant 0.000000e+00 : f32
    %5 = vector.broadcast %cst_5 : f32 to vector<2x128xf32>
    %6 = arith.maximumf %4, %5 : vector<2x128xf32>
    %c0_6 = arith.constant 0 : index
    %c0_7 = arith.constant 0 : index
    %7 = vector.load %arg3[%c0_6, %c0_7] : memref<128x256xf32, #tpu.memory_space<vmem>>, vector<128x256xf32>
    %cst_8 = arith.constant dense<0.000000e+00> : vector<2x256xf32>
    %8 = tpu.matmul %6, %7, %cst_8 {dimension_numbers = #tpu.dot_dimension_numbers<[1], [0], [0], [1], [0, 0, 1, 1], [], []>, precision = #tpu.contract_precision<fp32>} : vector<2x128xf32>, vector<128x256xf32>, vector<2x256xf32> -> vector<2x256xf32>
    %c0_9 = arith.constant 0 : index
    %c0_10 = arith.constant 0 : index
    %9 = vector.load %arg4[%c0_9, %c0_10] : memref<2x256xf32, #tpu.memory_space<vmem>>, vector<2x256xf32>
    %10 = arith.addf %8, %9 : vector<2x256xf32>
    %cst_11 = arith.constant 0.000000e+00 : f32
    %11 = vector.broadcast %cst_11 : f32 to vector<2x256xf32>
    %12 = arith.maximumf %10, %11 : vector<2x256xf32>
    %c0_12 = arith.constant 0 : index
    %c0_13 = arith.constant 0 : index
    %13 = vector.load %arg5[%c0_12, %c0_13] : memref<256x32xf32, #tpu.memory_space<vmem>>, vector<256x32xf32>
    %cst_14 = arith.constant dense<0.000000e+00> : vector<2x32xf32>
    %14 = tpu.matmul %12, %13, %cst_14 {dimension_numbers = #tpu.dot_dimension_numbers<[1], [0], [0], [1], [0, 0, 1, 1], [], []>, precision = #tpu.contract_precision<fp32>} : vector<2x256xf32>, vector<256x32xf32>, vector<2x32xf32> -> vector<2x32xf32>
    %c0_15 = arith.constant 0 : index
    %c0_16 = arith.constant 0 : index
    %15 = vector.load %arg6[%c0_15, %c0_16] : memref<2x32xf32, #tpu.memory_space<vmem>>, vector<2x32xf32>
    %16 = arith.addf %14, %15 : vector<2x32xf32>
    %17 = vector.extract_strided_slice %16 {offsets = [0, 0], sizes = [2, 16], strides = [1, 1]} : vector<2x32xf32> to vector<2x16xf32>
    %18 = vector.extract_strided_slice %16 {offsets = [0, 16], sizes = [2, 16], strides = [1, 1]} : vector<2x32xf32> to vector<2x16xf32>
    %c0_17 = arith.constant 0 : index
    %c0_18 = arith.constant 0 : index
    %19 = vector.load %arg7[%c0_17, %c0_18] : memref<2x16xf32, #tpu.memory_space<vmem>>, vector<2x16xf32>
    %cst_19 = arith.constant 5.000000e-01 : f32
    %20 = vector.broadcast %cst_19 : f32 to vector<2x16xf32>
    %21 = arith.mulf %20, %18 : vector<2x16xf32>
    %22 = math.exp %21 : vector<2x16xf32>
    %23 = arith.mulf %19, %22 : vector<2x16xf32>
    %24 = arith.addf %17, %23 : vector<2x16xf32>
    %c0_20 = arith.constant 0 : index
    %c0_21 = arith.constant 0 : index
    %25 = vector.load %arg14[%c0_20, %c0_21] : memref<2x48xf32, #tpu.memory_space<vmem>>, vector<2x32xf32>
    tpu.vector_store %arg14[%c0_20, %c0_21], %16 {strides = array<i32>} : memref<2x48xf32, #tpu.memory_space<vmem>>, vector<2x32xf32>,
    %c0_22 = arith.constant 0 : index
    %c32 = arith.constant 32 : index
    %26 = vector.load %arg14[%c0_22, %c32] : memref<2x48xf32, #tpu.memory_space<vmem>>, vector<2x16xf32>
    tpu.vector_store %arg14[%c0_22, %c32], %24 {strides = array<i32>} : memref<2x48xf32, #tpu.memory_space<vmem>>, vector<2x16xf32>,
    %c0_23 = arith.constant 0 : index
    %c0_24 = arith.constant 0 : index
    %27 = vector.load %arg8[%c0_23, %c0_24] : memref<16x256xf32, #tpu.memory_space<vmem>>, vector<16x256xf32>
    %cst_25 = arith.constant dense<0.000000e+00> : vector<2x256xf32>
    %28 = tpu.matmul %24, %27, %cst_25 {dimension_numbers = #tpu.dot_dimension_numbers<[1], [0], [0], [1], [0, 0, 1, 1], [], []>, precision = #tpu.contract_precision<fp32>} : vector<2x16xf32>, vector<16x256xf32>, vector<2x256xf32> -> vector<2x256xf32>
    %c0_26 = arith.constant 0 : index
    %c0_27 = arith.constant 0 : index
    %29 = vector.load %arg10[%c0_26, %c0_27] : memref<2x256xf32, #tpu.memory_space<vmem>>, vector<2x256xf32>
    %30 = arith.addf %28, %29 : vector<2x256xf32>
    %c0_28 = arith.constant 0 : index
    %c0_29 = arith.constant 0 : index
    %31 = vector.load %arg9[%c0_28, %c0_29] : memref<64x256xf32, #tpu.memory_space<vmem>>, vector<64x256xf32>
    %32 = vector.extract_strided_slice %30 {offsets = [0, 0], sizes = [2, 192], strides = [1, 1]} : vector<2x256xf32> to vector<2x192xf32>
    %33 = arith.negf %32 : vector<2x192xf32>
    %34 = math.exp %33 : vector<2x192xf32>
    %cst_30 = arith.constant 1.000000e+00 : f32
    %35 = vector.broadcast %cst_30 : f32 to vector<2x192xf32>
    %36 = arith.addf %35, %34 : vector<2x192xf32>
    %37 = arith.divf %35, %36 : vector<2x192xf32>
    %38 = vector.extract_strided_slice %30 {offsets = [0, 192], sizes = [2, 64], strides = [1, 1]} : vector<2x256xf32> to vector<2x64xf32>
    %39 = math.tanh %38 : vector<2x64xf32>
    %40 = vector.extract_strided_slice %37 {offsets = [0, 0], sizes = [2, 64], strides = [1, 1]} : vector<2x192xf32> to vector<2x64xf32>
    %41 = vector.extract_strided_slice %37 {offsets = [0, 128], sizes = [2, 64], strides = [1, 1]} : vector<2x192xf32> to vector<2x64xf32>
    %42 = arith.mulf %40, %39 : vector<2x64xf32>
    %43 = math.tanh %42 : vector<2x64xf32>
    %44 = arith.mulf %41, %43 : vector<2x64xf32>
    %45 = vector.extract_strided_slice %44 {offsets = [0, 0], sizes = [1, 32], strides = [1, 1]} : vector<2x64xf32> to vector<1x32xf32>
    %c0_31 = arith.constant 0 : index
    %c0_32 = arith.constant 0 : index
    %46 = vector.load %arg15[%c0_31, %c0_32] : memref<16x64xf32, #tpu.memory_space<vmem>>, vector<1x32xf32>
    tpu.vector_store %arg15[%c0_31, %c0_32], %45 {strides = array<i32>} : memref<16x64xf32, #tpu.memory_space<vmem>>, vector<1x32xf32>,
    %47 = vector.extract_strided_slice %44 {offsets = [0, 32], sizes = [1, 32], strides = [1, 1]} : vector<2x64xf32> to vector<1x32xf32>
    %c7 = arith.constant 7 : index
    %c32_33 = arith.constant 32 : index
    %48 = vector.load %arg15[%c7, %c32_33] : memref<16x64xf32, #tpu.memory_space<vmem>>, vector<1x32xf32>
    tpu.vector_store %arg15[%c7, %c32_33], %47 {strides = array<i32>} : memref<16x64xf32, #tpu.memory_space<vmem>>, vector<1x32xf32>,
    %49 = vector.extract_strided_slice %44 {offsets = [1, 0], sizes = [1, 32], strides = [1, 1]} : vector<2x64xf32> to vector<1x32xf32>
    %c8 = arith.constant 8 : index
    %c0_34 = arith.constant 0 : index
    %50 = vector.load %arg15[%c8, %c0_34] : memref<16x64xf32, #tpu.memory_space<vmem>>, vector<1x32xf32>
    tpu.vector_store %arg15[%c8, %c0_34], %49 {strides = array<i32>} : memref<16x64xf32, #tpu.memory_space<vmem>>, vector<1x32xf32>,
    %51 = vector.extract_strided_slice %44 {offsets = [1, 32], sizes = [1, 32], strides = [1, 1]} : vector<2x64xf32> to vector<1x32xf32>
    %c15 = arith.constant 15 : index
    %c32_35 = arith.constant 32 : index
    %52 = vector.load %arg15[%c15, %c32_35] : memref<16x64xf32, #tpu.memory_space<vmem>>, vector<1x32xf32>
    tpu.vector_store %arg15[%c15, %c32_35], %51 {strides = array<i32>} : memref<16x64xf32, #tpu.memory_space<vmem>>, vector<1x32xf32>,
    %cst_36 = arith.constant dense<0.000000e+00> : vector<2x256xf32>
    %53 = tpu.matmul %44, %31, %cst_36 {dimension_numbers = #tpu.dot_dimension_numbers<[1], [0], [0], [1], [0, 0, 1, 1], [], []>, precision = #tpu.contract_precision<fp32>} : vector<2x64xf32>, vector<64x256xf32>, vector<2x256xf32> -> vector<2x256xf32>
    %54 = arith.addf %30, %53 : vector<2x256xf32>
    %55 = vector.extract_strided_slice %54 {offsets = [0, 0], sizes = [2, 192], strides = [1, 1]} : vector<2x256xf32> to vector<2x192xf32>
    %56 = arith.negf %55 : vector<2x192xf32>
    %57 = math.exp %56 : vector<2x192xf32>
    %cst_37 = arith.constant 1.000000e+00 : f32
    %58 = vector.broadcast %cst_37 : f32 to vector<2x192xf32>
    %59 = arith.addf %58, %57 : vector<2x192xf32>
    %60 = arith.divf %58, %59 : vector<2x192xf32>
    %61 = vector.extract_strided_slice %54 {offsets = [0, 192], sizes = [2, 64], strides = [1, 1]} : vector<2x256xf32> to vector<2x64xf32>
    %62 = math.tanh %61 : vector<2x64xf32>
    %63 = vector.extract_strided_slice %60 {offsets = [0, 0], sizes = [2, 64], strides = [1, 1]} : vector<2x192xf32> to vector<2x64xf32>
    %64 = vector.extract_strided_slice %60 {offsets = [0, 64], sizes = [2, 64], strides = [1, 1]} : vector<2x192xf32> to vector<2x64xf32>
    %65 = vector.extract_strided_slice %60 {offsets = [0, 128], sizes = [2, 64], strides = [1, 1]} : vector<2x192xf32> to vector<2x64xf32>
    %66 = arith.mulf %64, %42 : vector<2x64xf32>
    %67 = arith.mulf %63, %62 : vector<2x64xf32>
    %68 = arith.addf %66, %67 : vector<2x64xf32>
    %69 = math.tanh %68 : vector<2x64xf32>
    %70 = arith.mulf %65, %69 : vector<2x64xf32>
    %71 = vector.extract_strided_slice %70 {offsets = [0, 0], sizes = [1, 32], strides = [1, 1]} : vector<2x64xf32> to vector<1x32xf32>
    %c1 = arith.constant 1 : index
    %c0_38 = arith.constant 0 : index
    %72 = vector.load %arg15[%c1, %c0_38] : memref<16x64xf32, #tpu.memory_space<vmem>>, vector<1x32xf32>
    tpu.vector_store %arg15[%c1, %c0_38], %71 {strides = array<i32>} : memref<16x64xf32, #tpu.memory_space<vmem>>, vector<1x32xf32>,
    %73 = vector.extract_strided_slice %70 {offsets = [0, 32], sizes = [1, 32], strides = [1, 1]} : vector<2x64xf32> to vector<1x32xf32>
    %c6 = arith.constant 6 : index
    %c32_39 = arith.constant 32 : index
    %74 = vector.load %arg15[%c6, %c32_39] : memref<16x64xf32, #tpu.memory_space<vmem>>, vector<1x32xf32>
    tpu.vector_store %arg15[%c6, %c32_39], %73 {strides = array<i32>} : memref<16x64xf32, #tpu.memory_space<vmem>>, vector<1x32xf32>,
    %75 = vector.extract_strided_slice %70 {offsets = [1, 0], sizes = [1, 32], strides = [1, 1]} : vector<2x64xf32> to vector<1x32xf32>
    %c9 = arith.constant 9 : index
    %c0_40 = arith.constant 0 : index
    %76 = vector.load %arg15[%c9, %c0_40] : memref<16x64xf32, #tpu.memory_space<vmem>>, vector<1x32xf32>
    tpu.vector_store %arg15[%c9, %c0_40], %75 {strides = array<i32>} : memref<16x64xf32, #tpu.memory_space<vmem>>, vector<1x32xf32>,
    %77 = vector.extract_strided_slice %70 {offsets = [1, 32], sizes = [1, 32], strides = [1, 1]} : vector<2x64xf32> to vector<1x32xf32>
    %c14 = arith.constant 14 : index
    %c32_41 = arith.constant 32 : index
    %78 = vector.load %arg15[%c14, %c32_41] : memref<16x64xf32, #tpu.memory_space<vmem>>, vector<1x32xf32>
    tpu.vector_store %arg15[%c14, %c32_41], %77 {strides = array<i32>} : memref<16x64xf32, #tpu.memory_space<vmem>>, vector<1x32xf32>,
    %cst_42 = arith.constant dense<0.000000e+00> : vector<2x256xf32>
    %79 = tpu.matmul %70, %31, %cst_42 {dimension_numbers = #tpu.dot_dimension_numbers<[1], [0], [0], [1], [0, 0, 1, 1], [], []>, precision = #tpu.contract_precision<fp32>} : vector<2x64xf32>, vector<64x256xf32>, vector<2x256xf32> -> vector<2x256xf32>
    %80 = arith.addf %30, %79 : vector<2x256xf32>
    %81 = vector.extract_strided_slice %80 {offsets = [0, 0], sizes = [2, 192], strides = [1, 1]} : vector<2x256xf32> to vector<2x192xf32>
    %82 = arith.negf %81 : vector<2x192xf32>
    %83 = math.exp %82 : vector<2x192xf32>
    %cst_43 = arith.constant 1.000000e+00 : f32
    %84 = vector.broadcast %cst_43 : f32 to vector<2x192xf32>
    %85 = arith.addf %84, %83 : vector<2x192xf32>
    %86 = arith.divf %84, %85 : vector<2x192xf32>
    %87 = vector.extract_strided_slice %80 {offsets = [0, 192], sizes = [2, 64], strides = [1, 1]} : vector<2x256xf32> to vector<2x64xf32>
    %88 = math.tanh %87 : vector<2x64xf32>
    %89 = vector.extract_strided_slice %86 {offsets = [0, 0], sizes = [2, 64], strides = [1, 1]} : vector<2x192xf32> to vector<2x64xf32>
    %90 = vector.extract_strided_slice %86 {offsets = [0, 64], sizes = [2, 64], strides = [1, 1]} : vector<2x192xf32> to vector<2x64xf32>
    %91 = vector.extract_strided_slice %86 {offsets = [0, 128], sizes = [2, 64], strides = [1, 1]} : vector<2x192xf32> to vector<2x64xf32>
    %92 = arith.mulf %90, %68 : vector<2x64xf32>
    %93 = arith.mulf %89, %88 : vector<2x64xf32>
    %94 = arith.addf %92, %93 : vector<2x64xf32>
    %95 = math.tanh %94 : vector<2x64xf32>
    %96 = arith.mulf %91, %95 : vector<2x64xf32>
    %97 = vector.extract_strided_slice %96 {offsets = [0, 0], sizes = [1, 32], strides = [1, 1]} : vector<2x64xf32> to vector<1x32xf32>
    %c2 = arith.constant 2 : index
    %c0_44 = arith.constant 0 : index
    %98 = vector.load %arg15[%c2, %c0_44] : memref<16x64xf32, #tpu.memory_space<vmem>>, vector<1x32xf32>
    tpu.vector_store %arg15[%c2, %c0_44], %97 {strides = array<i32>} : memref<16x64xf32, #tpu.memory_space<vmem>>, vector<1x32xf32>,
    %99 = vector.extract_strided_slice %96 {offsets = [0, 32], sizes = [1, 32], strides = [1, 1]} : vector<2x64xf32> to vector<1x32xf32>
    %c5 = arith.constant 5 : index
    %c32_45 = arith.constant 32 : index
    %100 = vector.load %arg15[%c5, %c32_45] : memref<16x64xf32, #tpu.memory_space<vmem>>, vector<1x32xf32>
    tpu.vector_store %arg15[%c5, %c32_45], %99 {strides = array<i32>} : memref<16x64xf32, #tpu.memory_space<vmem>>, vector<1x32xf32>,
    %101 = vector.extract_strided_slice %96 {offsets = [1, 0], sizes = [1, 32], strides = [1, 1]} : vector<2x64xf32> to vector<1x32xf32>
    %c10 = arith.constant 10 : index
    %c0_46 = arith.constant 0 : index
    %102 = vector.load %arg15[%c10, %c0_46] : memref<16x64xf32, #tpu.memory_space<vmem>>, vector<1x32xf32>
    tpu.vector_store %arg15[%c10, %c0_46], %101 {strides = array<i32>} : memref<16x64xf32, #tpu.memory_space<vmem>>, vector<1x32xf32>,
    %103 = vector.extract_strided_slice %96 {offsets = [1, 32], sizes = [1, 32], strides = [1, 1]} : vector<2x64xf32> to vector<1x32xf32>
    %c13 = arith.constant 13 : index
    %c32_47 = arith.constant 32 : index
    %104 = vector.load %arg15[%c13, %c32_47] : memref<16x64xf32, #tpu.memory_space<vmem>>, vector<1x32xf32>
    tpu.vector_store %arg15[%c13, %c32_47], %103 {strides = array<i32>} : memref<16x64xf32, #tpu.memory_space<vmem>>, vector<1x32xf32>,
    %cst_48 = arith.constant dense<0.000000e+00> : vector<2x256xf32>
    %105 = tpu.matmul %96, %31, %cst_48 {dimension_numbers = #tpu.dot_dimension_numbers<[1], [0], [0], [1], [0, 0, 1, 1], [], []>, precision = #tpu.contract_precision<fp32>} : vector<2x64xf32>, vector<64x256xf32>, vector<2x256xf32> -> vector<2x256xf32>
    %106 = arith.addf %30, %105 : vector<2x256xf32>
    %107 = vector.extract_strided_slice %106 {offsets = [0, 0], sizes = [2, 192], strides = [1, 1]} : vector<2x256xf32> to vector<2x192xf32>
    %108 = arith.negf %107 : vector<2x192xf32>
    %109 = math.exp %108 : vector<2x192xf32>
    %cst_49 = arith.constant 1.000000e+00 : f32
    %110 = vector.broadcast %cst_49 : f32 to vector<2x192xf32>
    %111 = arith.addf %110, %109 : vector<2x192xf32>
    %112 = arith.divf %110, %111 : vector<2x192xf32>
    %113 = vector.extract_strided_slice %106 {offsets = [0, 192], sizes = [2, 64], strides = [1, 1]} : vector<2x256xf32> to vector<2x64xf32>
    %114 = math.tanh %113 : vector<2x64xf32>
    %115 = vector.extract_strided_slice %112 {offsets = [0, 0], sizes = [2, 64], strides = [1, 1]} : vector<2x192xf32> to vector<2x64xf32>
    %116 = vector.extract_strided_slice %112 {offsets = [0, 64], sizes = [2, 64], strides = [1, 1]} : vector<2x192xf32> to vector<2x64xf32>
    %117 = vector.extract_strided_slice %112 {offsets = [0, 128], sizes = [2, 64], strides = [1, 1]} : vector<2x192xf32> to vector<2x64xf32>
    %118 = arith.mulf %116, %94 : vector<2x64xf32>
    %119 = arith.mulf %115, %114 : vector<2x64xf32>
    %120 = arith.addf %118, %119 : vector<2x64xf32>
    %121 = math.tanh %120 : vector<2x64xf32>
    %122 = arith.mulf %117, %121 : vector<2x64xf32>
    %123 = vector.extract_strided_slice %122 {offsets = [0, 0], sizes = [1, 32], strides = [1, 1]} : vector<2x64xf32> to vector<1x32xf32>
    %c3 = arith.constant 3 : index
    %c0_50 = arith.constant 0 : index
    %124 = vector.load %arg15[%c3, %c0_50] : memref<16x64xf32, #tpu.memory_space<vmem>>, vector<1x32xf32>
    tpu.vector_store %arg15[%c3, %c0_50], %123 {strides = array<i32>} : memref<16x64xf32, #tpu.memory_space<vmem>>, vector<1x32xf32>,
    %125 = vector.extract_strided_slice %122 {offsets = [0, 32], sizes = [1, 32], strides = [1, 1]} : vector<2x64xf32> to vector<1x32xf32>
    %c4 = arith.constant 4 : index
    %c32_51 = arith.constant 32 : index
    %126 = vector.load %arg15[%c4, %c32_51] : memref<16x64xf32, #tpu.memory_space<vmem>>, vector<1x32xf32>
    tpu.vector_store %arg15[%c4, %c32_51], %125 {strides = array<i32>} : memref<16x64xf32, #tpu.memory_space<vmem>>, vector<1x32xf32>,
    %127 = vector.extract_strided_slice %122 {offsets = [1, 0], sizes = [1, 32], strides = [1, 1]} : vector<2x64xf32> to vector<1x32xf32>
    %c11 = arith.constant 11 : index
    %c0_52 = arith.constant 0 : index
    %128 = vector.load %arg15[%c11, %c0_52] : memref<16x64xf32, #tpu.memory_space<vmem>>, vector<1x32xf32>
    tpu.vector_store %arg15[%c11, %c0_52], %127 {strides = array<i32>} : memref<16x64xf32, #tpu.memory_space<vmem>>, vector<1x32xf32>,
    %129 = vector.extract_strided_slice %122 {offsets = [1, 32], sizes = [1, 32], strides = [1, 1]} : vector<2x64xf32> to vector<1x32xf32>
    %c12 = arith.constant 12 : index
    %c32_53 = arith.constant 32 : index
    %130 = vector.load %arg15[%c12, %c32_53] : memref<16x64xf32, #tpu.memory_space<vmem>>, vector<1x32xf32>
    tpu.vector_store %arg15[%c12, %c32_53], %129 {strides = array<i32>} : memref<16x64xf32, #tpu.memory_space<vmem>>, vector<1x32xf32>,
    %cst_54 = arith.constant dense<0.000000e+00> : vector<2x256xf32>
    %131 = tpu.matmul %122, %31, %cst_54 {dimension_numbers = #tpu.dot_dimension_numbers<[1], [0], [0], [1], [0, 0, 1, 1], [], []>, precision = #tpu.contract_precision<fp32>} : vector<2x64xf32>, vector<64x256xf32>, vector<2x256xf32> -> vector<2x256xf32>
    %132 = arith.addf %30, %131 : vector<2x256xf32>
    %133 = vector.extract_strided_slice %132 {offsets = [0, 0], sizes = [2, 192], strides = [1, 1]} : vector<2x256xf32> to vector<2x192xf32>
    %134 = arith.negf %133 : vector<2x192xf32>
    %135 = math.exp %134 : vector<2x192xf32>
    %cst_55 = arith.constant 1.000000e+00 : f32
    %136 = vector.broadcast %cst_55 : f32 to vector<2x192xf32>
    %137 = arith.addf %136, %135 : vector<2x192xf32>
    %138 = arith.divf %136, %137 : vector<2x192xf32>
    %139 = vector.extract_strided_slice %132 {offsets = [0, 192], sizes = [2, 64], strides = [1, 1]} : vector<2x256xf32> to vector<2x64xf32>
    %140 = math.tanh %139 : vector<2x64xf32>
    %141 = vector.extract_strided_slice %138 {offsets = [0, 0], sizes = [2, 64], strides = [1, 1]} : vector<2x192xf32> to vector<2x64xf32>
    %142 = vector.extract_strided_slice %138 {offsets = [0, 64], sizes = [2, 64], strides = [1, 1]} : vector<2x192xf32> to vector<2x64xf32>
    %143 = vector.extract_strided_slice %138 {offsets = [0, 128], sizes = [2, 64], strides = [1, 1]} : vector<2x192xf32> to vector<2x64xf32>
    %144 = arith.mulf %142, %120 : vector<2x64xf32>
    %145 = arith.mulf %141, %140 : vector<2x64xf32>
    %146 = arith.addf %144, %145 : vector<2x64xf32>
    %147 = math.tanh %146 : vector<2x64xf32>
    %148 = arith.mulf %143, %147 : vector<2x64xf32>
    %149 = vector.extract_strided_slice %148 {offsets = [0, 0], sizes = [1, 32], strides = [1, 1]} : vector<2x64xf32> to vector<1x32xf32>
    %c4_56 = arith.constant 4 : index
    %c0_57 = arith.constant 0 : index
    %150 = vector.load %arg15[%c4_56, %c0_57] : memref<16x64xf32, #tpu.memory_space<vmem>>, vector<1x32xf32>
    tpu.vector_store %arg15[%c4_56, %c0_57], %149 {strides = array<i32>} : memref<16x64xf32, #tpu.memory_space<vmem>>, vector<1x32xf32>,
    %151 = vector.extract_strided_slice %148 {offsets = [0, 32], sizes = [1, 32], strides = [1, 1]} : vector<2x64xf32> to vector<1x32xf32>
    %c3_58 = arith.constant 3 : index
    %c32_59 = arith.constant 32 : index
    %152 = vector.load %arg15[%c3_58, %c32_59] : memref<16x64xf32, #tpu.memory_space<vmem>>, vector<1x32xf32>
    tpu.vector_store %arg15[%c3_58, %c32_59], %151 {strides = array<i32>} : memref<16x64xf32, #tpu.memory_space<vmem>>, vector<1x32xf32>,
    %153 = vector.extract_strided_slice %148 {offsets = [1, 0], sizes = [1, 32], strides = [1, 1]} : vector<2x64xf32> to vector<1x32xf32>
    %c12_60 = arith.constant 12 : index
    %c0_61 = arith.constant 0 : index
    %154 = vector.load %arg15[%c12_60, %c0_61] : memref<16x64xf32, #tpu.memory_space<vmem>>, vector<1x32xf32>
    tpu.vector_store %arg15[%c12_60, %c0_61], %153 {strides = array<i32>} : memref<16x64xf32, #tpu.memory_space<vmem>>, vector<1x32xf32>,
    %155 = vector.extract_strided_slice %148 {offsets = [1, 32], sizes = [1, 32], strides = [1, 1]} : vector<2x64xf32> to vector<1x32xf32>
    %c11_62 = arith.constant 11 : index
    %c32_63 = arith.constant 32 : index
    %156 = vector.load %arg15[%c11_62, %c32_63] : memref<16x64xf32, #tpu.memory_space<vmem>>, vector<1x32xf32>
    tpu.vector_store %arg15[%c11_62, %c32_63], %155 {strides = array<i32>} : memref<16x64xf32, #tpu.memory_space<vmem>>, vector<1x32xf32>,
    %cst_64 = arith.constant dense<0.000000e+00> : vector<2x256xf32>
    %157 = tpu.matmul %148, %31, %cst_64 {dimension_numbers = #tpu.dot_dimension_numbers<[1], [0], [0], [1], [0, 0, 1, 1], [], []>, precision = #tpu.contract_precision<fp32>} : vector<2x64xf32>, vector<64x256xf32>, vector<2x256xf32> -> vector<2x256xf32>
    %158 = arith.addf %30, %157 : vector<2x256xf32>
    %159 = vector.extract_strided_slice %158 {offsets = [0, 0], sizes = [2, 192], strides = [1, 1]} : vector<2x256xf32> to vector<2x192xf32>
    %160 = arith.negf %159 : vector<2x192xf32>
    %161 = math.exp %160 : vector<2x192xf32>
    %cst_65 = arith.constant 1.000000e+00 : f32
    %162 = vector.broadcast %cst_65 : f32 to vector<2x192xf32>
    %163 = arith.addf %162, %161 : vector<2x192xf32>
    %164 = arith.divf %162, %163 : vector<2x192xf32>
    %165 = vector.extract_strided_slice %158 {offsets = [0, 192], sizes = [2, 64], strides = [1, 1]} : vector<2x256xf32> to vector<2x64xf32>
    %166 = math.tanh %165 : vector<2x64xf32>
    %167 = vector.extract_strided_slice %164 {offsets = [0, 0], sizes = [2, 64], strides = [1, 1]} : vector<2x192xf32> to vector<2x64xf32>
    %168 = vector.extract_strided_slice %164 {offsets = [0, 64], sizes = [2, 64], strides = [1, 1]} : vector<2x192xf32> to vector<2x64xf32>
    %169 = vector.extract_strided_slice %164 {offsets = [0, 128], sizes = [2, 64], strides = [1, 1]} : vector<2x192xf32> to vector<2x64xf32>
    %170 = arith.mulf %168, %146 : vector<2x64xf32>
    %171 = arith.mulf %167, %166 : vector<2x64xf32>
    %172 = arith.addf %170, %171 : vector<2x64xf32>
    %173 = math.tanh %172 : vector<2x64xf32>
    %174 = arith.mulf %169, %173 : vector<2x64xf32>
    %175 = vector.extract_strided_slice %174 {offsets = [0, 0], sizes = [1, 32], strides = [1, 1]} : vector<2x64xf32> to vector<1x32xf32>
    %c5_66 = arith.constant 5 : index
    %c0_67 = arith.constant 0 : index
    %176 = vector.load %arg15[%c5_66, %c0_67] : memref<16x64xf32, #tpu.memory_space<vmem>>, vector<1x32xf32>
    tpu.vector_store %arg15[%c5_66, %c0_67], %175 {strides = array<i32>} : memref<16x64xf32, #tpu.memory_space<vmem>>, vector<1x32xf32>,
    %177 = vector.extract_strided_slice %174 {offsets = [0, 32], sizes = [1, 32], strides = [1, 1]} : vector<2x64xf32> to vector<1x32xf32>
    %c2_68 = arith.constant 2 : index
    %c32_69 = arith.constant 32 : index
    %178 = vector.load %arg15[%c2_68, %c32_69] : memref<16x64xf32, #tpu.memory_space<vmem>>, vector<1x32xf32>
    tpu.vector_store %arg15[%c2_68, %c32_69], %177 {strides = array<i32>} : memref<16x64xf32, #tpu.memory_space<vmem>>, vector<1x32xf32>,
    %179 = vector.extract_strided_slice %174 {offsets = [1, 0], sizes = [1, 32], strides = [1, 1]} : vector<2x64xf32> to vector<1x32xf32>
    %c13_70 = arith.constant 13 : index
    %c0_71 = arith.constant 0 : index
    %180 = vector.load %arg15[%c13_70, %c0_71] : memref<16x64xf32, #tpu.memory_space<vmem>>, vector<1x32xf32>
    tpu.vector_store %arg15[%c13_70, %c0_71], %179 {strides = array<i32>} : memref<16x64xf32, #tpu.memory_space<vmem>>, vector<1x32xf32>,
    %181 = vector.extract_strided_slice %174 {offsets = [1, 32], sizes = [1, 32], strides = [1, 1]} : vector<2x64xf32> to vector<1x32xf32>
    %c10_72 = arith.constant 10 : index
    %c32_73 = arith.constant 32 : index
    %182 = vector.load %arg15[%c10_72, %c32_73] : memref<16x64xf32, #tpu.memory_space<vmem>>, vector<1x32xf32>
    tpu.vector_store %arg15[%c10_72, %c32_73], %181 {strides = array<i32>} : memref<16x64xf32, #tpu.memory_space<vmem>>, vector<1x32xf32>,
    %cst_74 = arith.constant dense<0.000000e+00> : vector<2x256xf32>
    %183 = tpu.matmul %174, %31, %cst_74 {dimension_numbers = #tpu.dot_dimension_numbers<[1], [0], [0], [1], [0, 0, 1, 1], [], []>, precision = #tpu.contract_precision<fp32>} : vector<2x64xf32>, vector<64x256xf32>, vector<2x256xf32> -> vector<2x256xf32>
    %184 = arith.addf %30, %183 : vector<2x256xf32>
    %185 = vector.extract_strided_slice %184 {offsets = [0, 0], sizes = [2, 192], strides = [1, 1]} : vector<2x256xf32> to vector<2x192xf32>
    %186 = arith.negf %185 : vector<2x192xf32>
    %187 = math.exp %186 : vector<2x192xf32>
    %cst_75 = arith.constant 1.000000e+00 : f32
    %188 = vector.broadcast %cst_75 : f32 to vector<2x192xf32>
    %189 = arith.addf %188, %187 : vector<2x192xf32>
    %190 = arith.divf %188, %189 : vector<2x192xf32>
    %191 = vector.extract_strided_slice %184 {offsets = [0, 192], sizes = [2, 64], strides = [1, 1]} : vector<2x256xf32> to vector<2x64xf32>
    %192 = math.tanh %191 : vector<2x64xf32>
    %193 = vector.extract_strided_slice %190 {offsets = [0, 0], sizes = [2, 64], strides = [1, 1]} : vector<2x192xf32> to vector<2x64xf32>
    %194 = vector.extract_strided_slice %190 {offsets = [0, 64], sizes = [2, 64], strides = [1, 1]} : vector<2x192xf32> to vector<2x64xf32>
    %195 = vector.extract_strided_slice %190 {offsets = [0, 128], sizes = [2, 64], strides = [1, 1]} : vector<2x192xf32> to vector<2x64xf32>
    %196 = arith.mulf %194, %172 : vector<2x64xf32>
    %197 = arith.mulf %193, %192 : vector<2x64xf32>
    %198 = arith.addf %196, %197 : vector<2x64xf32>
    %199 = math.tanh %198 : vector<2x64xf32>
    %200 = arith.mulf %195, %199 : vector<2x64xf32>
    %201 = vector.extract_strided_slice %200 {offsets = [0, 0], sizes = [1, 32], strides = [1, 1]} : vector<2x64xf32> to vector<1x32xf32>
    %c6_76 = arith.constant 6 : index
    %c0_77 = arith.constant 0 : index
    %202 = vector.load %arg15[%c6_76, %c0_77] : memref<16x64xf32, #tpu.memory_space<vmem>>, vector<1x32xf32>
    tpu.vector_store %arg15[%c6_76, %c0_77], %201 {strides = array<i32>} : memref<16x64xf32, #tpu.memory_space<vmem>>, vector<1x32xf32>,
    %203 = vector.extract_strided_slice %200 {offsets = [0, 32], sizes = [1, 32], strides = [1, 1]} : vector<2x64xf32> to vector<1x32xf32>
    %c1_78 = arith.constant 1 : index
    %c32_79 = arith.constant 32 : index
    %204 = vector.load %arg15[%c1_78, %c32_79] : memref<16x64xf32, #tpu.memory_space<vmem>>, vector<1x32xf32>
    tpu.vector_store %arg15[%c1_78, %c32_79], %203 {strides = array<i32>} : memref<16x64xf32, #tpu.memory_space<vmem>>, vector<1x32xf32>,
    %205 = vector.extract_strided_slice %200 {offsets = [1, 0], sizes = [1, 32], strides = [1, 1]} : vector<2x64xf32> to vector<1x32xf32>
    %c14_80 = arith.constant 14 : index
    %c0_81 = arith.constant 0 : index
    %206 = vector.load %arg15[%c14_80, %c0_81] : memref<16x64xf32, #tpu.memory_space<vmem>>, vector<1x32xf32>
    tpu.vector_store %arg15[%c14_80, %c0_81], %205 {strides = array<i32>} : memref<16x64xf32, #tpu.memory_space<vmem>>, vector<1x32xf32>,
    %207 = vector.extract_strided_slice %200 {offsets = [1, 32], sizes = [1, 32], strides = [1, 1]} : vector<2x64xf32> to vector<1x32xf32>
    %c9_82 = arith.constant 9 : index
    %c32_83 = arith.constant 32 : index
    %208 = vector.load %arg15[%c9_82, %c32_83] : memref<16x64xf32, #tpu.memory_space<vmem>>, vector<1x32xf32>
    tpu.vector_store %arg15[%c9_82, %c32_83], %207 {strides = array<i32>} : memref<16x64xf32, #tpu.memory_space<vmem>>, vector<1x32xf32>,
    %cst_84 = arith.constant dense<0.000000e+00> : vector<2x256xf32>
    %209 = tpu.matmul %200, %31, %cst_84 {dimension_numbers = #tpu.dot_dimension_numbers<[1], [0], [0], [1], [0, 0, 1, 1], [], []>, precision = #tpu.contract_precision<fp32>} : vector<2x64xf32>, vector<64x256xf32>, vector<2x256xf32> -> vector<2x256xf32>
    %210 = arith.addf %30, %209 : vector<2x256xf32>
    %211 = vector.extract_strided_slice %210 {offsets = [0, 0], sizes = [2, 192], strides = [1, 1]} : vector<2x256xf32> to vector<2x192xf32>
    %212 = arith.negf %211 : vector<2x192xf32>
    %213 = math.exp %212 : vector<2x192xf32>
    %cst_85 = arith.constant 1.000000e+00 : f32
    %214 = vector.broadcast %cst_85 : f32 to vector<2x192xf32>
    %215 = arith.addf %214, %213 : vector<2x192xf32>
    %216 = arith.divf %214, %215 : vector<2x192xf32>
    %217 = vector.extract_strided_slice %210 {offsets = [0, 192], sizes = [2, 64], strides = [1, 1]} : vector<2x256xf32> to vector<2x64xf32>
    %218 = math.tanh %217 : vector<2x64xf32>
    %219 = vector.extract_strided_slice %216 {offsets = [0, 0], sizes = [2, 64], strides = [1, 1]} : vector<2x192xf32> to vector<2x64xf32>
    %220 = vector.extract_strided_slice %216 {offsets = [0, 64], sizes = [2, 64], strides = [1, 1]} : vector<2x192xf32> to vector<2x64xf32>
    %221 = vector.extract_strided_slice %216 {offsets = [0, 128], sizes = [2, 64], strides = [1, 1]} : vector<2x192xf32> to vector<2x64xf32>
    %222 = arith.mulf %220, %198 : vector<2x64xf32>
    %223 = arith.mulf %219, %218 : vector<2x64xf32>
    %224 = arith.addf %222, %223 : vector<2x64xf32>
    %225 = math.tanh %224 : vector<2x64xf32>
    %226 = arith.mulf %221, %225 : vector<2x64xf32>
    %227 = vector.extract_strided_slice %226 {offsets = [0, 0], sizes = [1, 32], strides = [1, 1]} : vector<2x64xf32> to vector<1x32xf32>
    %c7_86 = arith.constant 7 : index
    %c0_87 = arith.constant 0 : index
    %228 = vector.load %arg15[%c7_86, %c0_87] : memref<16x64xf32, #tpu.memory_space<vmem>>, vector<1x32xf32>
    tpu.vector_store %arg15[%c7_86, %c0_87], %227 {strides = array<i32>} : memref<16x64xf32, #tpu.memory_space<vmem>>, vector<1x32xf32>,
    %229 = vector.extract_strided_slice %226 {offsets = [0, 32], sizes = [1, 32], strides = [1, 1]} : vector<2x64xf32> to vector<1x32xf32>
    %c0_88 = arith.constant 0 : index
    %c32_89 = arith.constant 32 : index
    %230 = vector.load %arg15[%c0_88, %c32_89] : memref<16x64xf32, #tpu.memory_space<vmem>>, vector<1x32xf32>
    tpu.vector_store %arg15[%c0_88, %c32_89], %229 {strides = array<i32>} : memref<16x64xf32, #tpu.memory_space<vmem>>, vector<1x32xf32>,
    %231 = vector.extract_strided_slice %226 {offsets = [1, 0], sizes = [1, 32], strides = [1, 1]} : vector<2x64xf32> to vector<1x32xf32>
    %c15_90 = arith.constant 15 : index
    %c0_91 = arith.constant 0 : index
    %232 = vector.load %arg15[%c15_90, %c0_91] : memref<16x64xf32, #tpu.memory_space<vmem>>, vector<1x32xf32>
    tpu.vector_store %arg15[%c15_90, %c0_91], %231 {strides = array<i32>} : memref<16x64xf32, #tpu.memory_space<vmem>>, vector<1x32xf32>,
    %233 = vector.extract_strided_slice %226 {offsets = [1, 32], sizes = [1, 32], strides = [1, 1]} : vector<2x64xf32> to vector<1x32xf32>
    %c8_92 = arith.constant 8 : index
    %c32_93 = arith.constant 32 : index
    %234 = vector.load %arg15[%c8_92, %c32_93] : memref<16x64xf32, #tpu.memory_space<vmem>>, vector<1x32xf32>
    tpu.vector_store %arg15[%c8_92, %c32_93], %233 {strides = array<i32>} : memref<16x64xf32, #tpu.memory_space<vmem>>, vector<1x32xf32>,
    %c0_94 = arith.constant 0 : index
    %c0_95 = arith.constant 0 : index
    %235 = vector.load %arg15[%c0_94, %c0_95] : memref<16x64xf32, #tpu.memory_space<vmem>>, vector<16x64xf32>
    %c0_96 = arith.constant 0 : index
    %c0_97 = arith.constant 0 : index
    %236 = vector.load %arg11[%c0_96, %c0_97] : memref<64x16xf32, #tpu.memory_space<vmem>>, vector<64x16xf32>
    %cst_98 = arith.constant dense<0.000000e+00> : vector<16x16xf32>
    %237 = tpu.matmul %235, %236, %cst_98 {dimension_numbers = #tpu.dot_dimension_numbers<[1], [0], [0], [1], [0, 0, 1, 1], [], []>, precision = #tpu.contract_precision<fp32>} : vector<16x64xf32>, vector<64x16xf32>, vector<16x16xf32> -> vector<16x16xf32>
    %c0_99 = arith.constant 0 : index
    %c0_100 = arith.constant 0 : index
    %238 = vector.load %arg12[%c0_99, %c0_100] : memref<16x16xf32, #tpu.memory_space<vmem>>, vector<16x16xf32>
    %239 = arith.addf %237, %238 : vector<16x16xf32>
    %c0_101 = arith.constant 0 : index
    %c0_102 = arith.constant 0 : index
    %240 = vector.load %arg13[%c0_101, %c0_102] : memref<16x16xf32, #tpu.memory_space<vmem>>, vector<16x16xf32>
    tpu.vector_store %arg13[%c0_101, %c0_102], %239 {strides = array<i32>} : memref<16x16xf32, #tpu.memory_space<vmem>>, vector<16x16xf32>,
    return
  }
}

</mosaic_0001>

<bundles_post_ra>
// kernel: squeeze.1
= control target key start
LH: loop header
LB: loop body
LE: loop exit
PB: predicated region body
PF: predicated region fallthrough
CT: control target
= control target key end

     0   :  { %s7_s6 = smov 3  ;;  %s21_s9 = smov 3  ;;  %vm4_vm0 = vcmask 130048   ;;  %vm11_vm1 = vcmask 1048448   ;;  %vm18_vm2 = vcmask 917248   ;;  %vm25_vm3 = vcmask 786048   ;;  %s121_s0 = inlined_call_operand.vmem [shape: f32[2,1,8,16], index: 0, kind: input, shape index: {}]   ;;  %s122_s1 = inlined_call_operand.vmem [shape: f32[2,128], index: 1, kind: output, shape index: {}]  }
   0x1   :  { %v63_v0 = vld [vmem:[%s121_s0 + $0x7] ss:$8 sm:%s7_s6]   ;;  %s77_s10 = smov 112   ;;  %v65_v1 = vld [vmem:[%s121_s0 + $0x5] ss:$8 sm:%s21_s9]   ;;  %s14_s13 = smov 3 }
   0x2   :  { %9 = vrot.lane.b32.xlu0 %v63_v0, %s77_s10  ;;  %s78_s14 = smov 80   ;;  %v64_v2 = vld [vmem:[%s121_s0 + $0x6] ss:$8 sm:%s14_s13]   ;;  %s28_s17 = smov 3  ;;  %vm32_vm4 = vcmask 654848   ;;  %vm39_vm5 = vcmask 523648  }
   0x3   :  { %23 = vrot.lane.b32.xlu1 %v65_v1, %s78_s14  ;;  %v66_v3 = vld [vmem:[%s121_s0 + $0x4] ss:$8 sm:%s28_s17]   ;;  %s35_s20 = smov 3  ;;  %s42_s21 = smov 3  ;;  %vm46_vm6 = vcmask 392448   ;;  %vm53_vm7 = vcmask 261248  }
   0x4   :  { %s79_s22 = smov 96   ;;  %s80_s23 = smov 64   ;;  %v67_v4 = vld [vmem:[%s121_s0 + $0x3] ss:$8 sm:%s35_s20]   ;;  %v68_v5 = vld [vmem:[%s121_s0 + $0x2] ss:$8 sm:%s42_s21]  }
   0x5   :  { %s2_s26 = smov 3  ;;  %s49_s29 = smov 3 }
   0x6   :  { %16 = vrot.lane.b32.xlu0 %v64_v2, %s79_s22  ;;  %v3_v6 = vld [vmem:[%s121_s0] ss:$8 sm:%s2_s26]   ;;  %s81_s3 = smov 48   ;;  %s82_s4 = smov 32  }
   0x7   :  { %30 = vrot.lane.b32.xlu1 %v66_v3, %s80_s23  ;;  %5 = vst.msk [vmem:[#allocation0] sm:$0x3] %vm4_vm0, %v3_v6   ;;  %v69_v7 = vld [vmem:[%s121_s0 + $0x1] ss:$8 sm:%s49_s29]   ;;  %s83_s0 = smov 16  }
   0xa   :  { %37 = vrot.lane.b32.xlu0 %v67_v4, %s81_s3 }
   0xb   :  { %44 = vrot.lane.b32.xlu1 %v68_v5, %s82_s4 }
   0xe   :  { %51 = vrot.lane.b32.xlu0 %v69_v7, %s83_s0 }
  0x74   :  { %v10_v8 = vpop.permute.xlu0 %9  }
  0x75   :  { %12 = vst.msk [vmem:[#allocation0] sm:$0x3] %vm11_vm1, %v10_v8   ;;  %v24_v9 = vpop.permute.xlu1 %23  }
  0x78   :  { %v17_v10 = vpop.permute.xlu0 %16  }
  0x79   :  { %19 = vst.msk [vmem:[#allocation0] sm:$0x3] %vm18_vm2, %v17_v10   ;;  %v31_v11 = vpop.permute.xlu1 %30  }
  0x7a   :  { %26 = vst.msk [vmem:[#allocation0] sm:$0x3] %vm25_vm3, %v24_v9  }
  0x7b   :  { %33 = vst.msk [vmem:[#allocation0] sm:$0x3] %vm32_vm4, %v31_v11  }
  0x7c   :  { %v38_v12 = vpop.permute.xlu0 %37  }
  0x7d   :  { %40 = vst.msk [vmem:[#allocation0] sm:$0x3] %vm39_vm5, %v38_v12   ;;  %v45_v13 = vpop.permute.xlu1 %44  }
  0x7e   :  { %47 = vst.msk [vmem:[#allocation0] sm:$0x3] %vm46_vm6, %v45_v13  }
  0x80   :  { %v52_v14 = vpop.permute.xlu0 %51  }
  0x81   :  { %54 = vst.msk [vmem:[#allocation0] sm:$0x3] %vm53_vm7, %v52_v14  }
  0x88   :  { %v59_v15 = vld [vmem:[#allocation0] sm:$0x3] }
  0x89   :  { %62 = vst [vmem:[%s122_s1] sm:$0x3] %v59_v15 }

// kernel: vae_forward.1
= control target key start
LH: loop header
LB: loop body
LE: loop exit
PB: predicated region body
PF: predicated region fallthrough
CT: control target
= control target key end

     0   :  { %20 = vsyncpa [#allocation4], 0  ;;  %s12537_s0 = inlined_call_operand.vmem [shape: f32[2,128], index: 0, kind: input, shape index: {}]   ;;  %s12538_s1 = inlined_call_operand.vmem [shape: f32[128,128], index: 1, kind: input, shape index: {}]   ;;  %s12539_s2 = inlined_call_operand.vmem [shape: f32[2,128], index: 2, kind: input, shape index: {}]   ;;  %s12540_s3 = inlined_call_operand.vmem [shape: f32[128,256], index: 3, kind: input, shape index: {}]   ;;  %s12541_s4 = inlined_call_operand.vmem [shape: f32[2,256], index: 4, kind: input, shape index: {}]   ;;  %s12542_s5 = inlined_call_operand.vmem [shape: f32[256,32], index: 5, kind: input, shape index: {}]   ;;  %s12543_s6 = inlined_call_operand.hbm [shape: f32[2,32], index: 6, kind: input, shape index: {}]   ;;  %s12544_s7 = inlined_call_operand.hbm [shape: f32[2,16], index: 7, kind: input, shape index: {}]   ;;  %s12545_s8 = inlined_call_operand.vmem [shape: f32[16,256], index: 8, kind: input, shape index: {}]   ;;  %s12546_s9 = inlined_call_operand.hbm [shape: f32[64,256], index: 9, kind: input, shape index: {}]   ;;  %s12547_s10 = inlined_call_operand.hbm [shape: f32[2,256], index: 10, kind: input, shape index: {}]   ;;  %s12548_s11 = inlined_call_operand.vmem [shape: f32[64,16], index: 11, kind: input, shape index: {}]   ;;  %s12549_s12 = inlined_call_operand.hbm [shape: f32[16,16], index: 12, kind: input, shape index: {}]   ;;  %s12550_s13 = inlined_call_operand.hbm [shape: f32[16,16], index: 13, kind: output, shape index: {0}]   ;;  %s12551_s14 = inlined_call_operand.vmem [shape: f32[2,48], index: 14, kind: output, shape index: {1}]  }
   0x1   :  { %21 = vsyncpa [#allocation7], 0 }
   0x2   :  { %22 = vsyncpa [#allocation10], 0 }
   0x3   :  { %23 = vsyncpa [#allocation5], 0  ;;  %s9522_s29 = smov [#allocation6]   ;;  %s9523_s15 = smov [#allocation9]  }
   0x4   :  { %s52_s30 = sshll.u32 %s9522_s29, 4  ;;  %s76_s16 = sshll.u32 %s9523_s15, 4  ;;  %s53_s30 = int_to_ptr.vmem [resolvable:$true] %s52_s30  ;;  %s77_s16 = int_to_ptr.vmem [resolvable:$true] %s76_s16 }
   0x5   :  { %s9402_s17 = scalar_lea.vmem %s53_s30, 32  ;;  %p9407_p1 = scmp.lt.s32.totalorder %s53_s30, %s53_s30 }
   0x6   :  { %p9403_p0 = scmp.ne.s32.totalorder %s53_s30, %s9402_s17  ;;  %p9408_p2 = scmp.lt.s32.totalorder %s9402_s17, %s9402_s17 }
   0x8   :  { %p9409_p3 = por %p9408_p2, %p9407_p1 }
   0xa   :  { %p9410_p4 = pnand %p9409_p3, %p9403_p0 }
   0xc   :  { %9413 = shalt.err (!%p9410_p4)
}
   0xd   :  { %55 = dma.hbm_to_vmem [thread:$0]  %s12544_s7, 32, %s53_s30, [#allocation7]  }
   0xe   :  { %s9422_s20 = scalar_lea.vmem %s77_s16, 64  ;;  %p9427_p6 = scmp.lt.s32.totalorder %s77_s16, %s77_s16 }
   0xf   :  { %p9423_p5 = scmp.ne.s32.totalorder %s77_s16, %s9422_s20  ;;  %p9428_p7 = scmp.lt.s32.totalorder %s9422_s20, %s9422_s20 }
  0x11   :  { %p9429_p8 = por %p9428_p7, %p9427_p6 }
  0x13   :  { %p9430_p9 = pnand %p9429_p8, %p9423_p5 }
  0x15   :  { %9433 = shalt.err (!%p9430_p9)
}
  0x16   :  { %79 = dma.hbm_to_vmem [thread:$0]  %s12547_s10, 64, %s77_s16, [#allocation10]  }
  0x17   :  { %s9524_s23 = smov [#allocation3]   ;;  %s9525_s25 = smov [#allocation8]  }
  0x18   :  { %s42_s24 = sshll.u32 %s9524_s23, 4  ;;  %s63_s26 = sshll.u32 %s9525_s25, 4  ;;  %s43_s24 = int_to_ptr.vmem [resolvable:$true] %s42_s24  ;;  %s64_s26 = int_to_ptr.vmem [resolvable:$true] %s63_s26 }
  0x19   :  { %s9442_s27 = scalar_lea.vmem %s43_s24, 32  ;;  %p9447_p11 = scmp.lt.s32.totalorder %s43_s24, %s43_s24 }
  0x1a   :  { %p9443_p10 = scmp.ne.s32.totalorder %s43_s24, %s9442_s27  ;;  %p9448_p12 = scmp.lt.s32.totalorder %s9442_s27, %s9442_s27 }
  0x1c   :  { %p9449_p13 = por %p9448_p12, %p9447_p11 }
  0x1e   :  { %p9450_p0 = pnand %p9449_p13, %p9443_p10 }
  0x20   :  { %9453 = shalt.err (!%p9450_p0)
}
  0x21   :  { %45 = dma.hbm_to_vmem [thread:$0]  %s12543_s6, 32, %s43_s24, [#allocation4]  }
  0x22   :  { %s9462_s29 = scalar_lea.vmem %s64_s26, 2048  ;;  %p9467_p2 = scmp.lt.s32.totalorder %s64_s26, %s64_s26 }
  0x23   :  { %p9463_p1 = scmp.ne.s32.totalorder %s64_s26, %s9462_s29  ;;  %p9468_p3 = scmp.lt.s32.totalorder %s9462_s29, %s9462_s29 }
  0x25   :  { %p9469_p4 = por %p9468_p3, %p9467_p2 }
  0x27   :  { %p9470_p5 = pnand %p9469_p4, %p9463_p1 }
  0x29   :  { %9473 = shalt.err (!%p9470_p5)
}
  0x2a   :  { %s9526_s10 = smov 256   ;;  %s9527_s30 = smov 16  }
  0x2b   :  { %69 = dma.hbm_to_vmem [thread:$0]  %s12546_s9, 2048, %s64_s26, [#allocation7], %s9526_s10, %s9526_s10, %s9527_s30  }
  0x2c   :  { %s9528_s17 = smov [#allocation11]  }
  0x2d   :  { %s87_s18 = sshll.u32 %s9528_s17, 4  ;;  %s88_s18 = int_to_ptr.vmem [resolvable:$true] %s87_s18 }
  0x2e   :  { %s9482_s19 = scalar_lea.vmem %s88_s18, 256  ;;  %p9487_p7 = scmp.lt.s32.totalorder %s88_s18, %s88_s18 }
  0x2f   :  { %p9483_p6 = scmp.ne.s32.totalorder %s88_s18, %s9482_s19  ;;  %p9488_p8 = scmp.lt.s32.totalorder %s9482_s19, %s9482_s19 }
  0x31   :  { %p9489_p9 = por %p9488_p8, %p9487_p7 }
  0x33   :  { %p9490_p10 = pnand %p9489_p9, %p9483_p6 }
  0x35   :  { %9493 = shalt.err (!%p9490_p10)
}
  0x36   :  { %s9529_s6 = smov 128   ;;  %s9530_s20 = smov 8  }
  0x37   :  { %93 = dma.hbm_to_vmem [thread:$0]  %s12549_s12, 256, %s88_s18, [#allocation10], %s9529_s6, %s9529_s6, %s9530_s20  }
  0x38   :  { %9514 = dma.done.wait [#allocation4], 32  }
  0x39   :  { %9515 = vsyncadd [#allocation4], 4294967264 }
  0x3a   :  { %9516 = dma.done.wait [#allocation7], 2080  }
  0x3b   :  { %9517 = vsyncadd [#allocation7], 4294965216 }
  0x3c   :  { %9518 = dma.done.wait [#allocation10], 320  }
  0x3d   :  { %9519 = vsyncadd [#allocation10], 4294966976  ;;  %v12572_v0 = vmov 0.0   ;;  %vm9532_vm0 = vmmov 0   ;;  %v125_v1 = vld [vmem:[%s12538_s1 + $0x78] sm:$0xff]  ;;  %v124_v2 = vld [vmem:[%s12538_s1 + $0x70] sm:$0xff] }
  0x3e   :  { %8957 = vmatprep.subr.mxu0 %v12572_v0  ;;  %8992 = vmatprep.subr.mxu1 %v12572_v0  ;;  %v123_v3 = vld [vmem:[%s12538_s1 + $0x68] sm:$0xff]  ;;  %v9645_v4 = vand.u32 4294901760, %v125_v1  ;;  %v9647_v5 = vand.u32 4294901760, %v124_v2  ;;  %v122_v7 = vld [vmem:[%s12538_s1 + $0x60] sm:$0xff]  ;;  %v121_v8 = vld [vmem:[%s12538_s1 + $0x58] sm:$0xff]  ;;  %vm2575_vm1 = vcmask 254976  }
  0x3f   :  { %8989 = vmatprep.mubr.msk.f32.mxu0 %vm9532_vm0, %v12572_v0  ;;  %9024 = vmatprep.mubr.msk.f32.mxu1 %vm9532_vm0, %v12572_v0  ;;  %v9649_v6 = vand.u32 4294901760, %v123_v3  ;;  %v120_v9 = vld [vmem:[%s12538_s1 + $0x50] sm:$0xff]  ;;  %v9660_v10 = vand.u32 4294901760, %v122_v7  ;;  %v9662_v11 = vand.u32 4294901760, %v121_v8  ;;  %v119_v13 = vld [vmem:[%s12538_s1 + $0x48] sm:$0xff]  ;;  %v118_v14 = vld [vmem:[%s12538_s1 + $0x40] sm:$0xff] }
  0x40   :  { %v9664_v12 = vand.u32 4294901760, %v120_v9  ;;  %8958 = vmatpush3.msra.mxu0 %v9645_v4  ;;  %v9674_v15 = vsub.f32 %v125_v1, %v9645_v4  ;;  %v9677_v16 = vsub.f32 %v124_v2, %v9647_v5  ;;  %v9679_v17 = vand.u32 4294901760, %v119_v13  ;;  %v117_v19 = vld [vmem:[%s12538_s1 + $0x38] sm:$0xff]  ;;  %v116_v26 = vld [vmem:[%s12538_s1 + $0x30] sm:$0xff]  ;;  %v115_v36 = vld [vmem:[%s12538_s1 + $0x28] sm:$0xff]  ;;  %s9534_s9 = smov 64  }
  0x41   :  { %v9682_v18 = vsub.f32 %v123_v3, %v9649_v6  ;;  %8959 = vmatprep.subr.mxu0 %v12572_v0  ;;  %v9689_v20 = vsub.f32 %v122_v7, %v9660_v10  ;;  %v9692_v21 = vsub.f32 %v121_v8, %v9662_v11  ;;  %v9698_v25 = vand.u32 4294901760, %v118_v14  ;;  %v114_v41 = vld [vmem:[%s12538_s1 + $0x20] sm:$0xff]  ;;  %v113_v49 = vld [vmem:[%s12538_s1 + $0x18] sm:$0xff]  ;;  %v112_v54 = vld [vmem:[%s12538_s1 + $0x10] sm:$0xff]  ;;  %s9535_s26 = smov 32  }
  0x42   :  { %8960 = vmatpush3.msra.mxu0 %v9647_v5  ;;  %v221_v22 = vand.u32 4294901760, %v9674_v15  ;;  %v228_v23 = vand.u32 4294901760, %v9677_v16  ;;  %v9705_v28 = vand.u32 4294901760, %v117_v19  ;;  %v9709_v30 = vsub.f32 %v120_v9, %v9664_v12  ;;  %v109_v50 = vld [vmem:[%s12537_s0] sm:$0x3]  ;;  %v111_v60 = vld [vmem:[%s12538_s1 + $0x8] sm:$0xff] }
  0x43   :  { %v235_v24 = vand.u32 4294901760, %v9682_v18  ;;  %8961 = vmatprep.subr.mxu0 %v12572_v0  ;;  %v242_v27 = vand.u32 4294901760, %v9689_v20  ;;  %v249_v29 = vand.u32 4294901760, %v9692_v21  ;;  %v9722_v34 = vsub.f32 %v119_v13, %v9679_v17  ;;  %v110_v7 = vld [vmem:[%s12538_s1] sm:$0xff] }
  0x44   :  { %8962 = vmatpush3.msra.mxu0 %v9649_v6  ;;  %v222_v31 = vsub.f32 %v9674_v15, %v221_v22  ;;  %v229_v32 = vsub.f32 %v9677_v16, %v228_v23  ;;  %v9725_v35 = vand.u32 4294901760, %v116_v26  ;;  %v256_v40 = vand.u32 4294901760, %v9709_v30 }
  0x45   :  { %v236_v33 = vsub.f32 %v9682_v18, %v235_v24  ;;  %8963 = vmatprep.subr.mxu0 %v12572_v0  ;;  %v243_v39 = vsub.f32 %v9689_v20, %v242_v27  ;;  %v250_v42 = vsub.f32 %v9692_v21, %v249_v29  ;;  %v9743_v43 = vsub.f32 %v118_v14, %v9698_v25 }
  0x46   :  { %8964 = vmatpush3.msra.mxu0 %v9660_v10  ;;  %v223_v37 = vand.u32 4294901760, %v222_v31  ;;  %v230_v38 = vand.u32 4294901760, %v229_v32  ;;  %v9746_v45 = vand.u32 4294901760, %v115_v36  ;;  %v263_v46 = vand.u32 4294901760, %v9722_v34 }
  0x47   :  { %8965 = vmatprep.subr.mxu0 %v12572_v0  ;;  %v237_v44 = vand.u32 4294901760, %v236_v33  ;;  %v9750_v47 = vsub.f32 %v117_v19, %v9705_v28  ;;  %v9754_v48 = vand.u32 4294901760, %v114_v41  ;;  %v244_v51 = vand.u32 4294901760, %v243_v39 }
  0x48   :  { %8966 = vmatpush3.msra.mxu0 %v9662_v11  ;;  %8993 = vmatpush3.msra.mxu1 %v223_v37  ;;  %v257_v52 = vsub.f32 %v9709_v30, %v256_v40  ;;  %v270_v53 = vand.u32 4294901760, %v9743_v43  ;;  %v9771_v55 = vsub.f32 %v116_v26, %v9725_v35  ;;  %v251_v56 = vand.u32 4294901760, %v250_v42 }
  0x49   :  { %8967 = vmatprep.subr.mxu0 %v12572_v0  ;;  %8994 = vmatprep.subr.mxu1 %v12572_v0  ;;  %v277_v57 = vand.u32 4294901760, %v9750_v47  ;;  %v264_v58 = vsub.f32 %v9722_v34, %v263_v46  ;;  %v9780_v59 = vand.u32 4294901760, %v113_v49  ;;  %v9786_v61 = vsub.f32 %v115_v36, %v9746_v45 }
  0x4a   :  { %8968 = vmatpush3.msra.mxu0 %v9664_v12  ;;  %8995 = vmatpush3.msra.mxu1 %v230_v38  ;;  %v9788_v62 = vand.u32 4294901760, %v109_v50  ;;  %v9792_v63 = vand.u32 4294901760, %v112_v54  ;;  %v258_v1 = vand.u32 4294901760, %v257_v52  ;;  %v271_v2 = vsub.f32 %v9743_v43, %v270_v53 }
  0x4b   :  { %8969 = vmatprep.subr.mxu0 %v12572_v0  ;;  %8996 = vmatprep.subr.mxu1 %v12572_v0  ;;  %v284_v3 = vand.u32 4294901760, %v9771_v55  ;;  %v9803_v8 = vsub.f32 %v114_v41, %v9754_v48  ;;  %v278_v9 = vsub.f32 %v9750_v47, %v277_v57  ;;  %v9810_v13 = vand.u32 4294901760, %v111_v60 }
  0x4c   :  { %8970 = vmatpush3.msra.mxu0 %v9679_v17  ;;  %8997 = vmatpush3.msra.mxu1 %v237_v44  ;;  %v265_v14 = vand.u32 4294901760, %v264_v58  ;;  %v291_v19 = vand.u32 4294901760, %v9786_v61  ;;  %v9815_v26 = vsub.f32 %v109_v50, %v9788_v62  ;;  %v9818_v31 = vsub.f32 %v113_v49, %v9780_v59 }
  0x4d   :  { %8971 = vmatprep.subr.mxu0 %v12572_v0  ;;  %8998 = vmatprep.subr.mxu1 %v12572_v0  ;;  %v9822_v32 = vand.u32 4294901760, %v110_v7  ;;  %v272_v33 = vand.u32 4294901760, %v271_v2  ;;  %v285_v36 = vsub.f32 %v9771_v55, %v284_v3  ;;  %v298_v37 = vand.u32 4294901760, %v9803_v8 }
  0x4e   :  { %8972 = vmatpush3.msra.mxu0 %v9698_v25  ;;  %8999 = vmatpush3.msra.mxu1 %v244_v51  ;;  %v9830_v38 = vsub.f32 %v112_v54, %v9792_v63  ;;  %v279_v39 = vand.u32 4294901760, %v278_v9  ;;  %v292_v41 = vsub.f32 %v9786_v61, %v291_v19  ;;  %v210_v42 = vand.u32 4294901760, %v9815_v26 }
  0x4f   :  { %8973 = vmatprep.subr.mxu0 %v12572_v0  ;;  %9000 = vmatprep.subr.mxu1 %v12572_v0  ;;  %v305_v44 = vand.u32 4294901760, %v9818_v31  ;;  %v9841_v49 = vsub.f32 %v111_v60, %v9810_v13  ;;  %v286_v50 = vand.u32 4294901760, %v285_v36  ;;  %v299_v51 = vsub.f32 %v9803_v8, %v298_v37 }
  0x50   :  { %8974 = vmatpush3.msra.mxu0 %v9705_v28  ;;  %9001 = vmatpush3.msra.mxu1 %v251_v56  ;;  %v312_v52 = vand.u32 4294901760, %v9830_v38  ;;  %v9851_v54 = vsub.f32 %v110_v7, %v9822_v32  ;;  %v293_v56 = vand.u32 4294901760, %v292_v41  ;;  %v211_v58 = vsub.f32 %v9815_v26, %v210_v42 }
  0x51   :  { %8975 = vmatprep.subr.mxu0 %v12572_v0  ;;  %9002 = vmatprep.subr.mxu1 %v12572_v0  ;;  %v306_v60 = vsub.f32 %v9818_v31, %v305_v44  ;;  %v300_v2 = vand.u32 4294901760, %v299_v51  ;;  %vm2599_vm2 = vcmask 130048   ;;  %vm3137_vm3 = vcmask 523264  }
  0x52   :  { %8976 = vmatpush3.msra.mxu0 %v9725_v35  ;;  %9003 = vmatpush3.msra.mxu1 %v258_v1  ;;  %v319_v1 = vand.u32 4294901760, %v9841_v49  ;;  %v313_v7 = vsub.f32 %v9830_v38, %v312_v52  ;;  %v326_v9 = vand.u32 4294901760, %v9851_v54  ;;  %vm3129_vm4 = vcmask 253952  }
  0x53   :  { %8977 = vmatprep.subr.mxu0 %v12572_v0  ;;  %9004 = vmatprep.subr.mxu1 %v12572_v0  ;;  %vm3131_vm5 = vcmask 516352   ;;  %vm3133_vm6 = vcmask 254977   ;;  %vm3135_vm7 = vcmask 517377   ;;  %vm2581_vm8 = vcmask 386304  }
  0x54   :  { %8978 = vmatpush3.msra.mxu0 %v9746_v45  ;;  %9005 = vmatpush3.msra.mxu1 %v265_v14  ;;  %v212_v14 = vand.u32 4294901760, %v211_v58  ;;  %v320_v36 = vsub.f32 %v9841_v49, %v319_v1  ;;  %v327_v41 = vsub.f32 %v9851_v54, %v326_v9 }
  0x55   :  { %8979 = vmatprep.subr.mxu0 %v12572_v0  ;;  %9006 = vmatprep.subr.mxu1 %v12572_v0 }
  0x56   :  { %8980 = vmatpush3.msra.mxu0 %v9754_v48  ;;  %9007 = vmatpush3.msra.mxu1 %v272_v33  ;;  %v307_v33 = vand.u32 4294901760, %v306_v60  ;;  %v328_v51 = vand.u32 4294901760, %v327_v41  ;;  %v785_v41 = vld [vmem:[%s12540_s3 + $0x80] sm:$0xff] }
  0x57   :  { %8981 = vmatprep.subr.mxu0 %v12572_v0  ;;  %9008 = vmatprep.subr.mxu1 %v12572_v0 }
  0x58   :  { %8982 = vmatpush3.msra.mxu0 %v9780_v59  ;;  %9009 = vmatpush3.msra.mxu1 %v279_v39  ;;  %v314_v39 = vand.u32 4294901760, %v313_v7  ;;  %v787_v7 = vld [vmem:[%s12540_s3 + $0x90] sm:$0xff] }
  0x59   :  { %8983 = vmatprep.subr.mxu0 %v12572_v0  ;;  %9010 = vmatprep.subr.mxu1 %v12572_v0 }
  0x5a   :  { %8984 = vmatpush3.msra.mxu0 %v9792_v63  ;;  %9011 = vmatpush3.msra.mxu1 %v286_v50  ;;  %v321_v50 = vand.u32 4294901760, %v320_v36 }
  0x5b   :  { %8985 = vmatprep.subr.mxu0 %v12572_v0  ;;  %9012 = vmatprep.subr.mxu1 %v12572_v0 }
  0x5c   :  { %8986 = vmatpush3.msra.mxu0 %v9810_v13  ;;  %9013 = vmatpush3.msra.mxu1 %v293_v56  ;;  %v788_v56 = vld [vmem:[%s12540_s3 + $0x98] sm:$0xff] }
  0x5d   :  { %8987 = vmatprep.subr.mxu0 %v12572_v0  ;;  %9014 = vmatprep.subr.mxu1 %v12572_v0 }
  0x5e   :  { %8988 = vmatpush3.msra.mxu0 %v9822_v32  ;;  %9015 = vmatpush3.msra.mxu1 %v300_v2 }
  0x5f   :  { %9016 = vmatprep.subr.mxu1 %v12572_v0  ;;  %9027 = vmatprep.subr.mxu0 %v12572_v0 }
  0x60   :  { %8990 = vmatmul.mubr.f32.vlgmr.msra.gmra.mxu0 %v212_v14  ;;  %9017 = vmatpush3.msra.mxu1 %v307_v33 }
  0x61   :  { %9028 = vmatpush3.msra.mxu0 %v9674_v15  ;;  %9018 = vmatprep.subr.mxu1 %v12572_v0 }
  0x62   :  { %9029 = vmatprep.subr.mxu0 %v12572_v0  ;;  %9019 = vmatpush3.msra.mxu1 %v314_v39 }
  0x63   :  { %9030 = vmatpush3.msra.mxu0 %v9677_v16  ;;  %9020 = vmatprep.subr.mxu1 %v12572_v0  ;;  %v797_v16 = vld [vmem:[%s12540_s3 + $0xe0] sm:$0xff] }
  0x64   :  { %9031 = vmatprep.subr.mxu0 %v12572_v0  ;;  %9021 = vmatpush3.msra.mxu1 %v321_v50 }
  0x65   :  { %9032 = vmatpush3.msra.mxu0 %v9682_v18  ;;  %9022 = vmatprep.subr.mxu1 %v12572_v0  ;;  %v10071_v18 = vand.u32 4294901760, %v797_v16 }
  0x66   :  { %9033 = vmatprep.subr.mxu0 %v12572_v0  ;;  %9023 = vmatpush3.msra.mxu1 %v328_v51 }
  0x67   :  { %9034 = vmatpush3.msra.mxu0 %v9689_v20  ;;  %9025 = vmatmul.mubr.f32.vlgmr.msra.gmra.mxu1 %v9788_v62  ;;  %v796_v20 = vld [vmem:[%s12540_s3 + $0xd8] sm:$0xff] }
  0x68   :  { %9035 = vmatprep.subr.mxu0 %v12572_v0  ;;  %9062 = vmatprep.subr.mxu1 %v12572_v0 }
  0x69   :  { %9036 = vmatpush3.msra.mxu0 %v9692_v21  ;;  %9063 = vmatpush3.msra.mxu1 %v9645_v4 }
  0x6a   :  { %9037 = vmatprep.subr.mxu0 %v12572_v0  ;;  %9064 = vmatprep.subr.mxu1 %v12572_v0 }
  0x6b   :  { %9038 = vmatpush3.msra.mxu0 %v9709_v30  ;;  %9065 = vmatpush3.msra.mxu1 %v9647_v5 }
  0x6c   :  { %9039 = vmatprep.subr.mxu0 %v12572_v0  ;;  %9066 = vmatprep.subr.mxu1 %v12572_v0 }
  0x6d   :  { %9040 = vmatpush3.msra.mxu0 %v9722_v34  ;;  %9067 = vmatpush3.msra.mxu1 %v9649_v6 }
  0x6e   :  { %9041 = vmatprep.subr.mxu0 %v12572_v0  ;;  %9068 = vmatprep.subr.mxu1 %v12572_v0 }
  0x6f   :  { %9042 = vmatpush3.msra.mxu0 %v9743_v43  ;;  %9069 = vmatpush3.msra.mxu1 %v9660_v10 }
  0x70   :  { %9043 = vmatprep.subr.mxu0 %v12572_v0  ;;  %9070 = vmatprep.subr.mxu1 %v12572_v0 }
  0x71   :  { %9044 = vmatpush3.msra.mxu0 %v9750_v47  ;;  %9071 = vmatpush3.msra.mxu1 %v9662_v11 }
  0x72   :  { %9045 = vmatprep.subr.mxu0 %v12572_v0  ;;  %9072 = vmatprep.subr.mxu1 %v12572_v0 }
  0x73   :  { %9046 = vmatpush3.msra.mxu0 %v9771_v55  ;;  %9073 = vmatpush3.msra.mxu1 %v9664_v12  ;;  %v792_v55 = vld [vmem:[%s12540_s3 + $0xb8] sm:$0xff] }
  0x74   :  { %9047 = vmatprep.subr.mxu0 %v12572_v0  ;;  %9074 = vmatprep.subr.mxu1 %v12572_v0 }
  0x75   :  { %9048 = vmatpush3.msra.mxu0 %v9786_v61  ;;  %9075 = vmatpush3.msra.mxu1 %v9679_v17 }
  0x76   :  { %9049 = vmatprep.subr.mxu0 %v12572_v0  ;;  %9076 = vmatprep.subr.mxu1 %v12572_v0 }
  0x77   :  { %9050 = vmatpush3.msra.mxu0 %v9803_v8  ;;  %9077 = vmatpush3.msra.mxu1 %v9698_v25 }
  0x78   :  { %9051 = vmatprep.subr.mxu0 %v12572_v0  ;;  %9078 = vmatprep.subr.mxu1 %v12572_v0 }
  0x79   :  { %9052 = vmatpush3.msra.mxu0 %v9818_v31  ;;  %9079 = vmatpush3.msra.mxu1 %v9705_v28 }
  0x7a   :  { %9053 = vmatprep.subr.mxu0 %v12572_v0  ;;  %9080 = vmatprep.subr.mxu1 %v12572_v0 }
  0x7b   :  { %9054 = vmatpush3.msra.mxu0 %v9830_v38  ;;  %9081 = vmatpush3.msra.mxu1 %v9725_v35  ;;  %v10150_v38 = vand.u32 4294901760, %v792_v55 }
  0x7c   :  { %9055 = vmatprep.subr.mxu0 %v12572_v0  ;;  %9082 = vmatprep.subr.mxu1 %v12572_v0 }
  0x7d   :  { %9056 = vmatpush3.msra.mxu0 %v9841_v49  ;;  %9083 = vmatpush3.msra.mxu1 %v9746_v45 }
  0x7e   :  { %9057 = vmatprep.subr.mxu0 %v12572_v0  ;;  %9084 = vmatprep.subr.mxu1 %v12572_v0 }
  0x7f   :  { %9058 = vmatpush3.msra.mxu0 %v9851_v54  ;;  %9059 = vmatprep.mubr.msk.f32.mxu0 %vm9532_vm0, %v12572_v0 }
  0x80   :  { %9085 = vmatpush3.msra.mxu1 %v9754_v48  ;;  %9060 = vmatmul.mubr.f32.vlgmr.msra.gmra.mxu0 %v9815_v26  ;;  %v790_v26 = vld [vmem:[%s12540_s3 + $0xa8] sm:$0xff] }
  0x81   :  { %9086 = vmatprep.subr.mxu1 %v12572_v0  ;;  %9097 = vmatprep.subr.mxu0 %v12572_v0  ;;  %v10172_v2 = vand.u32 4294901760, %v790_v26 }
  0x82   :  { %9087 = vmatpush3.msra.mxu1 %v9780_v59  ;;  %9098 = vmatpush3.msra.mxu0 %v221_v22 }
  0x83   :  { %9088 = vmatprep.subr.mxu1 %v12572_v0  ;;  %9099 = vmatprep.subr.mxu0 %v12572_v0 }
  0x84   :  { %9089 = vmatpush3.msra.mxu1 %v9792_v63  ;;  %9100 = vmatpush3.msra.mxu0 %v228_v23  ;;  %v10081_v23 = vand.u32 4294901760, %v796_v20 }
  0x85   :  { %9090 = vmatprep.subr.mxu1 %v12572_v0  ;;  %9101 = vmatprep.subr.mxu0 %v12572_v0 }
  0x86   :  { %9091 = vmatpush3.msra.mxu1 %v9810_v13  ;;  %9102 = vmatpush3.msra.mxu0 %v235_v24  ;;  %v795_v24 = vld [vmem:[%s12540_s3 + $0xd0] sm:$0xff]  ;;  %v10107_v43 = vsub.f32 %v796_v20, %v10081_v23  ;;  %v10201_v20 = vand.u32 4294901760, %v787_v7 }
  0x87   :  { %9092 = vmatprep.subr.mxu1 %v12572_v0  ;;  %9103 = vmatprep.subr.mxu0 %v12572_v0  ;;  %v10097_v30 = vand.u32 4294901760, %v795_v24 }
  0x88   :  { %9093 = vmatpush3.msra.mxu1 %v9822_v32  ;;  %9094 = vmatprep.mubr.msk.f32.mxu1 %vm9532_vm0, %v12572_v0  ;;  %v12565_v61 = vand.u32 4294901760, %v10107_v43 }
  0x89   :  { %9104 = vmatpush3.msra.mxu0 %v242_v27  ;;  %9095 = vmatmul.mubr.f32.vlgmr.msra.gmra.mxu1 %v210_v42  ;;  %v793_v27 = vld [vmem:[%s12540_s3 + $0xc0] sm:$0xff] }
  0x8a   :  { %9105 = vmatprep.subr.mxu0 %v12572_v0  ;;  %9132 = vmatprep.subr.mxu1 %v12572_v0  ;;  %v789_v42 = vld [vmem:[%s12540_s3 + $0xa0] sm:$0xff] }
  0x8b   :  { %9106 = vmatpush3.msra.mxu0 %v249_v29  ;;  %9133 = vmatpush3.msra.mxu1 %v9645_v4  ;;  %v800_v4 = vld [vmem:[%s12540_s3 + $0xf8] sm:$0xff]  ;;  %v10095_v29 = vsub.f32 %v797_v16, %v10071_v18  ;;  %v10184_v39 = vand.u32 4294901760, %v789_v42 }
  0x8c   :  { %9107 = vmatprep.subr.mxu0 %v12572_v0  ;;  %9134 = vmatprep.subr.mxu1 %v12572_v0 }
  0x8d   :  { %9108 = vmatpush3.msra.mxu0 %v256_v40  ;;  %9135 = vmatpush3.msra.mxu1 %v9647_v5  ;;  %v10049_v5 = vand.u32 4294901760, %v800_v4  ;;  %v12566_v47 = vand.u32 4294901760, %v10095_v29  ;;  %v10199_v16 = vsub.f32 %v789_v42, %v10184_v39  ;;  %v783_v42 = vld [vmem:[%s12540_s3 + $0x70] sm:$0xff] }
  0x8e   :  { %9109 = vmatprep.subr.mxu0 %v12572_v0  ;;  %9136 = vmatprep.subr.mxu1 %v12572_v0 }
  0x8f   :  { %9110 = vmatpush3.msra.mxu0 %v263_v46  ;;  %9137 = vmatpush3.msra.mxu1 %v9649_v6  ;;  %v799_v6 = vld [vmem:[%s12540_s3 + $0xf0] sm:$0xff]  ;;  %v942_v8 = vsub.f32 %v10095_v29, %v12566_v47 }
  0x90   :  { %9111 = vmatprep.subr.mxu0 %v12572_v0  ;;  %9138 = vmatprep.subr.mxu1 %v12572_v0 }
  0x91   :  { %9112 = vmatpush3.msra.mxu0 %v270_v53  ;;  %9139 = vmatpush3.msra.mxu1 %v9660_v10  ;;  %v10054_v10 = vand.u32 4294901760, %v799_v6 }
  0x92   :  { %9113 = vmatprep.subr.mxu0 %v12572_v0  ;;  %9140 = vmatprep.subr.mxu1 %v12572_v0 }
  0x93   :  { %9114 = vmatpush3.msra.mxu0 %v277_v57  ;;  %9141 = vmatpush3.msra.mxu1 %v9662_v11  ;;  %v798_v11 = vld [vmem:[%s12540_s3 + $0xe8] sm:$0xff] }
  0x94   :  { %9115 = vmatprep.subr.mxu0 %v12572_v0  ;;  %9142 = vmatprep.subr.mxu1 %v12572_v0  ;;  %v10062_v15 = vand.u32 4294901760, %v798_v11 }
  0x95   :  { %9116 = vmatpush3.msra.mxu0 %v284_v3  ;;  %9143 = vmatpush3.msra.mxu1 %v9664_v12  ;;  %v10060_v12 = vsub.f32 %v800_v4, %v10049_v5  ;;  %v10192_v4 = vsub.f32 %v790_v26, %v10172_v2 }
  0x96   :  { %9117 = vmatprep.subr.mxu0 %v12572_v0  ;;  %9144 = vmatprep.subr.mxu1 %v12572_v0  ;;  %v10079_v22 = vsub.f32 %v798_v11, %v10062_v15 }
  0x97   :  { %9118 = vmatpush3.msra.mxu0 %v291_v19  ;;  %9145 = vmatpush3.msra.mxu1 %v9679_v17  ;;  %12752 = vst [vmem:[#allocation17_spill] sm:$0xff] %v10060_v12  ;;  %v10069_v17 = vsub.f32 %v799_v6, %v10054_v10  ;;  %v12570_v21 = vand.u32 4294901760, %v10060_v12  ;;  %v10194_v6 = vand.u32 4294901760, %v788_v56 }
  0x98   :  { %9119 = vmatprep.subr.mxu0 %v12572_v0  ;;  %9146 = vmatprep.subr.mxu1 %v12572_v0  ;;  %v12568_v40 = vand.u32 4294901760, %v10079_v22 }
  0x99   :  { %9120 = vmatpush3.msra.mxu0 %v298_v37  ;;  %9147 = vmatpush3.msra.mxu1 %v9698_v25  ;;  %v794_v25 = vld [vmem:[%s12540_s3 + $0xc8] sm:$0xff] }
  0x9a   :  { %9121 = vmatprep.subr.mxu0 %v12572_v0  ;;  %9148 = vmatprep.subr.mxu1 %v12572_v0  ;;  %v10099_v34 = vand.u32 4294901760, %v794_v25 }
  0x9b   :  { %9122 = vmatpush3.msra.mxu0 %v305_v44  ;;  %9149 = vmatpush3.msra.mxu1 %v9705_v28  ;;  %v12569_v28 = vand.u32 4294901760, %v10069_v17  ;;  %v943_v44 = vand.u32 4294901760, %v942_v8 }
  0x9c   :  { %9123 = vmatprep.subr.mxu0 %v12572_v0  ;;  %9150 = vmatprep.subr.mxu1 %v12572_v0  ;;  %v10120_v53 = vsub.f32 %v794_v25, %v10099_v34 }
  0x9d   :  { %9124 = vmatpush3.msra.mxu0 %v312_v52  ;;  %9151 = vmatpush3.msra.mxu1 %v9725_v35  ;;  %v924_v35 = vsub.f32 %v10060_v12, %v12570_v21  ;;  %v930_v46 = vsub.f32 %v10069_v17, %v12569_v28 }
  0x9e   :  { %9125 = vmatprep.subr.mxu0 %v12572_v0  ;;  %9152 = vmatprep.subr.mxu1 %v12572_v0  ;;  %v12561_v19 = vand.u32 4294901760, %v10120_v53 }
  0x9f   :  { %9126 = vmatpush3.msra.mxu0 %v319_v1  ;;  %9153 = vmatpush3.msra.mxu1 %v9746_v45  ;;  %v10109_v45 = vand.u32 4294901760, %v793_v27  ;;  %v925_v57 = vand.u32 4294901760, %v924_v35  ;;  %v931_v3 = vand.u32 4294901760, %v930_v46  ;;  %v10170_v1 = vsub.f32 %v792_v55, %v10150_v38 }
  0xa0   :  { %9127 = vmatprep.subr.mxu0 %v12572_v0  ;;  %9154 = vmatprep.subr.mxu1 %v12572_v0  ;;  %v960_v52 = vsub.f32 %v10120_v53, %v12561_v19  ;;  %v10211_v35 = vsub.f32 %v788_v56, %v10194_v6  ;;  %v10213_v46 = vand.u32 4294901760, %v785_v41 }
  0xa1   :  { %9128 = vmatpush3.msra.mxu0 %v326_v9  ;;  %9129 = vmatprep.mubr.msk.f32.mxu0 %vm9532_vm0, %v12572_v0  ;;  %v786_v9 = vld [vmem:[%s12540_s3 + $0x88] sm:$0xff]  ;;  %v12559_v51 = vand.u32 4294901760, %v10170_v1 }
  0xa2   :  { %9155 = vmatpush3.msra.mxu1 %v9754_v48  ;;  %9130 = vmatmul.mubr.f32.vlgmr.msra.gmra.mxu0 %v9788_v62  ;;  %v10117_v48 = vsub.f32 %v795_v24, %v10097_v30  ;;  %v961_v33 = vand.u32 4294901760, %v960_v52  ;;  %v10203_v24 = vand.u32 4294901760, %v786_v9 }
  0xa3   :  { %9156 = vmatprep.subr.mxu1 %v12572_v0  ;;  %9164 = vmatprep.mubr.msk.f32.mxu1 %vm9532_vm0, %v12572_v0  ;;  %v972_v25 = vsub.f32 %v10170_v1, %v12559_v51 }
  0xa4   :  { %9157 = vmatpush3.msra.mxu1 %v9780_v59  ;;  %909 = vmatprep.mubr.f32.mxu0 %v12572_v0  ;;  %v936_v59 = vsub.f32 %v10079_v22, %v12568_v40 }
  0xa5   :  { %9158 = vmatprep.subr.mxu1 %v12572_v0  ;;  %814 = vmatprep.subr.mxu0 %v10049_v5  ;;  %v973_v8 = vand.u32 4294901760, %v972_v25 }
  0xa6   :  { %9159 = vmatpush3.msra.mxu1 %v9792_v63  ;;  %816 = vmatpush1.msra.mxu0 %v10054_v10  ;;  %v791_v63 = vld [vmem:[%s12540_s3 + $0xb0] sm:$0xff]  ;;  %v937_v31 = vand.u32 4294901760, %v936_v59  ;;  %v10221_v59 = vsub.f32 %v787_v7, %v10201_v20 }
  0xa7   :  { %9160 = vmatprep.subr.mxu1 %v12572_v0  ;;  %818 = vmatprep.subr.mxu0 %v10062_v15  ;;  %v10161_v54 = vand.u32 4294901760, %v791_v63 }
  0xa8   :  { %9161 = vmatpush3.msra.mxu1 %v9810_v13  ;;  %820 = vmatpush1.msra.mxu0 %v10071_v18  ;;  %v12563_v13 = vand.u32 4294901760, %v10117_v48  ;;  %v12552_v52 = vand.u32 4294901760, %v10221_v59 }
  0xa9   :  { %9162 = vmatprep.subr.mxu1 %v12572_v0  ;;  %822 = vmatprep.subr.mxu0 %v10081_v23  ;;  %v10182_v36 = vsub.f32 %v791_v63, %v10161_v54  ;;  %v10224_v63 = vsub.f32 %v786_v9, %v10203_v24 }
  0xaa   :  { %9163 = vmatpush3.msra.mxu1 %v9822_v32  ;;  %824 = vmatpush1.msra.mxu0 %v10097_v30  ;;  %v948_v32 = vsub.f32 %v10107_v43, %v12565_v61  ;;  %v954_v49 = vsub.f32 %v10117_v48, %v12563_v13 }
  0xab   :  { %9165 = vmatmul.mubr.f32.vlgmr.msra.gmra.mxu1 %v9788_v62  ;;  %v10131_v62 = vsub.f32 %v793_v27, %v10109_v45  ;;  %826 = vmatprep.subr.mxu0 %v10099_v34  ;;  %v12558_v11 = vand.u32 4294901760, %v10182_v36  ;;  %v12557_v27 = vand.u32 4294901760, %v10192_v4  ;;  %v12553_v56 = vand.u32 4294901760, %v10224_v63 }
  0xac   :  { %1145 = vmatprep.mubr.f32.mxu1 %v12572_v0  ;;  %828 = vmatpush1.msra.mxu0 %v10109_v45  ;;  %v949_v58 = vand.u32 4294901760, %v948_v32  ;;  %v955_v14 = vand.u32 4294901760, %v954_v49  ;;  %v10235_v32 = vsub.f32 %v785_v41, %v10213_v46 }
  0xad   :  { %926 = vmatprep.subr.mxu1 %v925_v57  ;;  %v12560_v37 = vand.u32 4294901760, %v10131_v62  ;;  %830 = vmatprep.subr.mxu0 %v10150_v38  ;;  %v978_v55 = vsub.f32 %v10182_v36, %v12558_v11  ;;  %v12556_v57 = vand.u32 4294901760, %v10199_v16  ;;  %v984_v26 = vsub.f32 %v10192_v4, %v12557_v27 }
  0xae   :  { %932 = vmatpush1.msra.mxu1 %v931_v3  ;;  %832 = vmatpush1.msra.mxu0 %v10161_v54  ;;  %v784_v3 = vld [vmem:[%s12540_s3 + $0x78] sm:$0xff]  ;;  %v12555_v9 = vand.u32 4294901760, %v10235_v32  ;;  %v1008_v25 = vsub.f32 %v10224_v63, %v12553_v56  ;;  %v779_v56 = vld [vmem:[%s12540_s3 + $0x50] sm:$0xff] }
  0xaf   :  { %938 = vmatprep.subr.mxu1 %v937_v31  ;;  %v966_v60 = vsub.f32 %v10131_v62, %v12560_v37  ;;  %834 = vmatprep.subr.mxu0 %v10172_v2  ;;  %v12554_v31 = vand.u32 4294901760, %v10211_v35  ;;  %v990_v49 = vsub.f32 %v10199_v16, %v12556_v57  ;;  %v777_v57 = vld [vmem:[%s12540_s3 + $0x40] sm:$0xff] }
  0xb0   :  { %944 = vmatpush1.msra.mxu1 %v943_v44  ;;  %836 = vmatpush1.msra.mxu0 %v10184_v39  ;;  %v979_v44 = vand.u32 4294901760, %v978_v55  ;;  %v10265_v55 = vand.u32 4294901760, %v783_v42 }
  0xb1   :  { %950 = vmatprep.subr.mxu1 %v949_v58  ;;  %v967_v50 = vand.u32 4294901760, %v966_v60  ;;  %838 = vmatprep.subr.mxu0 %v10194_v6  ;;  %v782_v58 = vld [vmem:[%s12540_s3 + $0x68] sm:$0xff]  ;;  %v985_v60 = vand.u32 4294901760, %v984_v26  ;;  %v996_v7 = vsub.f32 %v10211_v35, %v12554_v31  ;;  %v991_v41 = vand.u32 4294901760, %v990_v49 }
  0xb2   :  { %956 = vmatpush1.msra.mxu1 %v955_v14  ;;  %840 = vmatpush1.msra.mxu0 %v10201_v20  ;;  %v10254_v14 = vand.u32 4294901760, %v784_v3  ;;  %v778_v31 = vld [vmem:[%s12540_s3 + $0x48] sm:$0xff] }
  0xb3   :  { %962 = vmatprep.subr.mxu1 %v961_v33  ;;  %842 = vmatprep.subr.mxu0 %v10203_v24  ;;  %v781_v33 = vld [vmem:[%s12540_s3 + $0x60] sm:$0xff]  ;;  %v997_v26 = vand.u32 4294901760, %v996_v7  ;;  %v1009_v7 = vand.u32 4294901760, %v1008_v25  ;;  %v10305_v25 = vand.u32 4294901760, %v779_v56  ;;  %v10307_v37 = vand.u32 4294901760, %v778_v31 }
  0xb4   :  { %968 = vmatpush1.msra.mxu1 %v967_v50  ;;  %844 = vmatpush1.msra.mxu0 %v10213_v46  ;;  %v1002_v50 = vsub.f32 %v10221_v59, %v12552_v52  ;;  %v10274_v49 = vsub.f32 %v784_v3, %v10254_v14  ;;  %v10276_v52 = vand.u32 4294901760, %v782_v58  ;;  %v10288_v3 = vand.u32 4294901760, %v781_v33 }
  0xb5   :  { %974 = vmatprep.subr.mxu1 %v973_v8  ;;  %v780_v8 = vld [vmem:[%s12540_s3 + $0x58] sm:$0xff]  ;;  %846 = vmatprep.subr.mxu0 %v10254_v14  ;;  %v10325_v19 = vsub.f32 %v779_v56, %v10305_v25 }
  0xb6   :  { %980 = vmatpush1.msra.mxu1 %v979_v44  ;;  %v1014_v44 = vsub.f32 %v10235_v32, %v12555_v9  ;;  %v10286_v9 = vsub.f32 %v783_v42, %v10265_v55  ;;  %848 = vmatpush1.msra.mxu0 %v10265_v55  ;;  %v12562_v11 = vand.u32 4294901760, %v10274_v49  ;;  %v10296_v51 = vsub.f32 %v782_v58, %v10276_v52 }
  0xb7   :  { %986 = vmatprep.subr.mxu1 %v985_v60  ;;  %v1003_v60 = vand.u32 4294901760, %v1002_v50  ;;  %850 = vmatprep.subr.mxu0 %v10276_v52  ;;  %v10303_v50 = vsub.f32 %v781_v33, %v10288_v3  ;;  %12757 = vst [vmem:[#allocation22_spill] sm:$0xff] %v10325_v19  ;;  %v12579_v47 = vand.u32 4294901760, %v10325_v19 }
  0xb8   :  { %992 = vmatpush1.msra.mxu1 %v991_v41  ;;  %12753 = vst [vmem:[#allocation18_spill] sm:$0xff] %v10286_v9  ;;  %v1015_v27 = vand.u32 4294901760, %v1014_v44  ;;  %12754 = vst [vmem:[#allocation19_spill] sm:$0xff] %v10296_v51  ;;  %v10298_v41 = vand.u32 4294901760, %v780_v8  ;;  %v12564_v42 = vand.u32 4294901760, %v10286_v9  ;;  %852 = vmatpush1.msra.mxu0 %v10288_v3  ;;  %v1020_v58 = vsub.f32 %v10274_v49, %v12562_v11 }
  0xb9   :  { %998 = vmatprep.subr.mxu1 %v997_v26  ;;  %12755 = vst [vmem:[#allocation20_spill] sm:$0xff] %v10303_v50  ;;  %v12567_v26 = vand.u32 4294901760, %v10296_v51  ;;  %v10328_v11 = vsub.f32 %v778_v31, %v10307_v37  ;;  %v775_v31 = vld [vmem:[%s12540_s3 + $0x30] sm:$0xff] }
  0xba   :  { %1004 = vmatpush1.msra.mxu1 %v1003_v60  ;;  %v10315_v44 = vsub.f32 %v780_v8, %v10298_v41  ;;  %v10317_v60 = vand.u32 4294901760, %v777_v57  ;;  %854 = vmatprep.subr.mxu0 %v10298_v41  ;;  %v1026_v33 = vsub.f32 %v10286_v9, %v12564_v42  ;;  %v776_v8 = vld [vmem:[%s12540_s3 + $0x38] sm:$0xff]  ;;  %v1021_v13 = vand.u32 4294901760, %v1020_v58 }
  0xbb   :  { %1010 = vmatprep.subr.mxu1 %v1009_v7  ;;  %v12571_v7 = vand.u32 4294901760, %v10303_v50  ;;  %12758 = vst [vmem:[#allocation23_spill] sm:$0xff] %v10328_v11  ;;  %856 = vmatpush1.msra.mxu0 %v10305_v25  ;;  %v10358_v21 = vand.u32 4294901760, %v776_v8 }
  0xbc   :  { %12756 = vst [vmem:[#allocation21_spill] sm:$0xff] %v10315_v44  ;;  %1016 = vmatpush1.msra.mxu1 %v1015_v27  ;;  %v1032_v27 = vsub.f32 %v10296_v51, %v12567_v26  ;;  %v12576_v42 = vand.u32 4294901760, %v10315_v44  ;;  %v10339_v61 = vsub.f32 %v777_v57, %v10317_v60  ;;  %858 = vmatprep.subr.mxu0 %v10307_v37  ;;  %v1027_v56 = vand.u32 4294901760, %v1026_v33  ;;  %v774_v57 = vld [vmem:[%s12540_s3 + $0x28] sm:$0xff] }
  0xbd   :  { %v1038_v58 = vsub.f32 %v10303_v50, %v12571_v7  ;;  %860 = vmatpush1.msra.mxu0 %v10317_v60  ;;  %1022 = vmatprep.subr.mxu1 %v1021_v13  ;;  %v773_v7 = vld [vmem:[%s12540_s3 + $0x20] sm:$0xff]  ;;  %v1050_v26 = vsub.f32 %v10325_v19, %v12579_v47  ;;  %v12760_v13 = vand.u32 4294901760, %v10328_v11  ;;  %v10369_v50 = vand.u32 4294901760, %v775_v31 }
  0xbe   :  { %12759 = vst [vmem:[#allocation24_spill] sm:$0xff] %v10339_v61  ;;  %v1033_v40 = vand.u32 4294901760, %v1032_v27  ;;  %v1044_v33 = vsub.f32 %v10315_v44, %v12576_v42  ;;  %1028 = vmatpush1.msra.mxu1 %v1027_v56  ;;  %v772_v42 = vld [vmem:[%s12540_s3 + $0x18] sm:$0xff]  ;;  %v12762_v44 = vand.u32 4294901760, %v10339_v61  ;;  %v10380_v47 = vand.u32 4294901760, %v774_v57  ;;  %862 = vmatprep.subr.mxu0 %v10358_v21 }
  0xbf   :  { %v1039_v0 = vand.u32 4294901760, %v1038_v58  ;;  %v1056_v27 = vsub.f32 %v10328_v11, %v12760_v13  ;;  %12761 = vst [vmem:[#allocation25_spill] sm:$0xff] %v10369_v50  ;;  %v10378_v58 = vsub.f32 %v776_v8, %v10358_v21  ;;  %v771_v13 = vld [vmem:[%s12540_s3 + $0x10] sm:$0xff]  ;;  %v770_v11 = vld [vmem:[%s12540_s3 + $0x8] sm:$0xff]  ;;  %v10392_v8 = vand.u32 4294901760, %v773_v7  ;;  %864 = vmatpush1.msra.mxu0 %v10369_v50 }
  0xc0   :  { %1034 = vmatprep.subr.mxu1 %v1033_v40  ;;  %v1045_v28 = vand.u32 4294901760, %v1044_v33  ;;  %v1062_v56 = vsub.f32 %v10339_v61, %v12762_v44  ;;  %v1051_v40 = vand.u32 4294901760, %v1050_v26  ;;  %v10390_v44 = vsub.f32 %v775_v31, %v10369_v50  ;;  %v769_v61 = vld [vmem:[%s12540_s3] sm:$0xff]  ;;  %866 = vmatprep.subr.mxu0 %v10380_v47 }
  0xc1   :  { %12763 = vst [vmem:[#allocation26_spill] sm:$0xff] %v10378_v58  ;;  %1040 = vmatpush1.msra.mxu1 %v1039_v0  ;;  %v1057_v33 = vand.u32 4294901760, %v1056_v27  ;;  %12765 = vst [vmem:[#allocation28_spill] sm:$0xff] %v10392_v8  ;;  %v12594_v51 = vand.u32 4294901760, %v10378_v58  ;;  %v10400_v9 = vsub.f32 %v774_v57, %v10380_v47  ;;  %v10402_v0 = vand.u32 4294901760, %v772_v42  ;;  %868 = vmatpush1.msra.mxu0 %v10392_v8 }
  0xc2   :  { %12764 = vst [vmem:[#allocation27_spill] sm:$0xff] %v10390_v44  ;;  %1046 = vmatprep.subr.mxu1 %v1045_v28  ;;  %v1063_v19 = vand.u32 4294901760, %v1062_v56  ;;  %v12599_v26 = vand.u32 4294901760, %v10390_v44  ;;  %v10407_v31 = vsub.f32 %v773_v7, %v10392_v8  ;;  %v10409_v27 = vand.u32 4294901760, %v771_v13 }
  0xc3   :  { %12766 = vst [vmem:[#allocation29_spill] sm:$0xff] %v10400_v9  ;;  %12767 = vst [vmem:[#allocation30_spill] sm:$0xff] %v10402_v0  ;;  %1052 = vmatpush1.msra.mxu1 %v1051_v40  ;;  %v10411_v50 = vand.u32 4294901760, %v770_v11  ;;  %v1068_v28 = vsub.f32 %v10378_v58, %v12594_v51  ;;  %v12600_v57 = vand.u32 4294901760, %v10400_v9  ;;  %v10419_v56 = vsub.f32 %v772_v42, %v10402_v0 }
  0xc4   :  { %12768 = vst [vmem:[#allocation31_spill] sm:$0xff] %v10407_v31  ;;  %1058 = vmatprep.subr.mxu1 %v1057_v33  ;;  %v10421_v40 = vand.u32 4294901760, %v769_v61  ;;  %870 = vmatprep.subr.mxu0 %v10402_v0  ;;  %v1074_v7 = vsub.f32 %v10390_v44, %v12599_v26  ;;  %v12603_v33 = vand.u32 4294901760, %v10407_v31  ;;  %v10429_v8 = vsub.f32 %v771_v13, %v10409_v27 }
  0xc5   :  { %12769 = vst [vmem:[#allocation32_spill] sm:$0xff] %v10419_v56  ;;  %1064 = vmatpush1.msra.mxu1 %v1063_v19  ;;  %v10432_v51 = vsub.f32 %v770_v11, %v10411_v50  ;;  %872 = vmatpush1.msra.mxu0 %v10409_v27  ;;  %v1069_v42 = vand.u32 4294901760, %v1068_v28  ;;  %v1080_v58 = vsub.f32 %v10400_v9, %v12600_v57  ;;  %v12606_v19 = vand.u32 4294901760, %v10419_v56 }
  0xc6   :  { %12770 = vst [vmem:[#allocation33_spill] sm:$0xff] %v10429_v8  ;;  %v10440_v0 = vsub.f32 %v769_v61, %v10421_v40  ;;  %874 = vmatprep.subr.mxu0 %v10411_v50  ;;  %v1075_v26 = vand.u32 4294901760, %v1074_v7  ;;  %v1086_v11 = vsub.f32 %v10407_v31, %v12603_v33  ;;  %v12609_v13 = vand.u32 4294901760, %v10429_v8 }
  0xc7   :  { %12771 = vst [vmem:[#allocation34_spill] sm:$0xff] %v10432_v51  ;;  %v12611_v28 = vand.u32 4294901760, %v10432_v51  ;;  %876 = vmatpush1.msra.mxu0 %v10421_v40  ;;  %1070 = vmatprep.subr.mxu1 %v1069_v42  ;;  %v1081_v57 = vand.u32 4294901760, %v1080_v58  ;;  %v1092_v61 = vsub.f32 %v10419_v56, %v12606_v19 }
  0xc8   :  { %12772 = vst [vmem:[#allocation35_spill] sm:$0xff] %v10440_v0  ;;  %v12616_v9 = vand.u32 4294901760, %v10440_v0  ;;  %1155 = vmatprep.subr.mxu0 %v10060_v12  ;;  %1076 = vmatpush1.msra.mxu1 %v1075_v26  ;;  %v1087_v7 = vand.u32 4294901760, %v1086_v11  ;;  %v1098_v33 = vsub.f32 %v10429_v8, %v12609_v13 }
  0xc9   :  { %v1104_v31 = vsub.f32 %v10432_v51, %v12611_v28  ;;  %1082 = vmatprep.subr.mxu1 %v1081_v57  ;;  %v1093_v58 = vand.u32 4294901760, %v1092_v61 }
  0xca   :  { %v1110_v42 = vsub.f32 %v10440_v0, %v12616_v9  ;;  %1088 = vmatpush1.msra.mxu1 %v1087_v7  ;;  %v1099_v19 = vand.u32 4294901760, %v1098_v33  ;;  %v126_v33 = vld [vmem:[%s12539_s2] sm:$0x3] }
  0xcb   :  { %v1105_v56 = vand.u32 4294901760, %v1104_v31  ;;  %1094 = vmatprep.subr.mxu1 %v1093_v58 }
  0xcc   :  { %v1111_v26 = vand.u32 4294901760, %v1110_v42  ;;  %1100 = vmatpush1.msra.mxu1 %v1099_v19 }
  0xcd   :  { %1106 = vmatprep.subr.mxu1 %v1105_v56 }
  0xce   :  { %1112 = vmatpush1.msra.mxu1 %v1111_v26 }
  0xcf   :  { %1291 = vmatprep.subr.mxu1 %v10049_v5 }
 0x120   :  { %v214_v11 = vpop.f32.mrf.mxu0 }
 0x121   :  { %v215_v31 = vadd.f32 %v214_v11, %v126_v33  ;;  %v12777_v11 = vld [vmem:[#allocation19_spill] sm:$0xff]  ;;  %v12779_v33 = vld [vmem:[#allocation28_spill] sm:$0xff] }
 0x122   :  { %v8991_v13 = vpop.f32.mrf.mxu0 }
 0x127   :  { %v365_v12 = vpop.f32.mrf.mxu1 }
 0x128   :  { %v366_v58 = vadd.f32 %v365_v12, %v215_v31  ;;  %v12780_v31 = vld [vmem:[#allocation21_spill] sm:$0xff] }
 0x129   :  { %v9026_v28 = vpop.f32.mrf.mxu1 }
 0x140   :  { %v469_v57 = vpop.f32.mrf.mxu0 }
 0x141   :  { %v470_v56 = vadd.f32 %v469_v57, %v366_v58  ;;  %v12778_v57 = vld [vmem:[#allocation20_spill] sm:$0xff]  ;;  %v12782_v58 = vld [vmem:[#allocation22_spill] sm:$0xff] }
 0x142   :  { %v9061_v61 = vpop.f32.mrf.mxu0 }
 0x149   :  { %v558_v51 = vpop.f32.mrf.mxu1 }
 0x14a   :  { %v559_v42 = vadd.f32 %v558_v51, %v470_v56  ;;  %v12784_v56 = vld [vmem:[#allocation24_spill] sm:$0xff] }
 0x14b   :  { %v9096_v8 = vpop.f32.mrf.mxu1 }
 0x14c   :  { %v12774_v8 = vmov 0.0  }
 0x162   :  { %v677_v7 = vpop.f32.mrf.mxu0 }
 0x163   :  { %v678_v26 = vadd.f32 %v677_v7, %v559_v42  ;;  %v12781_v7 = vld [vmem:[#allocation30_spill] sm:$0xff] }
 0x164   :  { %v9131_v19 = vpop.f32.mrf.mxu0  ;;  %v12785_v42 = vld [vmem:[#allocation26_spill] sm:$0xff] }
 0x165   :  { %v12783_v19 = vld [vmem:[#allocation23_spill] sm:$0xff] }
 0x16b   :  { %v764_v9 = vpop.f32.mrf.mxu1 }
 0x16c   :  { %v765_v0 = vadd.f32 %v764_v9, %v678_v26  ;;  %v12786_v26 = vld [vmem:[#allocation27_spill] sm:$0xff] }
 0x16d   :  { %v9166_v13 = vpop.f32.mrf.mxu1 }
 0x16e   :  { %v768_v44 = vmax.f32 %v765_v0, 0.0  ;;  %v12776_v0 = vld [vmem:[#allocation25_spill] sm:$0xff] }
 0x16f   :  { %v12787_v13 = vld [vmem:[#allocation29_spill] sm:$0xff] }
 0x170   :  { %v10467_v28 = vand.u32 4294901760, %v768_v44 }
 0x172   :  { %12773 = vst [vmem:[#allocation36_spill] sm:$0xff] %v10467_v28  ;;  %v10470_v61 = vsub.f32 %v768_v44, %v10467_v28  ;;  %1147 = vmatmul.mubr.f32.vlgmr.msra.gmra.mxu1 %v10467_v28  ;;  %v12775_v44 = vld [vmem:[#allocation18_spill] sm:$0xff]  ;;  %v12790_v28 = vld [vmem:[#allocation33_spill] sm:$0xff] }
 0x173   :  { %1293 = vmatpush1.msra.mxu1 %v10054_v10  ;;  %1386 = vmatprep.mubr.f32.mxu1 %v12774_v8 }
 0x174   :  { %v912_v12 = vand.u32 4294901760, %v10470_v61  ;;  %1295 = vmatprep.subr.mxu1 %v10062_v15 }
 0x175   :  { %1297 = vmatpush1.msra.mxu1 %v10071_v18 }
 0x176   :  { %v913_v51 = vsub.f32 %v10470_v61, %v912_v12  ;;  %1299 = vmatprep.subr.mxu1 %v10081_v23 }
 0x177   :  { %1301 = vmatpush1.msra.mxu1 %v10097_v30 }
 0x178   :  { %1303 = vmatprep.subr.mxu1 %v10099_v34  ;;  %v914_v9 = vand.u32 4294901760, %v913_v51  ;;  %v12788_v51 = vld [vmem:[#allocation31_spill] sm:$0xff] }
 0x179   :  { %1305 = vmatpush1.msra.mxu1 %v10109_v45 }
 0x17a   :  { %1307 = vmatprep.subr.mxu1 %v10150_v38  ;;  %915 = vmatmul.mubr.f32.vlgmr.msra.gmra.mxu0 %v914_v9  ;;  %v12789_v9 = vld [vmem:[#allocation32_spill] sm:$0xff] }
 0x17b   :  { %1158 = vmatpush1.msra.mxu0 %v10069_v17  ;;  %1309 = vmatpush1.msra.mxu1 %v10161_v54 }
 0x17c   :  { %1161 = vmatprep.subr.mxu0 %v10079_v22  ;;  %1311 = vmatprep.subr.mxu1 %v10172_v2 }
 0x17d   :  { %1164 = vmatpush1.msra.mxu0 %v10095_v29  ;;  %1313 = vmatpush1.msra.mxu1 %v10184_v39 }
 0x17e   :  { %1167 = vmatprep.subr.mxu0 %v10107_v43  ;;  %1315 = vmatprep.subr.mxu1 %v10194_v6 }
 0x17f   :  { %1170 = vmatpush1.msra.mxu0 %v10117_v48  ;;  %1317 = vmatpush1.msra.mxu1 %v10201_v20 }
 0x180   :  { %1173 = vmatprep.subr.mxu0 %v10120_v53  ;;  %1319 = vmatprep.subr.mxu1 %v10203_v24 }
 0x181   :  { %1176 = vmatpush1.msra.mxu0 %v10131_v62  ;;  %1321 = vmatpush1.msra.mxu1 %v10213_v46 }
 0x182   :  { %1179 = vmatprep.subr.mxu0 %v10170_v1  ;;  %1323 = vmatprep.subr.mxu1 %v10254_v14 }
 0x183   :  { %1182 = vmatpush1.msra.mxu0 %v10182_v36  ;;  %1325 = vmatpush1.msra.mxu1 %v10265_v55 }
 0x184   :  { %1185 = vmatprep.subr.mxu0 %v10192_v4  ;;  %1327 = vmatprep.subr.mxu1 %v10276_v52 }
 0x185   :  { %1188 = vmatpush1.msra.mxu0 %v10199_v16  ;;  %1329 = vmatpush1.msra.mxu1 %v10288_v3 }
 0x186   :  { %1191 = vmatprep.subr.mxu0 %v10211_v35  ;;  %1331 = vmatprep.subr.mxu1 %v10298_v41 }
 0x187   :  { %1194 = vmatpush1.msra.mxu0 %v10221_v59  ;;  %1333 = vmatpush1.msra.mxu1 %v10305_v25 }
 0x188   :  { %1197 = vmatprep.subr.mxu0 %v10224_v63  ;;  %1335 = vmatprep.subr.mxu1 %v10307_v37 }
 0x189   :  { %1200 = vmatpush1.msra.mxu0 %v10235_v32  ;;  %1337 = vmatpush1.msra.mxu1 %v10317_v60 }
 0x18a   :  { %1203 = vmatprep.subr.mxu0 %v10274_v49  ;;  %1339 = vmatprep.subr.mxu1 %v10358_v21 }
 0x18b   :  { %1206 = vmatpush1.msra.mxu0 %v12775_v44  ;;  %1341 = vmatpush1.msra.mxu1 %v12776_v0 }
 0x18c   :  { %1209 = vmatprep.subr.mxu0 %v12777_v11  ;;  %1343 = vmatprep.subr.mxu1 %v10380_v47 }
 0x18d   :  { %1212 = vmatpush1.msra.mxu0 %v12778_v57  ;;  %1345 = vmatpush1.msra.mxu1 %v12779_v33 }
 0x18e   :  { %1215 = vmatprep.subr.mxu0 %v12780_v31  ;;  %1347 = vmatprep.subr.mxu1 %v12781_v7 }
 0x18f   :  { %1218 = vmatpush1.msra.mxu0 %v12782_v58  ;;  %1349 = vmatpush1.msra.mxu1 %v10409_v27 }
 0x190   :  { %1221 = vmatprep.subr.mxu0 %v12783_v19  ;;  %1351 = vmatprep.subr.mxu1 %v10411_v50 }
 0x191   :  { %1224 = vmatpush1.msra.mxu0 %v12784_v56  ;;  %1353 = vmatpush1.msra.mxu1 %v10421_v40 }
 0x192   :  { %1227 = vmatprep.subr.mxu0 %v12785_v42  ;;  %1390 = vmatmul.mubr.f32.vlgmr.msra.gmra.mxu1 %v912_v12  ;;  %v1683_v12 = vld [vmem:[%s12542_s5 + $0x68] sm:$0xff] }
 0x193   :  { %1565 = vmatprep.subr.mxu1 %v10049_v5  ;;  %1230 = vmatpush1.msra.mxu0 %v12786_v26  ;;  %v12791_v5 = vld [vmem:[#allocation34_spill] sm:$0xff] }
 0x194   :  { %1567 = vmatpush1.msra.mxu1 %v10054_v10  ;;  %1233 = vmatprep.subr.mxu0 %v12787_v13  ;;  %v12792_v10 = vld [vmem:[#allocation35_spill] sm:$0xff] }
 0x195   :  { %1569 = vmatprep.subr.mxu1 %v10062_v15  ;;  %1236 = vmatpush1.msra.mxu0 %v12788_v51  ;;  %v12793_v15 = vld [vmem:[#allocation17_spill] sm:$0xff] }
 0x196   :  { %1571 = vmatpush1.msra.mxu1 %v10071_v18  ;;  %1239 = vmatprep.subr.mxu0 %v12789_v9  ;;  %v12794_v18 = vand.u32 4294901760, %v12793_v15 }
 0x197   :  { %1573 = vmatprep.subr.mxu1 %v10081_v23  ;;  %1242 = vmatpush1.msra.mxu0 %v12790_v28  ;;  %v12795_v23 = vand.u32 4294901760, %v10069_v17  ;;  %v12799_v17 = vand.u32 4294901760, %v10117_v48  ;;  %v12803_v48 = vand.u32 4294901760, %v10182_v36  ;;  %v12810_v36 = vand.u32 4294901760, %v10274_v49 }
 0x198   :  { %1575 = vmatpush1.msra.mxu1 %v10097_v30  ;;  %1245 = vmatprep.subr.mxu0 %v12791_v5  ;;  %v12796_v30 = vand.u32 4294901760, %v10079_v22  ;;  %v12800_v22 = vand.u32 4294901760, %v10120_v53  ;;  %v12804_v53 = vand.u32 4294901760, %v10192_v4  ;;  %v12812_v4 = vand.u32 4294901760, %v12777_v11 }
 0x199   :  { %1577 = vmatprep.subr.mxu1 %v10099_v34  ;;  %1248 = vmatpush1.msra.mxu0 %v12792_v10  ;;  %v12797_v34 = vand.u32 4294901760, %v10095_v29  ;;  %v12801_v29 = vand.u32 4294901760, %v10131_v62  ;;  %v12805_v62 = vand.u32 4294901760, %v10199_v16  ;;  %v12816_v16 = vand.u32 4294901760, %v12783_v19 }
 0x19a   :  { %1281 = vmatprep.mubr.f32.mxu0 %v12774_v8  ;;  %1579 = vmatpush1.msra.mxu1 %v10109_v45  ;;  %v12798_v45 = vand.u32 4294901760, %v10107_v43  ;;  %v12802_v43 = vand.u32 4294901760, %v10170_v1  ;;  %v12808_v1 = vand.u32 4294901760, %v10224_v63  ;;  %v12823_v63 = vand.u32 4294901760, %v12789_v9 }
 0x19b   :  { %1284 = vmatmul.mubr.f32.vlgmr.msra.gmra.mxu0 %v10470_v61  ;;  %1399 = vmatprep.subr.mxu0 %v12794_v18 }
 0x19c   :  { %1581 = vmatprep.subr.mxu1 %v10150_v38  ;;  %1403 = vmatpush1.msra.mxu0 %v12795_v23  ;;  %v12806_v38 = vand.u32 4294901760, %v10211_v35  ;;  %v12820_v35 = vand.u32 4294901760, %v12786_v26 }
 0x19d   :  { %1583 = vmatpush1.msra.mxu1 %v10161_v54  ;;  %1407 = vmatprep.subr.mxu0 %v12796_v30  ;;  %v12807_v54 = vand.u32 4294901760, %v10221_v59  ;;  %v12822_v59 = vand.u32 4294901760, %v12788_v51 }
 0x19e   :  { %1585 = vmatprep.subr.mxu1 %v10172_v2  ;;  %1411 = vmatpush1.msra.mxu0 %v12797_v34  ;;  %v12809_v2 = vand.u32 4294901760, %v10235_v32  ;;  %v12824_v32 = vand.u32 4294901760, %v12790_v28 }
 0x19f   :  { %1587 = vmatpush1.msra.mxu1 %v10184_v39  ;;  %1415 = vmatprep.subr.mxu0 %v12798_v45  ;;  %v12811_v39 = vand.u32 4294901760, %v12775_v44  ;;  %v1698_v44 = vld [vmem:[%s12542_s5 + $0xe0] sm:$0xff]  ;;  %v1697_v45 = vld [vmem:[%s12542_s5 + $0xd8] sm:$0xff] }
 0x1a0   :  { %1589 = vmatprep.subr.mxu1 %v10194_v6  ;;  %1419 = vmatpush1.msra.mxu0 %v12799_v17  ;;  %v12814_v6 = vand.u32 4294901760, %v12780_v31 }
 0x1a1   :  { %1591 = vmatpush1.msra.mxu1 %v10201_v20  ;;  %1423 = vmatprep.subr.mxu0 %v12800_v22  ;;  %v12818_v20 = vand.u32 4294901760, %v12785_v42 }
 0x1a2   :  { %1593 = vmatprep.subr.mxu1 %v10203_v24  ;;  %1427 = vmatpush1.msra.mxu0 %v12801_v29  ;;  %v12819_v24 = vld [vmem:[#allocation36_spill] sm:$0xff] }
 0x1a3   :  { %1595 = vmatpush1.msra.mxu1 %v10213_v46  ;;  %1431 = vmatprep.subr.mxu0 %v12802_v43  ;;  %v12821_v46 = vand.u32 4294901760, %v12787_v13 }
 0x1a4   :  { %1597 = vmatprep.subr.mxu1 %v10254_v14  ;;  %1435 = vmatpush1.msra.mxu0 %v12803_v48  ;;  %v12826_v14 = vand.u32 4294901760, %v12792_v10  ;;  %v1681_v48 = vld [vmem:[%s12542_s5 + $0x58] sm:$0xff] }
 0x1a5   :  { %1599 = vmatpush1.msra.mxu1 %v10265_v55  ;;  %1439 = vmatprep.subr.mxu0 %v12804_v53  ;;  %v1701_v55 = vld [vmem:[%s12542_s5 + $0xf8] sm:$0xff] }
 0x1a6   :  { %1601 = vmatprep.subr.mxu1 %v10276_v52  ;;  %1443 = vmatpush1.msra.mxu0 %v12805_v62  ;;  %v12825_v52 = vand.u32 4294901760, %v12791_v5  ;;  %v10643_v49 = vand.u32 4294901760, %v1701_v55 }
 0x1a7   :  { %1603 = vmatpush1.msra.mxu1 %v10288_v3  ;;  %1447 = vmatprep.subr.mxu0 %v12806_v38  ;;  %v1685_v3 = vld [vmem:[%s12542_s5 + $0x78] sm:$0xff] }
 0x1a8   :  { %1605 = vmatprep.subr.mxu1 %v10298_v41  ;;  %1451 = vmatpush1.msra.mxu0 %v12807_v54  ;;  %12827 = vst [vmem:[#allocation18_spill] sm:$0xff] %v10643_v49  ;;  %v10648_v41 = vand.u32 4294901760, %v1685_v3 }
 0x1a9   :  { %1607 = vmatpush1.msra.mxu1 %v10305_v25  ;;  %1455 = vmatprep.subr.mxu0 %v12808_v1  ;;  %v1684_v25 = vld [vmem:[%s12542_s5 + $0x70] sm:$0xff] }
 0x1aa   :  { %1609 = vmatprep.subr.mxu1 %v10307_v37  ;;  %1459 = vmatpush1.msra.mxu0 %v12809_v2  ;;  %v12813_v37 = vand.u32 4294901760, %v12778_v57  ;;  %v10664_v28 = vand.u32 4294901760, %v1684_v25  ;;  %v10679_v11 = vsub.f32 %v1685_v3, %v10648_v41  ;;  %v10681_v57 = vand.u32 4294901760, %v1683_v12  ;;  %v1696_v1 = vld [vmem:[%s12542_s5 + $0xd0] sm:$0xff] }
 0x1ab   :  { %1611 = vmatpush1.msra.mxu1 %v10317_v60  ;;  %1463 = vmatprep.subr.mxu0 %v12810_v36  ;;  %v1699_v60 = vld [vmem:[%s12542_s5 + $0xe8] sm:$0xff]  ;;  %v1680_v2 = vld [vmem:[%s12542_s5 + $0x50] sm:$0xff] }
 0x1ac   :  { %1613 = vmatprep.subr.mxu1 %v10358_v21  ;;  %1467 = vmatpush1.msra.mxu0 %v12811_v39  ;;  %v12815_v21 = vand.u32 4294901760, %v12782_v58  ;;  %v10666_v61 = vand.u32 4294901760, %v1699_v60  ;;  %v10693_v19 = vsub.f32 %v1684_v25, %v10664_v28  ;;  %v12640_v42 = vand.u32 4294901760, %v10679_v11  ;;  %v1695_v36 = vld [vmem:[%s12542_s5 + $0xc8] sm:$0xff] }
 0x1ad   :  { %1615 = vmatpush1.msra.mxu1 %v12776_v0  ;;  %1471 = vmatprep.subr.mxu0 %v12812_v4  ;;  %v1682_v0 = vld [vmem:[%s12542_s5 + $0x60] sm:$0xff]  ;;  %v10701_v26 = vsub.f32 %v1683_v12, %v10681_v57 }
 0x1ae   :  { %1617 = vmatprep.subr.mxu1 %v10380_v47  ;;  %1475 = vmatpush1.msra.mxu0 %v12813_v37  ;;  %v12817_v47 = vand.u32 4294901760, %v12784_v56  ;;  %v10685_v31 = vand.u32 4294901760, %v1682_v0  ;;  %v10696_v56 = vsub.f32 %v1699_v60, %v10666_v61  ;;  %v12636_v10 = vand.u32 4294901760, %v10693_v19  ;;  %v1678_v60 = vld [vmem:[%s12542_s5 + $0x40] sm:$0xff] }
 0x1af   :  { %1619 = vmatpush1.msra.mxu1 %v12779_v33  ;;  %1479 = vmatprep.subr.mxu0 %v12814_v6  ;;  %v10683_v33 = vand.u32 4294901760, %v1698_v44  ;;  %v1819_v18 = vsub.f32 %v10679_v11, %v12640_v42  ;;  %v12633_v23 = vand.u32 4294901760, %v10701_v26  ;;  %v10759_v6 = vand.u32 4294901760, %v1697_v45  ;;  %v1671_v42 = vld [vmem:[%s12542_s5 + $0x8] sm:$0xff] }
 0x1b0   :  { %1621 = vmatprep.subr.mxu1 %v12781_v7  ;;  %1483 = vmatpush1.msra.mxu0 %v12815_v21  ;;  %v10707_v51 = vsub.f32 %v1682_v0, %v10685_v31  ;;  %v12635_v15 = vand.u32 4294901760, %v10696_v56  ;;  %v1826_v29 = vsub.f32 %v10693_v19, %v12636_v10 }
 0x1b1   :  { %1623 = vmatpush1.msra.mxu1 %v10409_v27  ;;  %1487 = vmatprep.subr.mxu0 %v12816_v16  ;;  %v10660_v27 = vsub.f32 %v1701_v55, %v10643_v49  ;;  %v10704_v13 = vsub.f32 %v1698_v44, %v10683_v33  ;;  %v1820_v53 = vand.u32 4294901760, %v1819_v18  ;;  %v1833_v62 = vsub.f32 %v10701_v26, %v12633_v23 }
 0x1b2   :  { %1625 = vmatprep.subr.mxu1 %v10411_v50  ;;  %1491 = vmatpush1.msra.mxu0 %v12817_v47  ;;  %v1700_v50 = vld [vmem:[%s12542_s5 + $0xf0] sm:$0xff]  ;;  %v12631_v34 = vand.u32 4294901760, %v10707_v51  ;;  %v1945_v43 = vsub.f32 %v10696_v56, %v12635_v15  ;;  %v1827_v4 = vand.u32 4294901760, %v1826_v29  ;;  %v10761_v47 = vand.u32 4294901760, %v1681_v48  ;;  %v1689_v15 = vld [vmem:[%s12542_s5 + $0x98] sm:$0xff] }
 0x1b3   :  { %1627 = vmatpush1.msra.mxu1 %v10421_v40  ;;  %1660 = vmatprep.mubr.f32.mxu1 %v12774_v8  ;;  %12828 = vst [vmem:[#allocation25_spill] sm:$0xff] %v10660_v27  ;;  %v10662_v40 = vand.u32 4294901760, %v1700_v50  ;;  %v12644_v7 = vand.u32 4294901760, %v10660_v27  ;;  %v12632_v30 = vand.u32 4294901760, %v10704_v13  ;;  %v1834_v21 = vand.u32 4294901760, %v1833_v62  ;;  %v1693_v62 = vld [vmem:[%s12542_s5 + $0xb8] sm:$0xff] }
 0x1b4   :  { %1495 = vmatprep.subr.mxu0 %v12818_v20  ;;  %1662 = vmatmul.mubr.f32.vlgmr.msra.gmra.mxu1 %v12819_v24  ;;  %v1840_v54 = vsub.f32 %v10707_v51, %v12631_v34  ;;  %v1946_v37 = vand.u32 4294901760, %v1945_v43  ;;  %v10764_v20 = vsub.f32 %v1697_v45, %v10759_v6 }
 0x1b5   :  { %1499 = vmatpush1.msra.mxu0 %v12820_v35  ;;  %1556 = vmatprep.mubr.f32.mxu0 %v12774_v8  ;;  %v10690_v58 = vsub.f32 %v1700_v50, %v10662_v40  ;;  %v1931_v9 = vsub.f32 %v10660_v27, %v12644_v7  ;;  %v1952_v38 = vsub.f32 %v10704_v13, %v12632_v30  ;;  %v10768_v35 = vand.u32 4294901760, %v1680_v2 }
 0x1b6   :  { %1503 = vmatprep.subr.mxu0 %v12821_v46  ;;  %v10770_v46 = vand.u32 4294901760, %v1695_v36  ;;  %v12630_v55 = vand.u32 4294901760, %v10764_v20  ;;  %v10961_v8 = vand.u32 4294901760, %v1689_v15 }
 0x1b7   :  { %1507 = vmatpush1.msra.mxu0 %v12822_v59  ;;  %v12638_v5 = vand.u32 4294901760, %v10690_v58  ;;  %v1932_v17 = vand.u32 4294901760, %v1931_v9  ;;  %v1953_v16 = vand.u32 4294901760, %v1952_v38  ;;  %v1679_v59 = vld [vmem:[%s12542_s5 + $0x48] sm:$0xff]  ;;  %v10790_v50 = vsub.f32 %v1680_v2, %v10768_v35 }
 0x1b8   :  { %1511 = vmatprep.subr.mxu0 %v12823_v63  ;;  %v1841_v63 = vand.u32 4294901760, %v1840_v54  ;;  %v10793_v25 = vsub.f32 %v1695_v36, %v10770_v46  ;;  %v10805_v9 = vand.u32 4294901760, %v1678_v60  ;;  %v1959_v18 = vsub.f32 %v10764_v20, %v12630_v55  ;;  %v1677_v36 = vld [vmem:[%s12542_s5 + $0x38] sm:$0xff] }
 0x1b9   :  { %1515 = vmatpush1.msra.mxu0 %v12824_v32  ;;  %v1938_v22 = vsub.f32 %v10690_v58, %v12638_v5  ;;  %8722 = vmatprep.subr.mxu1 %v1932_v17  ;;  %v10777_v32 = vsub.f32 %v1681_v48, %v10761_v47  ;;  %v12625_v17 = vand.u32 4294901760, %v10790_v50 }
 0x1ba   :  { %1519 = vmatprep.subr.mxu0 %v12825_v52  ;;  %8723 = vmatpush3.msra.mxu1 %v1820_v53  ;;  %v10779_v52 = vand.u32 4294901760, %v1679_v59  ;;  %v10823_v53 = vsub.f32 %v1678_v60, %v10805_v9  ;;  %v1960_v38 = vand.u32 4294901760, %v1959_v18 }
 0x1bb   :  { %1523 = vmatpush1.msra.mxu0 %v12826_v14  ;;  %v1939_v39 = vand.u32 4294901760, %v1938_v22  ;;  %v1694_v14 = vld [vmem:[%s12542_s5 + $0xc0] sm:$0xff]  ;;  %v12629_v12 = vand.u32 4294901760, %v10777_v32  ;;  %v12624_v22 = vand.u32 4294901760, %v10793_v25 }
 0x1bc   :  { %1558 = vmatmul.mubr.f32.vlgmr.msra.gmra.mxu0 %v12819_v24  ;;  %8687 = vmatprep.subr.mxu0 %v10643_v49  ;;  %v10766_v24 = vand.u32 4294901760, %v1696_v1  ;;  %v10801_v44 = vsub.f32 %v1679_v59, %v10779_v52  ;;  %v10803_v0 = vand.u32 4294901760, %v1694_v14  ;;  %v1676_v59 = vld [vmem:[%s12542_s5 + $0x30] sm:$0xff] }
 0x1bd   :  { %8688 = vmatpush3.msra.mxu0 %v10648_v41  ;;  %8724 = vmatprep.subr.mxu1 %v1939_v39  ;;  %v1847_v29 = vsub.f32 %v10777_v32, %v12629_v12  ;;  %v1973_v2 = vsub.f32 %v10793_v25, %v12624_v22 }
 0x1be   :  { %8689 = vmatprep.subr.mxu0 %v10662_v40  ;;  %8725 = vmatpush3.msra.mxu1 %v1827_v4  ;;  %v10787_v3 = vsub.f32 %v1696_v1, %v10766_v24  ;;  %v12623_v43 = vand.u32 4294901760, %v10801_v44  ;;  %v10820_v48 = vsub.f32 %v1694_v14, %v10803_v0  ;;  %v1854_v1 = vsub.f32 %v10790_v50, %v12625_v17 }
 0x1bf   :  { %8690 = vmatpush3.msra.mxu0 %v10664_v28  ;;  %8726 = vmatprep.subr.mxu1 %v1946_v37  ;;  %v1848_v39 = vand.u32 4294901760, %v1847_v29  ;;  %v1974_v18 = vand.u32 4294901760, %v1973_v2  ;;  %v10857_v29 = vand.u32 4294901760, %v1693_v62  ;;  %v10875_v2 = vand.u32 4294901760, %v1676_v59 }
 0x1c0   :  { %8691 = vmatprep.subr.mxu0 %v10666_v61  ;;  %8727 = vmatpush3.msra.mxu1 %v1834_v21  ;;  %v12626_v45 = vand.u32 4294901760, %v10787_v3  ;;  %v1861_v4 = vsub.f32 %v10801_v44, %v12623_v43  ;;  %v12628_v37 = vand.u32 4294901760, %v10820_v48  ;;  %v12627_v21 = vand.u32 4294901760, %v10823_v53  ;;  %v1675_v43 = vld [vmem:[%s12542_s5 + $0x28] sm:$0xff] }
 0x1c1   :  { %8692 = vmatpush3.msra.mxu0 %v10681_v57  ;;  %8728 = vmatprep.subr.mxu1 %v1953_v16  ;;  %v1692_v16 = vld [vmem:[%s12542_s5 + $0xb0] sm:$0xff]  ;;  %v1855_v60 = vand.u32 4294901760, %v1854_v1  ;;  %v10889_v12 = vand.u32 4294901760, %v1675_v43  ;;  %v10897_v30 = vsub.f32 %v1676_v59, %v10875_v2 }
 0x1c2   :  { %8693 = vmatprep.subr.mxu0 %v10683_v33  ;;  %8729 = vmatpush3.msra.mxu1 %v1841_v63  ;;  %v1966_v54 = vsub.f32 %v10787_v3, %v12626_v45  ;;  %v1691_v63 = vld [vmem:[%s12542_s5 + $0xa8] sm:$0xff]  ;;  %v1862_v22 = vand.u32 4294901760, %v1861_v4  ;;  %v1980_v17 = vsub.f32 %v10820_v48, %v12628_v37  ;;  %v1868_v45 = vsub.f32 %v10823_v53, %v12627_v21  ;;  %v1690_v4 = vld [vmem:[%s12542_s5 + $0xa0] sm:$0xff] }
 0x1c3   :  { %8694 = vmatpush3.msra.mxu0 %v10685_v31  ;;  %8730 = vmatprep.subr.mxu1 %v1960_v38  ;;  %v10868_v38 = vand.u32 4294901760, %v1677_v36  ;;  %v10873_v1 = vand.u32 4294901760, %v1692_v16  ;;  %v1674_v21 = vld [vmem:[%s12542_s5 + $0x20] sm:$0xff]  ;;  %12832 = vst [vmem:[#allocation21_spill] sm:$0xff] %v10897_v30 }
 0x1c4   :  { %8695 = vmatprep.subr.mxu0 %v10759_v6  ;;  %v1967_v14 = vand.u32 4294901760, %v1966_v54  ;;  %8731 = vmatpush3.msra.mxu1 %v1848_v39  ;;  %v10871_v54 = vsub.f32 %v1693_v62, %v10857_v29  ;;  %v10877_v39 = vand.u32 4294901760, %v1691_v63  ;;  %v1869_v62 = vand.u32 4294901760, %v1868_v45 }
 0x1c5   :  { %8696 = vmatpush3.msra.mxu0 %v10761_v47  ;;  %v10887_v37 = vsub.f32 %v1677_v36, %v10868_v38  ;;  %v10894_v34 = vsub.f32 %v1692_v16, %v10873_v1  ;;  %v10907_v36 = vand.u32 4294901760, %v1690_v4 }
 0x1c6   :  { %8697 = vmatprep.subr.mxu0 %v10766_v24  ;;  %8732 = vmatprep.subr.mxu1 %v1967_v14  ;;  %12829 = vst [vmem:[#allocation19_spill] sm:$0xff] %v10871_v54  ;;  %v1981_v14 = vand.u32 4294901760, %v1980_v17  ;;  %v12634_v55 = vand.u32 4294901760, %v10871_v54  ;;  %v10905_v17 = vsub.f32 %v1675_v43, %v10889_v12 }
 0x1c7   :  { %8698 = vmatpush3.msra.mxu0 %v10768_v35  ;;  %8733 = vmatpush3.msra.mxu1 %v1855_v60  ;;  %12830 = vst [vmem:[#allocation20_spill] sm:$0xff] %v10887_v37  ;;  %12831 = vst [vmem:[#allocation28_spill] sm:$0xff] %v10894_v34  ;;  %v10900_v60 = vsub.f32 %v1691_v63, %v10877_v39  ;;  %v12637_v45 = vand.u32 4294901760, %v10887_v37  ;;  %v12639_v59 = vand.u32 4294901760, %v10894_v34 }
 0x1c8   :  { %8699 = vmatprep.subr.mxu0 %v10770_v46  ;;  %8734 = vmatprep.subr.mxu1 %v1974_v18  ;;  %12834 = vst [vmem:[#allocation22_spill] sm:$0xff] %v10905_v17  ;;  %v10909_v18 = vand.u32 4294901760, %v1674_v21  ;;  %v1987_v16 = vsub.f32 %v10871_v54, %v12634_v55  ;;  %v12643_v23 = vand.u32 4294901760, %v10905_v17 }
 0x1c9   :  { %8700 = vmatpush3.msra.mxu0 %v10779_v52  ;;  %12833 = vst [vmem:[#allocation30_spill] sm:$0xff] %v10900_v60  ;;  %8735 = vmatpush3.msra.mxu1 %v1862_v22  ;;  %v12641_v22 = vand.u32 4294901760, %v10897_v30  ;;  %v12642_v63 = vand.u32 4294901760, %v10900_v60  ;;  %v1875_v43 = vsub.f32 %v10887_v37, %v12637_v45 }
 0x1ca   :  { %8701 = vmatprep.subr.mxu0 %v10803_v0  ;;  %12835 = vst [vmem:[#allocation23_spill] sm:$0xff] %v10909_v18  ;;  %8736 = vmatprep.subr.mxu1 %v1981_v14  ;;  %v10924_v14 = vsub.f32 %v1690_v4, %v10907_v36  ;;  %v10927_v55 = vsub.f32 %v1674_v21, %v10909_v18  ;;  %v1988_v10 = vand.u32 4294901760, %v1987_v16  ;;  %v1673_v4 = vld [vmem:[%s12542_s5 + $0x18] sm:$0xff] }
 0x1cb   :  { %8702 = vmatpush3.msra.mxu0 %v10805_v9  ;;  %8737 = vmatpush3.msra.mxu1 %v1869_v62  ;;  %v1994_v62 = vsub.f32 %v10894_v34, %v12639_v59  ;;  %v1882_v45 = vsub.f32 %v10897_v30, %v12641_v22  ;;  %v2001_v21 = vsub.f32 %v10900_v60, %v12642_v63  ;;  %v1876_v5 = vand.u32 4294901760, %v1875_v43  ;;  %v1688_v22 = vld [vmem:[%s12542_s5 + $0x90] sm:$0xff]  ;;  %v1687_v43 = vld [vmem:[%s12542_s5 + $0x88] sm:$0xff] }
 0x1cc   :  { %8703 = vmatprep.subr.mxu0 %v10857_v29  ;;  %12836 = vst [vmem:[#allocation24_spill] sm:$0xff] %v10924_v14  ;;  %12837 = vst [vmem:[#allocation26_spill] sm:$0xff] %v10927_v55  ;;  %v1889_v16 = vsub.f32 %v10905_v17, %v12643_v23  ;;  %v1672_v63 = vld [vmem:[%s12542_s5 + $0x10] sm:$0xff]  ;;  %8738 = vmatprep.subr.mxu1 %v1988_v10  ;;  %v12838_v60 = vand.u32 4294901760, %v10924_v14  ;;  %v12839_v34 = vand.u32 4294901760, %v10927_v55  ;;  %v10972_v10 = vand.u32 4294901760, %v1673_v4 }
 0x1cd   :  { %8704 = vmatpush3.msra.mxu0 %v10868_v38  ;;  %v1995_v23 = vand.u32 4294901760, %v1994_v62  ;;  %v1883_v7 = vand.u32 4294901760, %v1882_v45  ;;  %v2002_v59 = vand.u32 4294901760, %v2001_v21  ;;  %8739 = vmatpush3.msra.mxu1 %v1876_v5  ;;  %v10975_v45 = vsub.f32 %v1689_v15, %v10961_v8 }
 0x1ce   :  { %8705 = vmatprep.subr.mxu0 %v10873_v1  ;;  %v1890_v17 = vand.u32 4294901760, %v1889_v16  ;;  %v2008_v30 = vsub.f32 %v10924_v14, %v12838_v60  ;;  %v1896_v37 = vsub.f32 %v10927_v55, %v12839_v34  ;;  %v10977_v62 = vand.u32 4294901760, %v1688_v22  ;;  %v1686_v60 = vld [vmem:[%s12542_s5 + $0x80] sm:$0xff] }
 0x1cf   :  { %8706 = vmatpush3.msra.mxu0 %v10875_v2  ;;  %8740 = vmatprep.subr.mxu1 %v1995_v23  ;;  %12840 = vst [vmem:[#allocation27_spill] sm:$0xff] %v10975_v45  ;;  %v10979_v21 = vand.u32 4294901760, %v1672_v63  ;;  %v10981_v5 = vand.u32 4294901760, %v1687_v43  ;;  %v1670_v34 = vld [vmem:[%s12542_s5] sm:$0xff]  ;;  %v10991_v16 = vsub.f32 %v1673_v4, %v10972_v10  ;;  %v10993_v55 = vand.u32 4294901760, %v1671_v42 }
 0x1d0   :  { %8707 = vmatprep.subr.mxu0 %v10877_v39  ;;  %12841 = vst [vmem:[#allocation29_spill] sm:$0xff] %v10977_v62  ;;  %8741 = vmatpush3.msra.mxu1 %v1883_v7  ;;  %v2009_v23 = vand.u32 4294901760, %v2008_v30  ;;  %v1897_v15 = vand.u32 4294901760, %v1896_v37  ;;  %v12666_v14 = vand.u32 4294901760, %v10975_v45  ;;  %v10998_v54 = vsub.f32 %v1688_v22, %v10977_v62 }
 0x1d1   :  { %8708 = vmatpush3.msra.mxu0 %v10889_v12  ;;  %12842 = vst [vmem:[#allocation31_spill] sm:$0xff] %v10979_v21  ;;  %12843 = vst [vmem:[#allocation32_spill] sm:$0xff] %v10981_v5  ;;  %8742 = vmatprep.subr.mxu1 %v2002_v59  ;;  %v11004_v7 = vsub.f32 %v1687_v43, %v10981_v5  ;;  %v12669_v30 = vand.u32 4294901760, %v10991_v16  ;;  %v11009_v37 = vsub.f32 %v1671_v42, %v10993_v55 }
 0x1d2   :  { %8709 = vmatprep.subr.mxu0 %v10907_v36  ;;  %12844 = vst [vmem:[#allocation33_spill] sm:$0xff] %v10991_v16  ;;  %12845 = vst [vmem:[#allocation34_spill] sm:$0xff] %v10993_v55  ;;  %8743 = vmatpush3.msra.mxu1 %v1890_v17  ;;  %v11011_v59 = vand.u32 4294901760, %v1686_v60  ;;  %v11013_v4 = vand.u32 4294901760, %v1670_v34  ;;  %v2015_v22 = vsub.f32 %v10975_v45, %v12666_v14 }
 0x1d3   :  { %8710 = vmatpush3.msra.mxu0 %v10909_v18  ;;  %12846 = vst [vmem:[#allocation35_spill] sm:$0xff] %v10998_v54  ;;  %v11001_v18 = vsub.f32 %v1672_v63, %v10979_v21  ;;  %12848 = vst [vmem:[#allocation36_spill] sm:$0xff] %v11004_v7  ;;  %8744 = vmatprep.subr.mxu1 %v2009_v23  ;;  %v12674_v63 = vand.u32 4294901760, %v10998_v54  ;;  %v1903_v42 = vsub.f32 %v10991_v16, %v12669_v30 }
 0x1d4   :  { %8711 = vmatprep.subr.mxu0 %v10961_v8  ;;  %12849 = vst [vmem:[#allocation37_spill] sm:$0xff] %v11009_v37  ;;  %12850 = vst [vmem:[#allocation38_spill] sm:$0xff] %v11011_v59  ;;  %8745 = vmatpush3.msra.mxu1 %v1897_v15  ;;  %v11028_v23 = vsub.f32 %v1686_v60, %v11011_v59  ;;  %v11031_v14 = vsub.f32 %v1670_v34, %v11013_v4  ;;  %v2016_v17 = vand.u32 4294901760, %v2015_v22 }
 0x1d5   :  { %8712 = vmatpush3.msra.mxu0 %v10972_v10  ;;  %12847 = vst [vmem:[#allocation17_spill] sm:$0xff] %v11001_v18  ;;  %12851 = vst [vmem:[#allocation39_spill] sm:$0xff] %v11013_v4  ;;  %v2022_v43 = vsub.f32 %v10998_v54, %v12674_v63  ;;  %v12854_v15 = vand.u32 4294901760, %v11001_v18  ;;  %v12855_v30 = vand.u32 4294901760, %v11004_v7  ;;  %v1904_v60 = vand.u32 4294901760, %v1903_v42 }
 0x1d6   :  { %8713 = vmatprep.subr.mxu0 %v10977_v62  ;;  %12852 = vst [vmem:[#allocation40_spill] sm:$0xff] %v11028_v23  ;;  %12853 = vst [vmem:[#allocation41_spill] sm:$0xff] %v11031_v14  ;;  %v12856_v34 = vand.u32 4294901760, %v11009_v37  ;;  %v12682_v22 = vand.u32 4294901760, %v11028_v23  ;;  %8746 = vmatprep.subr.mxu1 %v2016_v17 }
 0x1d7   :  { %8714 = vmatpush3.msra.mxu0 %v10979_v21  ;;  %v1910_v45 = vsub.f32 %v11001_v18, %v12854_v15  ;;  %v2029_v21 = vsub.f32 %v11004_v7, %v12855_v30  ;;  %v2023_v63 = vand.u32 4294901760, %v2022_v43  ;;  %8747 = vmatpush3.msra.mxu1 %v1904_v60 }
 0x1d8   :  { %8715 = vmatprep.subr.mxu0 %v10981_v5  ;;  %v1917_v16 = vsub.f32 %v11009_v37, %v12856_v34  ;;  %v2036_v42 = vsub.f32 %v11028_v23, %v12682_v22 }
 0x1d9   :  { %8716 = vmatpush3.msra.mxu0 %v10993_v55  ;;  %v12681_v55 = vand.u32 4294901760, %v11031_v14  ;;  %v1911_v15 = vand.u32 4294901760, %v1910_v45  ;;  %v2030_v18 = vand.u32 4294901760, %v2029_v21  ;;  %8748 = vmatprep.subr.mxu1 %v2023_v63 }
 0x1da   :  { %8717 = vmatprep.subr.mxu0 %v11011_v59  ;;  %v1918_v30 = vand.u32 4294901760, %v1917_v16  ;;  %v2037_v37 = vand.u32 4294901760, %v2036_v42  ;;  %v8567_v45 = vld.sshfl [vmem:[%s12541_s4] sm:$0x33 pattern:$0x76325410] }
 0x1db   :  { %8718 = vmatpush3.msra.mxu0 %v11013_v4  ;;  %v1924_v34 = vsub.f32 %v11031_v14, %v12681_v55  ;;  %8749 = vmatpush3.msra.mxu1 %v1911_v15  ;;  %v810_v16 = vcombine.high %v8567_v45, %v8567_v45 }
 0x1dc   :  { %8757 = vmatprep.subr.mxu0 %v10660_v27  ;;  %8750 = vmatprep.subr.mxu1 %v2030_v18 }
 0x1dd   :  { %v1925_v7 = vand.u32 4294901760, %v1924_v34  ;;  %8751 = vmatpush3.msra.mxu1 %v1918_v30 }
 0x1de   :  { %8752 = vmatprep.subr.mxu1 %v2037_v37 }
 0x1df   :  { %8753 = vmatpush3.msra.mxu1 %v1925_v7 }
 0x1e0   :  { %8792 = vmatprep.subr.mxu1 %v10643_v49 }
 0x232   :  { %v1148_v17 = vpop.f32.mrf.mxu1 }
 0x234   :  { %v1150_v15 = vpop.f32.mrf.mxu1 }
 0x23a   :  { %v916_v21 = vpop.f32.mrf.mxu0 }
 0x23b   :  { %v917_v60 = vadd.f32 %v8567_v45, %v916_v21 }
 0x23c   :  { %v918_v43 = vpop.f32.mrf.mxu0 }
 0x23d   :  { %v919_v63 = vadd.f32 %v918_v43, %v810_v16  ;;  %v1149_v42 = vadd.f32 %v1148_v17, %v917_v60 }
 0x23f   :  { %v1151_v37 = vadd.f32 %v1150_v15, %v919_v63  ;;  %v12862_v15 = vld [vmem:[#allocation21_spill] sm:$0xff] }
 0x252   :  { %v1391_v34 = vpop.f32.mrf.mxu1 }
 0x254   :  { %v1393_v22 = vpop.f32.mrf.mxu1 }
 0x25b   :  { %v1285_v55 = vpop.f32.mrf.mxu0 }
 0x25c   :  { %v1286_v30 = vadd.f32 %v1285_v55, %v1149_v42  ;;  %v12863_v42 = vld [vmem:[#allocation31_spill] sm:$0xff] }
 0x25d   :  { %v1287_v18 = vpop.f32.mrf.mxu0 }
 0x25e   :  { %v1288_v7 = vadd.f32 %v1287_v18, %v1151_v37  ;;  %v1392_v27 = vadd.f32 %v1391_v34, %v1286_v30  ;;  %v12864_v34 = vld [vmem:[#allocation30_spill] sm:$0xff]  ;;  %v12865_v18 = vld [vmem:[#allocation32_spill] sm:$0xff] }
 0x25f   :  { %v12866_v30 = vld [vmem:[#allocation22_spill] sm:$0xff] }
 0x260   :  { %v1394_v49 = vadd.f32 %v1393_v22, %v1288_v7  ;;  %v12861_v22 = vld [vmem:[#allocation29_spill] sm:$0xff]  ;;  %v12867_v37 = vld [vmem:[#allocation34_spill] sm:$0xff]  ;;  %v12868_v7 = vld [vmem:[#allocation24_spill] sm:$0xff] }
 0x274   :  { %v1663_v14 = vpop.f32.mrf.mxu1 }
 0x276   :  { %v1665_v62 = vpop.f32.mrf.mxu1 }
 0x27c   :  { %v1559_v23 = vpop.f32.mrf.mxu0 }
 0x27d   :  { %v1560_v54 = vadd.f32 %v1559_v23, %v1392_v27  ;;  %v12860_v23 = vld [vmem:[#allocation28_spill] sm:$0xff] }
 0x27e   :  { %v1561_v4 = vpop.f32.mrf.mxu0 }
 0x27f   :  { %v1664_v59 = vadd.f32 %v1663_v14, %v1560_v54  ;;  %v1562_v5 = vadd.f32 %v1561_v4, %v1394_v49  ;;  %v12859_v4 = vld [vmem:[#allocation20_spill] sm:$0xff] }
 0x281   :  { %v1668_v45 = vmax.f32 %v1664_v59, 0.0  ;;  %v1666_v21 = vadd.f32 %v1665_v62, %v1562_v5  ;;  %v12857_v5 = vld [vmem:[#allocation23_spill] sm:$0xff] }
 0x282   :  { %v12858_v59 = vld [vmem:[#allocation19_spill] sm:$0xff] }
 0x283   :  { %v11061_v16 = vand.u32 4294901760, %v1668_v45  ;;  %v1669_v17 = vmax.f32 %v1666_v21, 0.0  ;;  %v12870_v21 = vld [vmem:[#allocation26_spill] sm:$0xff] }
 0x285   :  { %v11064_v43 = vsub.f32 %v1668_v45, %v11061_v16  ;;  %v11066_v55 = vand.u32 4294901760, %v1669_v17  ;;  %v12869_v45 = vld [vmem:[#allocation38_spill] sm:$0xff] }
 0x287   :  { %v1807_v60 = vand.u32 4294901760, %v11064_v43  ;;  %v1800_v63 = vsub.f32 %v1669_v17, %v11066_v55  ;;  %2040 = vmatprep.mubr.f32.mxu1 %v11066_v55  ;;  %v12871_v17 = vld [vmem:[#allocation39_spill] sm:$0xff] }
 0x288   :  { %2042 = vmatmul.mubr.f32.vlgmr.msra.gmra.mxu1 %v11061_v16 }
 0x289   :  { %8793 = vmatpush3.msra.mxu1 %v10648_v41  ;;  %v1801_v49 = vand.u32 4294901760, %v1800_v63  ;;  %v1808_v27 = vsub.f32 %v11064_v43, %v1807_v60 }
 0x28a   :  { %8794 = vmatprep.subr.mxu1 %v10662_v40 }
 0x28b   :  { %8795 = vmatpush3.msra.mxu1 %v10664_v28  ;;  %2284 = vmatprep.mubr.f32.mxu1 %v1801_v49  ;;  %v1802_v54 = vsub.f32 %v1800_v63, %v1801_v49  ;;  %v1809_v62 = vand.u32 4294901760, %v1808_v27  ;;  %v12873_v49 = vld [vmem:[#allocation18_spill] sm:$0xff]  ;;  %v12874_v27 = vld [vmem:[#allocation33_spill] sm:$0xff] }
 0x28c   :  { %8796 = vmatprep.subr.mxu1 %v10666_v61 }
 0x28d   :  { %8797 = vmatpush3.msra.mxu1 %v10681_v57  ;;  %v1803_v14 = vand.u32 4294901760, %v1802_v54  ;;  %v12875_v54 = vld [vmem:[#allocation35_spill] sm:$0xff] }
 0x28e   :  { %8798 = vmatprep.subr.mxu1 %v10683_v33 }
 0x28f   :  { %8799 = vmatpush3.msra.mxu1 %v10685_v31  ;;  %1804 = vmatprep.mubr.f32.mxu0 %v1803_v14  ;;  %v12876_v14 = vld [vmem:[#allocation17_spill] sm:$0xff] }
 0x290   :  { %8800 = vmatprep.subr.mxu1 %v10759_v6  ;;  %1810 = vmatmul.mubr.f32.vlgmr.msra.gmra.mxu0 %v1809_v62  ;;  %v12877_v62 = vld [vmem:[#allocation36_spill] sm:$0xff] }
 0x291   :  { %8758 = vmatpush3.msra.mxu0 %v10679_v11  ;;  %8801 = vmatpush3.msra.mxu1 %v10761_v47 }
 0x292   :  { %8759 = vmatprep.subr.mxu0 %v10690_v58  ;;  %2177 = vmatprep.mubr.f32.mxu0 %v1800_v63  ;;  %v12872_v63 = vld [vmem:[#allocation27_spill] sm:$0xff] }
 0x293   :  { %8802 = vmatprep.subr.mxu1 %v10766_v24  ;;  %8760 = vmatpush3.msra.mxu0 %v10693_v19 }
 0x294   :  { %8803 = vmatpush3.msra.mxu1 %v10768_v35  ;;  %8761 = vmatprep.subr.mxu0 %v10696_v56 }
 0x295   :  { %8804 = vmatprep.subr.mxu1 %v10770_v46  ;;  %8762 = vmatpush3.msra.mxu0 %v10701_v26 }
 0x296   :  { %8805 = vmatpush3.msra.mxu1 %v10779_v52  ;;  %8763 = vmatprep.subr.mxu0 %v10704_v13 }
 0x297   :  { %8806 = vmatprep.subr.mxu1 %v10803_v0  ;;  %8764 = vmatpush3.msra.mxu0 %v10707_v51 }
 0x298   :  { %8807 = vmatpush3.msra.mxu1 %v10805_v9  ;;  %8765 = vmatprep.subr.mxu0 %v10764_v20 }
 0x299   :  { %8808 = vmatprep.subr.mxu1 %v10857_v29  ;;  %8766 = vmatpush3.msra.mxu0 %v10777_v32 }
 0x29a   :  { %8809 = vmatpush3.msra.mxu1 %v10868_v38  ;;  %8767 = vmatprep.subr.mxu0 %v10787_v3 }
 0x29b   :  { %8810 = vmatprep.subr.mxu1 %v10873_v1  ;;  %8768 = vmatpush3.msra.mxu0 %v10790_v50 }
 0x29c   :  { %8811 = vmatpush3.msra.mxu1 %v10875_v2  ;;  %8769 = vmatprep.subr.mxu0 %v10793_v25 }
 0x29d   :  { %8812 = vmatprep.subr.mxu1 %v10877_v39  ;;  %8770 = vmatpush3.msra.mxu0 %v10801_v44 }
 0x29e   :  { %8813 = vmatpush3.msra.mxu1 %v10889_v12  ;;  %8771 = vmatprep.subr.mxu0 %v10820_v48 }
 0x29f   :  { %8814 = vmatprep.subr.mxu1 %v10907_v36  ;;  %8772 = vmatpush3.msra.mxu0 %v10823_v53 }
 0x2a0   :  { %8815 = vmatpush3.msra.mxu1 %v12857_v5  ;;  %8773 = vmatprep.subr.mxu0 %v12858_v59 }
 0x2a1   :  { %8816 = vmatprep.subr.mxu1 %v10961_v8  ;;  %8774 = vmatpush3.msra.mxu0 %v12859_v4 }
 0x2a2   :  { %8817 = vmatpush3.msra.mxu1 %v10972_v10  ;;  %8775 = vmatprep.subr.mxu0 %v12860_v23 }
 0x2a3   :  { %8818 = vmatprep.subr.mxu1 %v12861_v22  ;;  %8776 = vmatpush3.msra.mxu0 %v12862_v15 }
 0x2a4   :  { %8819 = vmatpush3.msra.mxu1 %v12863_v42  ;;  %8777 = vmatprep.subr.mxu0 %v12864_v34 }
 0x2a5   :  { %8820 = vmatprep.subr.mxu1 %v12865_v18  ;;  %8778 = vmatpush3.msra.mxu0 %v12866_v30 }
 0x2a6   :  { %8821 = vmatpush3.msra.mxu1 %v12867_v37  ;;  %8779 = vmatprep.subr.mxu0 %v12868_v7 }
 0x2a7   :  { %8822 = vmatprep.subr.mxu1 %v12869_v45  ;;  %8780 = vmatpush3.msra.mxu0 %v12870_v21 }
 0x2a8   :  { %8823 = vmatpush3.msra.mxu1 %v12871_v17  ;;  %8781 = vmatprep.subr.mxu0 %v12872_v63 }
 0x2a9   :  { %2288 = vmatmul.mubr.f32.vlgmr.msra.gmra.mxu1 %v1807_v60  ;;  %8862 = vmatprep.subr.mxu1 %v12873_v49  ;;  %v12878_v60 = vld [vmem:[#allocation37_spill] sm:$0xff]  ;;  %v12879_v49 = vld [vmem:[#allocation40_spill] sm:$0xff] }
 0x2aa   :  { %8782 = vmatpush3.msra.mxu0 %v12874_v27  ;;  %8863 = vmatpush3.msra.mxu1 %v10648_v41  ;;  %v12880_v41 = vld [vmem:[#allocation41_spill] sm:$0xff] }
 0x2ab   :  { %2558 = vmatprep.mubr.f32.mxu1 %v11066_v55  ;;  %8783 = vmatprep.subr.mxu0 %v12875_v54 }
 0x2ac   :  { %8864 = vmatprep.subr.mxu1 %v10662_v40  ;;  %8784 = vmatpush3.msra.mxu0 %v12876_v14  ;;  %v12881_v40 = vld [vmem:[#allocation25_spill] sm:$0xff] }
 0x2ad   :  { %8865 = vmatpush3.msra.mxu1 %v10664_v28  ;;  %8785 = vmatprep.subr.mxu0 %v12877_v62  ;;  %v12882_v28 = vand.u32 4294901760, %v12881_v40  ;;  %v2584_v40 = vld [vmem:[%s12545_s8 + $0x8] sm:$0xff] }
 0x2ae   :  { %8866 = vmatprep.subr.mxu1 %v10666_v61  ;;  %8786 = vmatpush3.msra.mxu0 %v12878_v60  ;;  %v12883_v61 = vand.u32 4294901760, %v10679_v11  ;;  %v12887_v11 = vand.u32 4294901760, %v10701_v26  ;;  %v12891_v26 = vand.u32 4294901760, %v10777_v32  ;;  %v12900_v32 = vand.u32 4294901760, %v12860_v23 }
 0x2af   :  { %8867 = vmatpush3.msra.mxu1 %v10681_v57  ;;  %8787 = vmatprep.subr.mxu0 %v12879_v49  ;;  %v12884_v57 = vand.u32 4294901760, %v10690_v58  ;;  %v12888_v58 = vand.u32 4294901760, %v10704_v13  ;;  %v12892_v13 = vand.u32 4294901760, %v10787_v3  ;;  %v12902_v3 = vand.u32 4294901760, %v12864_v34 }
 0x2b0   :  { %8868 = vmatprep.subr.mxu1 %v10683_v33  ;;  %8788 = vmatpush3.msra.mxu0 %v12880_v41  ;;  %v12885_v33 = vand.u32 4294901760, %v10693_v19  ;;  %v12889_v19 = vand.u32 4294901760, %v10707_v51  ;;  %v12893_v51 = vand.u32 4294901760, %v10790_v50  ;;  %v12904_v50 = vand.u32 4294901760, %v12868_v7 }
 0x2b1   :  { %8869 = vmatpush3.msra.mxu1 %v10685_v31  ;;  %2180 = vmatmul.mubr.f32.vlgmr.msra.gmra.mxu0 %v11064_v43  ;;  %v12886_v31 = vand.u32 4294901760, %v10696_v56  ;;  %v12890_v56 = vand.u32 4294901760, %v10764_v20  ;;  %v12896_v20 = vand.u32 4294901760, %v10820_v48  ;;  %v12910_v48 = vand.u32 4294901760, %v12876_v14  ;;  %v2586_v14 = vld [vmem:[%s12545_s8 + $0x18] sm:$0xff] }
 0x2b2   :  { %8827 = vmatprep.subr.mxu0 %v12882_v28  ;;  %8870 = vmatprep.subr.mxu1 %v10759_v6  ;;  %v12894_v6 = vand.u32 4294901760, %v10793_v25  ;;  %v12905_v25 = vand.u32 4294901760, %v12870_v21 }
 0x2b3   :  { %8828 = vmatpush3.msra.mxu0 %v12883_v61  ;;  %2454 = vmatprep.mubr.f32.mxu0 %v11066_v55  ;;  %v2634_v61 = vand.u32 4294901760, %v2584_v40 }
 0x2b4   :  { %8871 = vmatpush3.msra.mxu1 %v10761_v47  ;;  %8829 = vmatprep.subr.mxu0 %v12884_v57  ;;  %v12895_v47 = vand.u32 4294901760, %v10801_v44  ;;  %v12907_v44 = vand.u32 4294901760, %v12874_v27  ;;  %v2583_v57 = vld [vmem:[%s12545_s8] sm:$0xff] }
 0x2b5   :  { %8872 = vmatprep.subr.mxu1 %v10766_v24  ;;  %8830 = vmatpush3.msra.mxu0 %v12885_v33  ;;  %v12897_v24 = vand.u32 4294901760, %v10823_v53  ;;  %v12911_v53 = vand.u32 4294901760, %v12877_v62  ;;  %v2630_v62 = vand.u32 4294901760, %v2586_v14 }
 0x2b6   :  { %8873 = vmatpush3.msra.mxu1 %v10768_v35  ;;  %8831 = vmatprep.subr.mxu0 %v12886_v31  ;;  %v12898_v35 = vand.u32 4294901760, %v12858_v59 }
 0x2b7   :  { %8874 = vmatprep.subr.mxu1 %v10770_v46  ;;  %8832 = vmatpush3.msra.mxu0 %v12887_v11  ;;  %v12899_v46 = vand.u32 4294901760, %v12859_v4  ;;  %v11254_v28 = vsub.f32 %v2586_v14, %v2630_v62  ;;  %v2636_v11 = vand.u32 4294901760, %v2583_v57  ;;  %v3107_v14 = vld [vmem:[#allocation8 + $0x70] sm:$0xff] }
 0x2b8   :  { %8875 = vmatpush3.msra.mxu1 %v10779_v52  ;;  %8833 = vmatprep.subr.mxu0 %v12888_v58  ;;  %v12901_v52 = vand.u32 4294901760, %v12862_v15 }
 0x2b9   :  { %8876 = vmatprep.subr.mxu1 %v10803_v0  ;;  %8834 = vmatpush3.msra.mxu0 %v12889_v19  ;;  %v12908_v0 = vand.u32 4294901760, %v12875_v54  ;;  %v2712_v58 = vand.u32 4294901760, %v11254_v28  ;;  %v2723_v19 = vsub.f32 %v2584_v40, %v2634_v61 }
 0x2ba   :  { %8877 = vmatpush3.msra.mxu1 %v10805_v9  ;;  %8835 = vmatprep.subr.mxu0 %v12890_v56  ;;  %v12909_v9 = vmov 0.0  }
 0x2bb   :  { %8878 = vmatprep.subr.mxu1 %v10857_v29  ;;  %8836 = vmatpush3.msra.mxu0 %v12891_v26  ;;  %v12912_v29 = vand.u32 4294901760, %v12878_v60  ;;  %v2585_v60 = vld [vmem:[%s12545_s8 + $0x10] sm:$0xff]  ;;  %v2729_v26 = vsub.f32 %v2583_v57, %v2636_v11  ;;  %s9533_s8 = smov 112  }
 0x2bc   :  { %8879 = vmatpush3.msra.mxu1 %v10868_v38  ;;  %8837 = vmatprep.subr.mxu0 %v12892_v13  ;;  %v12913_v38 = vand.u32 4294901760, %v12879_v49  ;;  %v2713_v13 = vsub.f32 %v11254_v28, %v2712_v58 }
 0x2bd   :  { %8880 = vmatprep.subr.mxu1 %v10873_v1  ;;  %8838 = vmatpush3.msra.mxu0 %v12893_v51  ;;  %v12914_v1 = vand.u32 4294901760, %v12880_v41  ;;  %v2632_v41 = vand.u32 4294901760, %v2585_v60  ;;  %v2724_v51 = vand.u32 4294901760, %v2723_v19 }
 0x2be   :  { %8881 = vmatpush3.msra.mxu1 %v10875_v2  ;;  %8839 = vmatprep.subr.mxu0 %v12894_v6 }
 0x2bf   :  { %8882 = vmatprep.subr.mxu1 %v10877_v39  ;;  %8840 = vmatpush3.msra.mxu0 %v12895_v47  ;;  %v2717_v31 = vsub.f32 %v2585_v60, %v2632_v41  ;;  %v2730_v47 = vand.u32 4294901760, %v2729_v26  ;;  %v11276_v60 = vand.u32 4294901760, %v3107_v14 }
 0x2c0   :  { %8883 = vmatpush3.msra.mxu1 %v10889_v12  ;;  %8841 = vmatprep.subr.mxu0 %v12896_v20  ;;  %v12906_v12 = vand.u32 4294901760, %v12872_v63  ;;  %v2714_v20 = vand.u32 4294901760, %v2713_v13 }
 0x2c1   :  { %8884 = vmatprep.subr.mxu1 %v10907_v36  ;;  %8842 = vmatpush3.msra.mxu0 %v12897_v24  ;;  %v2718_v56 = vand.u32 4294901760, %v2717_v31  ;;  %v2725_v24 = vsub.f32 %v2723_v19, %v2724_v51  ;;  %v11287_v57 = vsub.f32 %v3107_v14, %v11276_v60  ;;  %v3094_v14 = vld [vmem:[#allocation8 + $0x8] sm:$0xff] }
 0x2c2   :  { %8885 = vmatpush3.msra.mxu1 %v12857_v5  ;;  %8843 = vmatprep.subr.mxu0 %v12898_v35  ;;  %v1702_v5 = vld [vmem:[#allocation3] sm:$0x3] }
 0x2c3   :  { %8886 = vmatprep.subr.mxu1 %v10961_v8  ;;  %8844 = vmatpush3.msra.mxu0 %v12899_v46  ;;  %v12903_v8 = vand.u32 4294901760, %v12866_v30  ;;  %v2719_v6 = vsub.f32 %v2717_v31, %v2718_v56  ;;  %v2731_v46 = vsub.f32 %v2729_v26, %v2730_v47 }
 0x2c4   :  { %8887 = vmatpush3.msra.mxu1 %v10972_v10  ;;  %8845 = vmatprep.subr.mxu0 %v12900_v32  ;;  %v2726_v32 = vand.u32 4294901760, %v2725_v24  ;;  %v3101_v24 = vld [vmem:[#allocation8 + $0x40] sm:$0xff] }
 0x2c5   :  { %8888 = vmatprep.subr.mxu1 %v12861_v22  ;;  %8846 = vmatpush3.msra.mxu0 %v12901_v52  ;;  %v2720_v35 = vand.u32 4294901760, %v2719_v6  ;;  %v2732_v52 = vand.u32 4294901760, %v2731_v46 }
 0x2c6   :  { %8889 = vmatpush3.msra.mxu1 %v12863_v42  ;;  %8847 = vmatprep.subr.mxu0 %v12902_v3 }
 0x2c7   :  { %8890 = vmatprep.subr.mxu1 %v12865_v18  ;;  %8848 = vmatpush3.msra.mxu0 %v12903_v8  ;;  %v2565_v8 = vld [vmem:[#allocation6] sm:$0x3] }
 0x2c8   :  { %8891 = vmatpush3.msra.mxu1 %v12867_v37  ;;  %8849 = vmatprep.subr.mxu0 %v12904_v50 }
 0x2c9   :  { %8892 = vmatprep.subr.mxu1 %v12869_v45  ;;  %8850 = vmatpush3.msra.mxu0 %v12905_v25 }
 0x2ca   :  { %8893 = vmatpush3.msra.mxu1 %v12871_v17  ;;  %8851 = vmatprep.subr.mxu0 %v12906_v12 }
 0x2cb   :  { %2560 = vmatmul.mubr.f32.vlgmr.msra.gmra.mxu1 %v11061_v16  ;;  %8852 = vmatpush3.msra.mxu0 %v12907_v44 }
 0x2cc   :  { %8853 = vmatprep.subr.mxu0 %v12908_v0  ;;  %2766 = vmatprep.mubr.f32.mxu1 %v12909_v9 }
 0x2cd   :  { %8854 = vmatpush3.msra.mxu0 %v12910_v48  ;;  %2715 = vmatprep.subr.mxu1 %v2714_v20 }
 0x2ce   :  { %8855 = vmatprep.subr.mxu0 %v12911_v53  ;;  %2721 = vmatpush1.msra.mxu1 %v2720_v35 }
 0x2cf   :  { %8856 = vmatpush3.msra.mxu0 %v12912_v29  ;;  %2727 = vmatprep.subr.mxu1 %v2726_v32 }
 0x2d0   :  { %8857 = vmatprep.subr.mxu0 %v12913_v38  ;;  %2733 = vmatpush1.msra.mxu1 %v2732_v52 }
 0x2d1   :  { %8858 = vmatpush3.msra.mxu0 %v12914_v1  ;;  %2884 = vmatprep.subr.mxu1 %v2630_v62 }
 0x2d2   :  { %2456 = vmatmul.mubr.f32.vlgmr.msra.gmra.mxu0 %v11061_v16  ;;  %2631 = vmatprep.subr.mxu0 %v2630_v62 }
 0x2d3   :  { %2670 = vmatprep.mubr.f32.mxu0 %v12909_v9  ;;  %2633 = vmatpush1.msra.mxu0 %v2632_v41 }
 0x2d4   :  { %2635 = vmatprep.subr.mxu0 %v2634_v61 }
 0x2d5   :  { %2637 = vmatpush1.msra.mxu0 %v2636_v11 }
 0x2d6   :  { %2804 = vmatprep.subr.mxu0 %v11254_v28 }
 0x348   :  { %v8754_v39 = vpop.f32.mrf.mxu1 }
 0x34a   :  { %v8755_v55 = vpop.f32.mrf.mxu1 }
 0x34b   :  { %v8756_v22 = vadd.f32 %v8755_v55, %v8754_v39  ;;  %v8568_v39 = vld.sshfl [vmem:[#allocation9] sm:$0x33 pattern:$0x76325410] }
 0x350   :  { %v8719_v2 = vpop.f32.mrf.mxu0 }
 0x352   :  { %v8720_v36 = vpop.f32.mrf.mxu0 }
 0x353   :  { %v8721_v43 = vadd.f32 %v8720_v36, %v8719_v2  ;;  %v2596_v36 = vcombine.high %v8568_v39, %v8568_v39 }
 0x355   :  { %v1812_v23 = vadd.f32 %v8721_v43, %v1702_v5 }
 0x357   :  { %v2044_v34 = vadd.f32 %v8756_v22, %v1812_v23 }
 0x369   :  { %v8824_v59 = vpop.f32.mrf.mxu1 }
 0x36b   :  { %v8825_v42 = vpop.f32.mrf.mxu1 }
 0x36c   :  { %v8826_v16 = vadd.f32 %v8825_v42, %v8824_v59 }
 0x371   :  { %v8789_v10 = vpop.f32.mrf.mxu0 }
 0x373   :  { %v8790_v4 = vpop.f32.mrf.mxu0 }
 0x374   :  { %v8791_v15 = vadd.f32 %v8790_v4, %v8789_v10 }
 0x376   :  { %v2182_v30 = vadd.f32 %v8791_v15, %v2044_v34 }
 0x378   :  { %v2290_v21 = vadd.f32 %v8826_v16, %v2182_v30 }
 0x38b   :  { %v8894_v18 = vpop.f32.mrf.mxu1 }
 0x38d   :  { %v8895_v7 = vpop.f32.mrf.mxu1 }
 0x38e   :  { %v8896_v63 = vadd.f32 %v8895_v7, %v8894_v18 }
 0x392   :  { %v8859_v37 = vpop.f32.mrf.mxu0 }
 0x394   :  { %v8860_v45 = vpop.f32.mrf.mxu0 }
 0x395   :  { %v8861_v17 = vadd.f32 %v8860_v45, %v8859_v37 }
 0x397   :  { %v2458_v27 = vadd.f32 %v8861_v17, %v2290_v21  ;;  %v3108_v17 = vld [vmem:[#allocation8 + $0x78] sm:$0xff] }
 0x399   :  { %v2562_v54 = vadd.f32 %v8896_v63, %v2458_v27 }
 0x39b   :  { %v2566_v49 = vmul.f32 0.5, %v2562_v54  ;;  %2576 = vst.msk [vmem:[%s12551_s14] sm:$0x3] %vm2575_vm1, %v2562_v54 }
 0x39d   :  { %v2567_v33 = vmul.f32 1.442695, %v2566_v49  ;;  %v3106_v49 = vld [vmem:[#allocation8 + $0x68] sm:$0xff] }
 0x39e   :  { %v11283_v28 = vand.u32 4294901760, %v3106_v49 }
 0x39f   :  { %9296 = vpow2.f32 %v2567_v33 }
 0x3ac   :  { %v9297_v3 = vpop.eup %9296 }
 0x3ad   :  { %2570 = vrot.lane.b32.xlu0 %v9297_v3, %s9533_s8  ;;  %v3100_v3 = vld [vmem:[#allocation8 + $0x38] sm:$0xff] }
 0x41f   :  { %v2571_v50 = vpop.permute.xlu0 %2570 }
 0x420   :  { %v2573_v25 = vmul.f32 %v2571_v50, %v2565_v8 }
 0x422   :  { %v11262_v12 = vadd.f32 %v2573_v25, %v2562_v54  ;;  %v11274_v54 = vand.u32 4294901760, %v3108_v17 }
 0x424   :  { %12915 = vst [vmem:[#allocation23_spill] sm:$0xff] %v11262_v12  ;;  %v2600_v44 = vsel %vm2599_vm2, %v11262_v12, 0  ;;  %v11281_v40 = vsub.f32 %v3108_v17, %v11274_v54 }
 0x425   :  { %v2671_v0 = vand.u32 4294901760, %v2600_v44 }
 0x426   :  { %12916 = vst [vmem:[#allocation19_spill] sm:$0xff] %v11281_v40 }
 0x427   :  { %v2672_v48 = vsub.f32 %v2600_v44, %v2671_v0  ;;  %2768 = vmatmul.mubr.f32.vlgmr.msra.gmra.mxu1 %v2671_v0  ;;  %v11334_v44 = vand.u32 4294901760, %v3101_v24 }
 0x428   :  { %2886 = vmatpush1.msra.mxu1 %v2632_v41  ;;  %2923 = vmatprep.mubr.f32.mxu1 %v12909_v9 }
 0x429   :  { %2888 = vmatprep.subr.mxu1 %v2634_v61  ;;  %v2673_v53 = vand.u32 4294901760, %v2672_v48 }
 0x42a   :  { %2890 = vmatpush1.msra.mxu1 %v2636_v11 }
 0x42b   :  { %2927 = vmatmul.mubr.f32.vlgmr.msra.gmra.mxu1 %v2673_v53  ;;  %3046 = vmatprep.subr.mxu1 %v2630_v62  ;;  %v2674_v29 = vsub.f32 %v2672_v48, %v2673_v53 }
 0x42c   :  { %3048 = vmatpush1.msra.mxu1 %v2632_v41  ;;  %3085 = vmatprep.mubr.f32.mxu1 %v12909_v9 }
 0x42d   :  { %3050 = vmatprep.subr.mxu1 %v2634_v61  ;;  %v2675_v38 = vand.u32 4294901760, %v2674_v29  ;;  %v3105_v61 = vld [vmem:[#allocation8 + $0x60] sm:$0xff] }
 0x42e   :  { %3052 = vmatpush1.msra.mxu1 %v2636_v11  ;;  %v11289_v33 = vand.u32 4294901760, %v3105_v61  ;;  %v11294_v11 = vand.u32 4294901760, %v11281_v40 }
 0x42f   :  { %2676 = vmatmul.mubr.f32.vlgmr.msra.gmra.mxu0 %v2675_v38  ;;  %3087 = vmatmul.mubr.f32.vlgmr.msra.gmra.mxu1 %v2671_v0 }
 0x430   :  { %2807 = vmatpush1.msra.mxu0 %v2717_v31  ;;  %2846 = vmatprep.mubr.f32.mxu0 %v12909_v9  ;;  %v3104_v31 = vld [vmem:[#allocation8 + $0x58] sm:$0xff]  ;;  %v3252_v6 = vsub.f32 %v11281_v40, %v11294_v11 }
 0x431   :  { %2810 = vmatprep.subr.mxu0 %v2723_v19  ;;  %3377 = vmatprep.mubr.f32.mxu1 %v12909_v9  ;;  %v3103_v19 = vld [vmem:[#allocation8 + $0x50] sm:$0xff]  ;;  %v11306_v13 = vand.u32 4294901760, %v3104_v31 }
 0x432   :  { %2813 = vmatpush1.msra.mxu0 %v2729_v26  ;;  %v11304_v26 = vsub.f32 %v3105_v61, %v11289_v33  ;;  %v11314_v20 = vand.u32 4294901760, %v3103_v19  ;;  %v11327_v8 = vand.u32 4294901760, %v3252_v6 }
 0x433   :  { %2964 = vmatprep.subr.mxu0 %v2712_v58  ;;  %2849 = vmatmul.mubr.f32.vlgmr.msra.gmra.mxu0 %v2672_v48  ;;  %v11297_v58 = vsub.f32 %v3106_v49, %v11283_v28  ;;  %v11322_v32 = vsub.f32 %v3104_v31, %v11306_v13 }
 0x434   :  { %2968 = vmatpush1.msra.mxu0 %v2718_v56  ;;  %3009 = vmatprep.mubr.f32.mxu0 %v12909_v9  ;;  %v11301_v56 = vand.u32 4294901760, %v11287_v57  ;;  %v11319_v46 = vand.u32 4294901760, %v11304_v26  ;;  %12917 = vst [vmem:[#allocation20_spill] sm:$0xff] %v11327_v8  ;;  %v11332_v25 = vsub.f32 %v3103_v19, %v11314_v20  ;;  %v3093_v19 = vld [vmem:[#allocation8] sm:$0xff] }
 0x435   :  { %2972 = vmatprep.subr.mxu0 %v2724_v51  ;;  %v3102_v51 = vld [vmem:[#allocation8 + $0x48] sm:$0xff]  ;;  %v11342_v29 = vand.u32 4294901760, %v11322_v32  ;;  %3254 = vmatprep.subr.mxu1 %v11327_v8 }
 0x436   :  { %2976 = vmatpush1.msra.mxu0 %v2730_v47  ;;  %v11312_v47 = vand.u32 4294901760, %v11297_v58  ;;  %v3258_v35 = vsub.f32 %v11287_v57, %v11301_v56  ;;  %v11324_v52 = vand.u32 4294901760, %v3102_v51  ;;  %v3270_v53 = vsub.f32 %v11304_v26, %v11319_v46 }
 0x437   :  { %3011 = vmatmul.mubr.f32.vlgmr.msra.gmra.mxu0 %v2671_v0  ;;  %3158 = vmatprep.subr.mxu0 %v11274_v54  ;;  %v3099_v0 = vld [vmem:[#allocation8 + $0x30] sm:$0xff] }
 0x438   :  { %3221 = vmatprep.mubr.f32.mxu0 %v12909_v9  ;;  %3160 = vmatpush1.msra.mxu0 %v11276_v60  ;;  %v3264_v50 = vsub.f32 %v11297_v58, %v11312_v47  ;;  %v11337_v48 = vand.u32 4294901760, %v3258_v35  ;;  %v11345_v38 = vsub.f32 %v3102_v51, %v11324_v52 }
 0x439   :  { %3162 = vmatprep.subr.mxu0 %v11283_v28 }
 0x43a   :  { %3164 = vmatpush1.msra.mxu0 %v11289_v33  ;;  %12918 = vst [vmem:[#allocation28_spill] sm:$0xff] %v11337_v48  ;;  %3260 = vmatpush1.msra.mxu1 %v11337_v48 }
 0x43b   :  { %3166 = vmatprep.subr.mxu0 %v11306_v13 }
 0x43c   :  { %3168 = vmatpush1.msra.mxu0 %v11314_v20 }
 0x43d   :  { %3170 = vmatprep.subr.mxu0 %v11324_v52 }
 0x43e   :  { %3172 = vmatpush1.msra.mxu0 %v11334_v44 }
 0x4e7   :  { %v2769_v1 = vpop.f32.mrf.mxu1 }
 0x4e9   :  { %v2771_v2 = vpop.f32.mrf.mxu1 }
 0x4eb   :  { %v2928_v10 = vpop.f32.mrf.mxu1 }
 0x4ed   :  { %v2930_v23 = vpop.f32.mrf.mxu1 }
 0x4ef   :  { %v2677_v43 = vpop.f32.mrf.mxu0  ;;  %v3088_v37 = vpop.f32.mrf.mxu1 }
 0x4f0   :  { %v2678_v55 = vadd.f32 %v8568_v39, %v2677_v43  ;;  %v11352_v39 = vand.u32 4294901760, %v11332_v25  ;;  %v3097_v43 = vld [vmem:[#allocation8 + $0x20] sm:$0xff] }
 0x4f1   :  { %v2679_v5 = vpop.f32.mrf.mxu0  ;;  %v3090_v62 = vpop.f32.mrf.mxu1 }
 0x4f2   :  { %v2680_v59 = vadd.f32 %v2679_v5, %v2596_v36  ;;  %v2770_v4 = vadd.f32 %v2769_v1, %v2678_v55  ;;  %v3098_v1 = vld [vmem:[#allocation8 + $0x28] sm:$0xff]  ;;  %v11355_v36 = vsub.f32 %v3101_v24, %v11334_v44  ;;  %v11361_v55 = vand.u32 4294901760, %v3270_v53 }
 0x4f3   :  { %v2850_v22 = vpop.f32.mrf.mxu0  ;;  %v3276_v5 = vsub.f32 %v11322_v32, %v11342_v29 }
 0x4f4   :  { %v2851_v15 = vadd.f32 %v2850_v22, %v2770_v4  ;;  %v2772_v42 = vadd.f32 %v2771_v2, %v2680_v59  ;;  %v11349_v2 = vand.u32 4294901760, %v3264_v50  ;;  %12920 = vst [vmem:[#allocation21_spill] sm:$0xff] %v11361_v55  ;;  %v11366_v59 = vand.u32 4294901760, %v11345_v38 }
 0x4f5   :  { %v2852_v34 = vpop.f32.mrf.mxu0  ;;  %v11368_v4 = vand.u32 4294901760, %v3099_v0  ;;  %v11374_v22 = vand.u32 4294901760, %v11355_v36 }
 0x4f6   :  { %v2853_v18 = vadd.f32 %v2852_v34, %v2772_v42  ;;  %v2929_v30 = vadd.f32 %v2928_v10, %v2851_v15  ;;  %12919 = vst [vmem:[#allocation29_spill] sm:$0xff] %v11349_v2  ;;  %v11357_v10 = vand.u32 4294901760, %v3100_v3  ;;  %3266 = vmatprep.subr.mxu1 %v11349_v2  ;;  %v11379_v42 = vand.u32 4294901760, %v3098_v1  ;;  %v3096_v34 = vld [vmem:[#allocation8 + $0x18] sm:$0xff] }
 0x4f7   :  { %v3012_v16 = vpop.f32.mrf.mxu0  ;;  %12921 = vst [vmem:[#allocation31_spill] sm:$0xff] %v11374_v22  ;;  %3272 = vmatpush1.msra.mxu1 %v11361_v55  ;;  %v11413_v31 = vand.u32 4294901760, %v3096_v34 }
 0x4f8   :  { %v3013_v7 = vadd.f32 %v3012_v16, %v2929_v30  ;;  %v2931_v45 = vadd.f32 %v2930_v23, %v2853_v18  ;;  %v3282_v23 = vsub.f32 %v11332_v25, %v11352_v39  ;;  %v11377_v15 = vsub.f32 %v3100_v3, %v11357_v10  ;;  %3174 = vmatprep.subr.mxu0 %v11357_v10 }
 0x4f9   :  { %v3014_v21 = vpop.f32.mrf.mxu0  ;;  %v11383_v18 = vand.u32 4294901760, %v3276_v5  ;;  %v3288_v30 = vsub.f32 %v11345_v38, %v11366_v59  ;;  %v11390_v16 = vand.u32 4294901760, %v3097_v43  ;;  %3176 = vmatpush1.msra.mxu0 %v11368_v4  ;;  %v11433_v53 = vsub.f32 %v3096_v34, %v11413_v31 }
 0x4fa   :  { %v11272_v63 = vadd.f32 %v3088_v37, %v3013_v7  ;;  %v3015_v27 = vadd.f32 %v3014_v21, %v2931_v45  ;;  %v11388_v37 = vsub.f32 %v3099_v0, %v11368_v4  ;;  %v3095_v7 = vld [vmem:[#allocation8 + $0x10] sm:$0xff]  ;;  %v11393_v45 = vand.u32 4294901760, %v3282_v23  ;;  %3178 = vmatprep.subr.mxu0 %v11379_v42 }
 0x4fb   :  { %12922 = vst [vmem:[#allocation30_spill] sm:$0xff] %v11383_v18  ;;  %v3294_v21 = vsub.f32 %v11355_v36, %v11374_v22  ;;  %v11398_v17 = vand.u32 4294901760, %v11377_v15  ;;  %3278 = vmatprep.subr.mxu1 %v11383_v18  ;;  %v11411_v61 = vsub.f32 %v3097_v43, %v11390_v16  ;;  %3180 = vmatpush1.msra.mxu0 %v11390_v16  ;;  %v11424_v35 = vand.u32 4294901760, %v3095_v7 }
 0x4fc   :  { %v11278_v41 = vadd.f32 %v3090_v62, %v3015_v27  ;;  %12923 = vst [vmem:[#allocation32_spill] sm:$0xff] %v11393_v45  ;;  %v11401_v27 = vsub.f32 %v3098_v1, %v11379_v42  ;;  %v11405_v62 = vand.u32 4294901760, %v3288_v30  ;;  %v11408_v49 = vand.u32 4294901760, %v11388_v37  ;;  %3284 = vmatpush1.msra.mxu1 %v11393_v45  ;;  %3182 = vmatprep.subr.mxu0 %v11413_v31 }
 0x4fd   :  { %12924 = vst [vmem:[#allocation22_spill] sm:$0xff] %v11398_v17  ;;  %v11417_v51 = vand.u32 4294901760, %v3294_v21  ;;  %v3300_v6 = vsub.f32 %v11377_v15, %v11398_v17  ;;  %v11430_v0 = vand.u32 4294901760, %v11411_v61  ;;  %v11435_v1 = vand.u32 4294901760, %v3094_v14  ;;  %3184 = vmatpush1.msra.mxu0 %v11424_v35 }
 0x4fe   :  { %9298 = vtanh.f32 %v11278_v41  ;;  %12925 = vst [vmem:[#allocation34_spill] sm:$0xff] %v11405_v62  ;;  %12926 = vst [vmem:[#allocation24_spill] sm:$0xff] %v11408_v49  ;;  %v11422_v24 = vand.u32 4294901760, %v11401_v27  ;;  %3290 = vmatprep.subr.mxu1 %v11405_v62  ;;  %v3306_v50 = vsub.f32 %v11388_v37, %v11408_v49  ;;  %v11445_v23 = vsub.f32 %v3095_v7, %v11424_v35 }
 0x4ff   :  { %12927 = vst [vmem:[#allocation38_spill] sm:$0xff] %v11417_v51  ;;  %12929 = vst [vmem:[#allocation39_spill] sm:$0xff] %v11430_v0  ;;  %3296 = vmatpush1.msra.mxu1 %v11417_v51  ;;  %v11440_v43 = vand.u32 4294901760, %v3300_v6  ;;  %v11447_v30 = vand.u32 4294901760, %v3093_v19  ;;  %v3318_v21 = vsub.f32 %v11411_v61, %v11430_v0  ;;  %v11454_v12 = vand.u32 4294901760, %v11433_v53  ;;  %3186 = vmatprep.subr.mxu0 %v11435_v1 }
 0x500   :  { %12928 = vst [vmem:[#allocation26_spill] sm:$0xff] %v11422_v24  ;;  %v3312_v5 = vsub.f32 %v11401_v27, %v11422_v24  ;;  %v11449_v34 = vand.u32 4294901760, %v3306_v50  ;;  %v11464_v7 = vsub.f32 %v3094_v14, %v11435_v1 }
 0x501   :  { %12930 = vst [vmem:[#allocation27_spill] sm:$0xff] %v11440_v43  ;;  %12932 = vst [vmem:[#allocation33_spill] sm:$0xff] %v11454_v12  ;;  %3302 = vmatprep.subr.mxu1 %v11440_v43  ;;  %v11468_v50 = vand.u32 4294901760, %v3318_v21  ;;  %v3324_v51 = vsub.f32 %v11433_v53, %v11454_v12  ;;  %v11473_v62 = vsub.f32 %v3093_v19, %v11447_v30  ;;  %3188 = vmatpush1.msra.mxu0 %v11447_v30 }
 0x502   :  { %12931 = vst [vmem:[#allocation18_spill] sm:$0xff] %v11449_v34  ;;  %v11458_v6 = vand.u32 4294901760, %v3312_v5  ;;  %3308 = vmatpush1.msra.mxu1 %v11449_v34  ;;  %v11480_v5 = vand.u32 4294901760, %v11464_v7  ;;  %3403 = vmatprep.subr.mxu0 %v11281_v40 }
 0x503   :  { %12935 = vst [vmem:[#allocation36_spill] sm:$0xff] %v11468_v50  ;;  %v11484_v21 = vand.u32 4294901760, %v3324_v51  ;;  %v11487_v34 = vand.u32 4294901760, %v11473_v62  ;;  %v8569_v51 = vmul.f32 -1.442695, %v11272_v63 }
 0x504   :  { %12933 = vst [vmem:[#allocation35_spill] sm:$0xff] %v11458_v6  ;;  %3314 = vmatprep.subr.mxu1 %v11458_v6  ;;  %12936 = vst [vmem:[#allocation37_spill] sm:$0xff] %v11480_v5  ;;  %v3336_v6 = vsub.f32 %v11464_v7, %v11480_v5 }
 0x505   :  { %3320 = vmatpush1.msra.mxu1 %v11468_v50  ;;  %12937 = vst [vmem:[#allocation40_spill] sm:$0xff] %v11484_v21  ;;  %12938 = vst [vmem:[#allocation41_spill] sm:$0xff] %v11487_v34  ;;  %v3342_v43 = vsub.f32 %v11473_v62, %v11487_v34  ;;  %9300 = vpow2.f32 %v8569_v51 }
 0x506   :  { %3326 = vmatprep.subr.mxu1 %v11484_v21  ;;  %v11497_v40 = vand.u32 4294901760, %v3336_v6 }
 0x507   :  { %v11499_v50 = vand.u32 4294901760, %v3342_v43 }
 0x508   :  { %12940 = vst [vmem:[#allocation42_spill] sm:$0xff] %v11497_v40 }
 0x509   :  { %12941 = vst [vmem:[#allocation43_spill] sm:$0xff] %v11499_v50 }
 0x50b   :  { %v9299_v3 = vpop.eup %9298 }
 0x50c   :  { %3123 = vrot.lane.b32.xlu0 %v9299_v3, %s9534_s9  ;;  %v11461_v3 = vand.u32 4294901760, %v11445_v23 }
 0x50e   :  { %12934 = vst [vmem:[#allocation17_spill] sm:$0xff] %v11461_v3  ;;  %v3330_v14 = vsub.f32 %v11445_v23, %v11461_v3 }
 0x510   :  { %v11489_v19 = vand.u32 4294901760, %v3330_v14  ;;  %v8570_v14 = vmul.f32 -1.442695, %v11278_v41 }
 0x512   :  { %12939 = vst [vmem:[#allocation25_spill] sm:$0xff] %v11489_v19  ;;  %3332 = vmatpush1.msra.mxu1 %v11489_v19  ;;  %v9301_v21 = vpop.eup %9300  ;;  %9302 = vpow2.f32 %v8570_v14  ;;  %v12942_v14 = vld [vmem:[#allocation30_spill] sm:$0xff] }
 0x513   :  { %3338 = vmatprep.subr.mxu1 %v11497_v40  ;;  %v3115_v45 = vadd.f32 1.0, %v9301_v21 }
 0x514   :  { %3344 = vmatpush1.msra.mxu1 %v11499_v50 }
 0x515   :  { %3507 = vmatprep.subr.mxu1 %v11274_v54  ;;  %9304 = vrcp.f32 %v3115_v45 }
 0x51f   :  { %v9303_v19 = vpop.eup %9302 }
 0x520   :  { %v3116_v6 = vadd.f32 1.0, %v9303_v19 }
 0x522   :  { %v9305_v34 = vpop.eup %9304  ;;  %9306 = vrcp.f32 %v3116_v6  ;;  %v12943_v6 = vld [vmem:[#allocation41_spill] sm:$0xff] }
 0x52f   :  { %v9307_v50 = vpop.eup %9306 }
 0x57e   :  { %v3124_v43 = vpop.permute.xlu0 %3123 }
 0x57f   :  { %v11506_v18 = vmul.f32 %v9305_v34, %v3124_v43  ;;  %v12944_v43 = vld [vmem:[#allocation32_spill] sm:$0xff] }
 0x581   :  { %9308 = vtanh.f32 %v11506_v18 }
 0x58e   :  { %v9309_v40 = vpop.eup %9308 }
 0x58f   :  { %v3128_v51 = vmul.f32 %v9309_v40, %v9307_v50 }
 0x591   :  { %v3139_v21 = vsel %vm3137_vm3, %v3128_v51, 0  ;;  %3130 = vst.msk [vmem:[#allocation2] sm:$0x1] %vm3129_vm4, %v3128_v51 }
 0x592   :  { %3132 = vst.msk [vmem:[#allocation2 + $0x7] sm:$0x1] %vm3131_vm5, %v3128_v51  ;;  %v11514_v45 = vand.u32 4294901760, %v3139_v21 }
 0x593   :  { %3134 = vst.msk [vmem:[#allocation2 + $0x7] sm:$0x2] %vm3133_vm6, %v3128_v51 }
 0x594   :  { %3136 = vst.msk [vmem:[#allocation2 + $0xe] sm:$0x2] %vm3135_vm7, %v3128_v51  ;;  %v3223_v34 = vsub.f32 %v3139_v21, %v11514_v45  ;;  %3379 = vmatmul.mubr.f32.vlgmr.msra.gmra.mxu1 %v11514_v45  ;;  %v12945_v51 = vld [vmem:[#allocation34_spill] sm:$0xff] }
 0x595   :  { %3509 = vmatpush1.msra.mxu1 %v11276_v60  ;;  %3570 = vmatprep.mubr.f32.mxu1 %v12909_v9  ;;  %v12946_v21 = vld [vmem:[#allocation38_spill] sm:$0xff] }
 0x596   :  { %3511 = vmatprep.subr.mxu1 %v11283_v28  ;;  %v3224_v40 = vand.u32 4294901760, %v3223_v34 }
 0x597   :  { %3513 = vmatpush1.msra.mxu1 %v11289_v33 }
 0x598   :  { %3515 = vmatprep.subr.mxu1 %v11306_v13  ;;  %v3225_v50 = vsub.f32 %v3223_v34, %v3224_v40 }
 0x599   :  { %3517 = vmatpush1.msra.mxu1 %v11314_v20 }
 0x59a   :  { %3519 = vmatprep.subr.mxu1 %v11324_v52  ;;  %v3226_v19 = vand.u32 4294901760, %v3225_v50  ;;  %v12949_v50 = vld [vmem:[#allocation35_spill] sm:$0xff] }
 0x59b   :  { %3521 = vmatpush1.msra.mxu1 %v11334_v44 }
 0x59c   :  { %3523 = vmatprep.subr.mxu1 %v11357_v10  ;;  %3227 = vmatmul.mubr.f32.vlgmr.msra.gmra.mxu0 %v3226_v19  ;;  %v12950_v19 = vld [vmem:[#allocation36_spill] sm:$0xff] }
 0x59d   :  { %3406 = vmatpush1.msra.mxu0 %v11287_v57  ;;  %3525 = vmatpush1.msra.mxu1 %v11368_v4 }
 0x59e   :  { %3409 = vmatprep.subr.mxu0 %v11297_v58  ;;  %3527 = vmatprep.subr.mxu1 %v11379_v42 }
 0x59f   :  { %3412 = vmatpush1.msra.mxu0 %v11304_v26  ;;  %3529 = vmatpush1.msra.mxu1 %v11390_v16 }
 0x5a0   :  { %3415 = vmatprep.subr.mxu0 %v11322_v32  ;;  %3531 = vmatprep.subr.mxu1 %v11413_v31 }
 0x5a1   :  { %3418 = vmatpush1.msra.mxu0 %v11332_v25  ;;  %3533 = vmatpush1.msra.mxu1 %v11424_v35 }
 0x5a2   :  { %3421 = vmatprep.subr.mxu0 %v11345_v38  ;;  %3535 = vmatprep.subr.mxu1 %v11435_v1 }
 0x5a3   :  { %3424 = vmatpush1.msra.mxu0 %v11355_v36  ;;  %3537 = vmatpush1.msra.mxu1 %v11447_v30 }
 0x5a4   :  { %3427 = vmatprep.subr.mxu0 %v11377_v15  ;;  %3574 = vmatmul.mubr.f32.vlgmr.msra.gmra.mxu1 %v3224_v40  ;;  %v12948_v40 = vld [vmem:[#allocation18_spill] sm:$0xff] }
 0x5a5   :  { %3717 = vmatprep.subr.mxu1 %v11274_v54  ;;  %3430 = vmatpush1.msra.mxu0 %v11388_v37 }
 0x5a6   :  { %3719 = vmatpush1.msra.mxu1 %v11276_v60  ;;  %3433 = vmatprep.subr.mxu0 %v11401_v27 }
 0x5a7   :  { %3721 = vmatprep.subr.mxu1 %v11283_v28  ;;  %3436 = vmatpush1.msra.mxu0 %v11411_v61 }
 0x5a8   :  { %3723 = vmatpush1.msra.mxu1 %v11289_v33  ;;  %3439 = vmatprep.subr.mxu0 %v11433_v53 }
 0x5a9   :  { %3725 = vmatprep.subr.mxu1 %v11306_v13  ;;  %3442 = vmatpush1.msra.mxu0 %v11445_v23 }
 0x5aa   :  { %3727 = vmatpush1.msra.mxu1 %v11314_v20  ;;  %3445 = vmatprep.subr.mxu0 %v11464_v7 }
 0x5ab   :  { %3729 = vmatprep.subr.mxu1 %v11324_v52  ;;  %3448 = vmatpush1.msra.mxu0 %v11473_v62 }
 0x5ac   :  { %3481 = vmatprep.mubr.f32.mxu0 %v12909_v9  ;;  %3731 = vmatpush1.msra.mxu1 %v11334_v44 }
 0x5ad   :  { %3484 = vmatmul.mubr.f32.vlgmr.msra.gmra.mxu0 %v3223_v34  ;;  %3599 = vmatprep.subr.mxu0 %v11294_v11  ;;  %v12947_v34 = vld [vmem:[#allocation27_spill] sm:$0xff] }
 0x5ae   :  { %3733 = vmatprep.subr.mxu1 %v11357_v10  ;;  %3603 = vmatpush1.msra.mxu0 %v11301_v56 }
 0x5af   :  { %3735 = vmatpush1.msra.mxu1 %v11368_v4  ;;  %3607 = vmatprep.subr.mxu0 %v11312_v47 }
 0x5b0   :  { %3737 = vmatprep.subr.mxu1 %v11379_v42  ;;  %3611 = vmatpush1.msra.mxu0 %v11319_v46 }
 0x5b1   :  { %3739 = vmatpush1.msra.mxu1 %v11390_v16  ;;  %3615 = vmatprep.subr.mxu0 %v11342_v29 }
 0x5b2   :  { %3741 = vmatprep.subr.mxu1 %v11413_v31  ;;  %3619 = vmatpush1.msra.mxu0 %v11352_v39 }
 0x5b3   :  { %3743 = vmatpush1.msra.mxu1 %v11424_v35  ;;  %3623 = vmatprep.subr.mxu0 %v11366_v59 }
 0x5b4   :  { %3745 = vmatprep.subr.mxu1 %v11435_v1  ;;  %3627 = vmatpush1.msra.mxu0 %v11374_v22 }
 0x5b5   :  { %3747 = vmatpush1.msra.mxu1 %v11447_v30  ;;  %3780 = vmatprep.mubr.f32.mxu1 %v12909_v9 }
 0x5b6   :  { %3631 = vmatprep.subr.mxu0 %v11398_v17  ;;  %3782 = vmatmul.mubr.f32.vlgmr.msra.gmra.mxu1 %v11514_v45 }
 0x5b7   :  { %3635 = vmatpush1.msra.mxu0 %v11408_v49  ;;  %3692 = vmatprep.mubr.f32.mxu0 %v12909_v9 }
 0x5b8   :  { %3639 = vmatprep.subr.mxu0 %v11422_v24  ;;  %3944 = vmatprep.subr.mxu1 %v11327_v8 }
 0x5b9   :  { %3643 = vmatpush1.msra.mxu0 %v11430_v0  ;;  %3950 = vmatpush1.msra.mxu1 %v11337_v48 }
 0x5ba   :  { %3647 = vmatprep.subr.mxu0 %v11454_v12  ;;  %3956 = vmatprep.subr.mxu1 %v11349_v2 }
 0x5bb   :  { %3651 = vmatpush1.msra.mxu0 %v11461_v3  ;;  %3962 = vmatpush1.msra.mxu1 %v11361_v55 }
 0x5bc   :  { %3655 = vmatprep.subr.mxu0 %v11480_v5  ;;  %3968 = vmatprep.subr.mxu1 %v12942_v14 }
 0x5bd   :  { %3659 = vmatpush1.msra.mxu0 %v12943_v6  ;;  %3974 = vmatpush1.msra.mxu1 %v12944_v43 }
 0x5be   :  { %3694 = vmatmul.mubr.f32.vlgmr.msra.gmra.mxu0 %v11514_v45  ;;  %3980 = vmatprep.subr.mxu1 %v12945_v51  ;;  %v12951_v45 = vld [vmem:[#allocation40_spill] sm:$0xff] }
 0x5bf   :  { %3986 = vmatpush1.msra.mxu1 %v12946_v21  ;;  %3848 = vmatprep.subr.mxu0 %v11274_v54  ;;  %v12952_v21 = vld [vmem:[#allocation25_spill] sm:$0xff] }
 0x5c0   :  { %3992 = vmatprep.subr.mxu1 %v12947_v34  ;;  %3850 = vmatpush1.msra.mxu0 %v11276_v60  ;;  %v12953_v34 = vld [vmem:[#allocation42_spill] sm:$0xff] }
 0x5c1   :  { %3998 = vmatpush1.msra.mxu1 %v12948_v40  ;;  %3852 = vmatprep.subr.mxu0 %v11283_v28  ;;  %v12954_v40 = vld [vmem:[#allocation43_spill] sm:$0xff] }
 0x5c2   :  { %4004 = vmatprep.subr.mxu1 %v12949_v50  ;;  %3854 = vmatpush1.msra.mxu0 %v11289_v33 }
 0x5c3   :  { %4010 = vmatpush1.msra.mxu1 %v12950_v19  ;;  %3856 = vmatprep.subr.mxu0 %v11306_v13 }
 0x5c4   :  { %4016 = vmatprep.subr.mxu1 %v12951_v45  ;;  %3858 = vmatpush1.msra.mxu0 %v11314_v20 }
 0x5c5   :  { %4022 = vmatpush1.msra.mxu1 %v12952_v21  ;;  %3860 = vmatprep.subr.mxu0 %v11324_v52 }
 0x5c6   :  { %4028 = vmatprep.subr.mxu1 %v12953_v34  ;;  %3862 = vmatpush1.msra.mxu0 %v11334_v44 }
 0x5c7   :  { %4034 = vmatpush1.msra.mxu1 %v12954_v40  ;;  %3864 = vmatprep.subr.mxu0 %v11357_v10  ;;  %v12955_v40 = vld [vmem:[#allocation19_spill] sm:$0xff] }
 0x5c8   :  { %4067 = vmatprep.mubr.f32.mxu1 %v12909_v9  ;;  %4197 = vmatprep.subr.mxu1 %v11274_v54 }
 0x5c9   :  { %3866 = vmatpush1.msra.mxu0 %v11368_v4  ;;  %3911 = vmatprep.mubr.f32.mxu0 %v12909_v9 }
 0x5ca   :  { %3868 = vmatprep.subr.mxu0 %v11379_v42 }
 0x5cb   :  { %3870 = vmatpush1.msra.mxu0 %v11390_v16 }
 0x5cc   :  { %3872 = vmatprep.subr.mxu0 %v11413_v31 }
 0x5cd   :  { %3874 = vmatpush1.msra.mxu0 %v11424_v35 }
 0x5ce   :  { %3876 = vmatprep.subr.mxu0 %v11435_v1 }
 0x5cf   :  { %3878 = vmatpush1.msra.mxu0 %v11447_v30 }
 0x5d0   :  { %4093 = vmatprep.subr.mxu0 %v12955_v40 }
 0x654   :  { %v3380_v34 = vpop.f32.mrf.mxu1 }
 0x656   :  { %v3382_v50 = vpop.f32.mrf.mxu1 }
 0x65c   :  { %v3228_v21 = vpop.f32.mrf.mxu0 }
 0x65d   :  { %v3381_v45 = vadd.f32 %v3380_v34, %v3228_v21 }
 0x65e   :  { %v3230_v19 = vpop.f32.mrf.mxu0 }
 0x65f   :  { %v3383_v55 = vadd.f32 %v3382_v50, %v3230_v19 }
 0x664   :  { %v3575_v6 = vpop.f32.mrf.mxu1 }
 0x666   :  { %v3577_v2 = vpop.f32.mrf.mxu1 }
 0x66d   :  { %v3485_v51 = vpop.f32.mrf.mxu0 }
 0x66e   :  { %v3486_v43 = vadd.f32 %v3485_v51, %v3381_v45 }
 0x66f   :  { %v3487_v5 = vpop.f32.mrf.mxu0 }
 0x670   :  { %v3576_v14 = vadd.f32 %v3575_v6, %v3486_v43  ;;  %v3488_v3 = vadd.f32 %v3487_v5, %v3383_v55 }
 0x672   :  { %v3578_v8 = vadd.f32 %v3577_v2, %v3488_v3 }
 0x676   :  { %v3783_v12 = vpop.f32.mrf.mxu1 }
 0x678   :  { %v3785_v17 = vpop.f32.mrf.mxu1 }
 0x67e   :  { %v3695_v48 = vpop.f32.mrf.mxu0 }
 0x67f   :  { %v3696_v0 = vadd.f32 %v3695_v48, %v3576_v14 }
 0x680   :  { %v3697_v24 = vpop.f32.mrf.mxu0 }
 0x681   :  { %v3784_v49 = vadd.f32 %v3783_v12, %v3696_v0  ;;  %v3698_v40 = vadd.f32 %v3697_v24, %v3578_v8 }
 0x683   :  { %v3786_v22 = vadd.f32 %v3785_v17, %v3698_v40  ;;  %v3788_v55 = vadd.f32 %v3784_v49, %v11272_v63 }
 0x685   :  { %v3789_v21 = vadd.f32 %v3786_v22, %v11278_v41  ;;  %v8571_v5 = vmul.f32 -1.442695, %v3788_v55 }
 0x687   :  { %9310 = vtanh.f32 %v3789_v21  ;;  %v8572_v49 = vmul.f32 -1.442695, %v3789_v21 }
 0x688   :  { %9312 = vpow2.f32 %v8571_v5  ;;  %v12956_v5 = vld [vmem:[#allocation31_spill] sm:$0xff] }
 0x694   :  { %v9311_v34 = vpop.eup %9310 }
 0x695   :  { %3809 = vrot.lane.b32.xlu1 %v9311_v34, %s9534_s9  ;;  %v9313_v48 = vpop.eup %9312 }
 0x696   :  { %v3796_v2 = vadd.f32 1.0, %v9313_v48  ;;  %v12957_v48 = vld [vmem:[#allocation22_spill] sm:$0xff] }
 0x698   :  { %9314 = vrcp.f32 %v3796_v2  ;;  %v12958_v2 = vld [vmem:[#allocation24_spill] sm:$0xff] }
 0x699   :  { %3804 = vrot.lane.b32.xlu1 %v11506_v18, %s9534_s9 }
 0x6a5   :  { %v9315_v12 = vpop.eup %9314 }
 0x707   :  { %v3810_v8 = vpop.permute.xlu1 %3809 }
 0x708   :  { %v3812_v24 = vmul.f32 %v9315_v12, %v3810_v8  ;;  %v12960_v8 = vld [vmem:[#allocation20_spill] sm:$0xff] }
 0x70a   :  { %3814 = vrot.lane.b32.xlu0 %v3812_v24, %s9534_s9  ;;  %v12961_v24 = vld [vmem:[#allocation39_spill] sm:$0xff] }
 0x70b   :  { %v3805_v22 = vpop.permute.xlu1 %3804 }
 0x70c   :  { %v3807_v17 = vmul.f32 %v9315_v12, %v3805_v22  ;;  %v12959_v12 = vld [vmem:[#allocation26_spill] sm:$0xff]  ;;  %v12962_v22 = vld [vmem:[#allocation28_spill] sm:$0xff] }
 0x77c   :  { %v3815_v0 = vpop.permute.xlu0 %3814 }
 0x77d   :  { %v11628_v3 = vadd.f32 %v3815_v0, %v3807_v17  ;;  %v12963_v17 = vld [vmem:[#allocation33_spill] sm:$0xff] }
 0x77e   :  { %v12964_v0 = vld [vmem:[#allocation29_spill] sm:$0xff] }
 0x77f   :  { %9316 = vtanh.f32 %v11628_v3 }
 0x780   :  { %9318 = vpow2.f32 %v8572_v49  ;;  %v12966_v49 = vld [vmem:[#allocation21_spill] sm:$0xff] }
 0x78c   :  { %v9317_v18 = vpop.eup %9316 }
 0x78d   :  { %3820 = vrot.lane.b32.xlu1 %v9317_v18, %s9534_s9  ;;  %v9319_v14 = vpop.eup %9318  ;;  %v12965_v18 = vld [vmem:[#allocation17_spill] sm:$0xff] }
 0x78e   :  { %v3797_v6 = vadd.f32 1.0, %v9319_v14  ;;  %v12967_v14 = vld [vmem:[#allocation37_spill] sm:$0xff] }
 0x790   :  { %9320 = vrcp.f32 %v3797_v6  ;;  %v12968_v6 = vld [vmem:[#allocation30_spill] sm:$0xff] }
 0x79d   :  { %v9321_v43 = vpop.eup %9320 }
 0x7ff   :  { %v3821_v51 = vpop.permute.xlu1 %3820 }
 0x800   :  { %v3823_v40 = vmul.f32 %v9321_v43, %v3821_v51  ;;  %v12969_v43 = vld [vmem:[#allocation41_spill] sm:$0xff]  ;;  %v12970_v51 = vld [vmem:[#allocation32_spill] sm:$0xff] }
 0x802   :  { %3824 = vst.msk [vmem:[#allocation2 + $0x1] sm:$0x1] %vm3129_vm4, %v3823_v40  ;;  %v3829_v50 = vsel %vm3137_vm3, %v3823_v40, 0 }
 0x803   :  { %3825 = vst.msk [vmem:[#allocation2 + $0x6] sm:$0x1] %vm3131_vm5, %v3823_v40  ;;  %v11637_v19 = vand.u32 4294901760, %v3829_v50 }
 0x804   :  { %3826 = vst.msk [vmem:[#allocation2 + $0x8] sm:$0x2] %vm3133_vm6, %v3823_v40 }
 0x805   :  { %3827 = vst.msk [vmem:[#allocation2 + $0xd] sm:$0x2] %vm3135_vm7, %v3823_v40  ;;  %v3913_v45 = vsub.f32 %v3829_v50, %v11637_v19  ;;  %4069 = vmatmul.mubr.f32.vlgmr.msra.gmra.mxu1 %v11637_v19  ;;  %v12971_v40 = vld [vmem:[#allocation34_spill] sm:$0xff] }
 0x806   :  { %4199 = vmatpush1.msra.mxu1 %v11276_v60  ;;  %4260 = vmatprep.mubr.f32.mxu1 %v12909_v9  ;;  %v12972_v50 = vld [vmem:[#allocation38_spill] sm:$0xff] }
 0x807   :  { %4201 = vmatprep.subr.mxu1 %v11283_v28  ;;  %v3914_v21 = vand.u32 4294901760, %v3913_v45 }
 0x808   :  { %4203 = vmatpush1.msra.mxu1 %v11289_v33 }
 0x809   :  { %4205 = vmatprep.subr.mxu1 %v11306_v13  ;;  %v3915_v34 = vsub.f32 %v3913_v45, %v3914_v21 }
 0x80a   :  { %4207 = vmatpush1.msra.mxu1 %v11314_v20 }
 0x80b   :  { %4209 = vmatprep.subr.mxu1 %v11324_v52  ;;  %v3916_v55 = vand.u32 4294901760, %v3915_v34  ;;  %v12975_v34 = vld [vmem:[#allocation35_spill] sm:$0xff] }
 0x80c   :  { %4211 = vmatpush1.msra.mxu1 %v11334_v44 }
 0x80d   :  { %4213 = vmatprep.subr.mxu1 %v11357_v10  ;;  %3917 = vmatmul.mubr.f32.vlgmr.msra.gmra.mxu0 %v3916_v55  ;;  %v12976_v55 = vld [vmem:[#allocation36_spill] sm:$0xff] }
 0x80e   :  { %4096 = vmatpush1.msra.mxu0 %v11287_v57  ;;  %4215 = vmatpush1.msra.mxu1 %v11368_v4 }
 0x80f   :  { %4099 = vmatprep.subr.mxu0 %v11297_v58  ;;  %4217 = vmatprep.subr.mxu1 %v11379_v42 }
 0x810   :  { %4102 = vmatpush1.msra.mxu0 %v11304_v26  ;;  %4219 = vmatpush1.msra.mxu1 %v11390_v16 }
 0x811   :  { %4105 = vmatprep.subr.mxu0 %v11322_v32  ;;  %4221 = vmatprep.subr.mxu1 %v11413_v31 }
 0x812   :  { %4108 = vmatpush1.msra.mxu0 %v11332_v25  ;;  %4223 = vmatpush1.msra.mxu1 %v11424_v35 }
 0x813   :  { %4111 = vmatprep.subr.mxu0 %v11345_v38  ;;  %4225 = vmatprep.subr.mxu1 %v11435_v1 }
 0x814   :  { %4114 = vmatpush1.msra.mxu0 %v11355_v36  ;;  %4227 = vmatpush1.msra.mxu1 %v11447_v30 }
 0x815   :  { %4117 = vmatprep.subr.mxu0 %v11377_v15  ;;  %4264 = vmatmul.mubr.f32.vlgmr.msra.gmra.mxu1 %v3914_v21  ;;  %v12974_v21 = vld [vmem:[#allocation18_spill] sm:$0xff] }
 0x816   :  { %4407 = vmatprep.subr.mxu1 %v11274_v54  ;;  %4120 = vmatpush1.msra.mxu0 %v11388_v37 }
 0x817   :  { %4409 = vmatpush1.msra.mxu1 %v11276_v60  ;;  %4123 = vmatprep.subr.mxu0 %v11401_v27 }
 0x818   :  { %4411 = vmatprep.subr.mxu1 %v11283_v28  ;;  %4126 = vmatpush1.msra.mxu0 %v11411_v61 }
 0x819   :  { %4413 = vmatpush1.msra.mxu1 %v11289_v33  ;;  %4129 = vmatprep.subr.mxu0 %v11433_v53 }
 0x81a   :  { %4415 = vmatprep.subr.mxu1 %v11306_v13  ;;  %4132 = vmatpush1.msra.mxu0 %v11445_v23 }
 0x81b   :  { %4417 = vmatpush1.msra.mxu1 %v11314_v20  ;;  %4135 = vmatprep.subr.mxu0 %v11464_v7 }
 0x81c   :  { %4419 = vmatprep.subr.mxu1 %v11324_v52  ;;  %4138 = vmatpush1.msra.mxu0 %v11473_v62 }
 0x81d   :  { %4171 = vmatprep.mubr.f32.mxu0 %v12909_v9  ;;  %4421 = vmatpush1.msra.mxu1 %v11334_v44 }
 0x81e   :  { %4174 = vmatmul.mubr.f32.vlgmr.msra.gmra.mxu0 %v3913_v45  ;;  %4289 = vmatprep.subr.mxu0 %v11294_v11  ;;  %v12973_v45 = vld [vmem:[#allocation27_spill] sm:$0xff] }
 0x81f   :  { %4423 = vmatprep.subr.mxu1 %v11357_v10  ;;  %4293 = vmatpush1.msra.mxu0 %v11301_v56 }
 0x820   :  { %4425 = vmatpush1.msra.mxu1 %v11368_v4  ;;  %4297 = vmatprep.subr.mxu0 %v11312_v47 }
 0x821   :  { %4427 = vmatprep.subr.mxu1 %v11379_v42  ;;  %4301 = vmatpush1.msra.mxu0 %v11319_v46 }
 0x822   :  { %4429 = vmatpush1.msra.mxu1 %v11390_v16  ;;  %4305 = vmatprep.subr.mxu0 %v11342_v29 }
 0x823   :  { %4431 = vmatprep.subr.mxu1 %v11413_v31  ;;  %4309 = vmatpush1.msra.mxu0 %v11352_v39 }
 0x824   :  { %4433 = vmatpush1.msra.mxu1 %v11424_v35  ;;  %4313 = vmatprep.subr.mxu0 %v11366_v59 }
 0x825   :  { %4435 = vmatprep.subr.mxu1 %v11435_v1  ;;  %4317 = vmatpush1.msra.mxu0 %v12956_v5 }
 0x826   :  { %4437 = vmatpush1.msra.mxu1 %v11447_v30  ;;  %4470 = vmatprep.mubr.f32.mxu1 %v12909_v9 }
 0x827   :  { %4321 = vmatprep.subr.mxu0 %v12957_v48  ;;  %4472 = vmatmul.mubr.f32.vlgmr.msra.gmra.mxu1 %v11637_v19 }
 0x828   :  { %4325 = vmatpush1.msra.mxu0 %v12958_v2  ;;  %4382 = vmatprep.mubr.f32.mxu0 %v12909_v9 }
 0x829   :  { %4329 = vmatprep.subr.mxu0 %v12959_v12  ;;  %4630 = vmatprep.subr.mxu1 %v12960_v8 }
 0x82a   :  { %4333 = vmatpush1.msra.mxu0 %v12961_v24  ;;  %4636 = vmatpush1.msra.mxu1 %v12962_v22 }
 0x82b   :  { %4337 = vmatprep.subr.mxu0 %v12963_v17  ;;  %4642 = vmatprep.subr.mxu1 %v12964_v0 }
 0x82c   :  { %4341 = vmatpush1.msra.mxu0 %v12965_v18  ;;  %4648 = vmatpush1.msra.mxu1 %v12966_v49 }
 0x82d   :  { %4345 = vmatprep.subr.mxu0 %v12967_v14  ;;  %4654 = vmatprep.subr.mxu1 %v12968_v6 }
 0x82e   :  { %4349 = vmatpush1.msra.mxu0 %v12969_v43  ;;  %4660 = vmatpush1.msra.mxu1 %v12970_v51 }
 0x82f   :  { %4384 = vmatmul.mubr.f32.vlgmr.msra.gmra.mxu0 %v11637_v19  ;;  %4666 = vmatprep.subr.mxu1 %v12971_v40  ;;  %v12977_v19 = vld [vmem:[#allocation40_spill] sm:$0xff] }
 0x830   :  { %4672 = vmatpush1.msra.mxu1 %v12972_v50  ;;  %4534 = vmatprep.subr.mxu0 %v11274_v54  ;;  %v12978_v50 = vld [vmem:[#allocation25_spill] sm:$0xff] }
 0x831   :  { %4678 = vmatprep.subr.mxu1 %v12973_v45  ;;  %4536 = vmatpush1.msra.mxu0 %v11276_v60  ;;  %v12979_v45 = vld [vmem:[#allocation42_spill] sm:$0xff] }
 0x832   :  { %4684 = vmatpush1.msra.mxu1 %v12974_v21  ;;  %4538 = vmatprep.subr.mxu0 %v11283_v28  ;;  %v12980_v21 = vld [vmem:[#allocation43_spill] sm:$0xff] }
 0x833   :  { %4690 = vmatprep.subr.mxu1 %v12975_v34  ;;  %4540 = vmatpush1.msra.mxu0 %v11289_v33 }
 0x834   :  { %4696 = vmatpush1.msra.mxu1 %v12976_v55  ;;  %4542 = vmatprep.subr.mxu0 %v11306_v13 }
 0x835   :  { %4702 = vmatprep.subr.mxu1 %v12977_v19  ;;  %4544 = vmatpush1.msra.mxu0 %v11314_v20 }
 0x836   :  { %4708 = vmatpush1.msra.mxu1 %v12978_v50  ;;  %4546 = vmatprep.subr.mxu0 %v11324_v52 }
 0x837   :  { %4714 = vmatprep.subr.mxu1 %v12979_v45  ;;  %4548 = vmatpush1.msra.mxu0 %v11334_v44 }
 0x838   :  { %4720 = vmatpush1.msra.mxu1 %v12980_v21  ;;  %4550 = vmatprep.subr.mxu0 %v11357_v10  ;;  %v12981_v21 = vld [vmem:[#allocation19_spill] sm:$0xff] }
 0x839   :  { %4753 = vmatprep.mubr.f32.mxu1 %v12909_v9  ;;  %4883 = vmatprep.subr.mxu1 %v11274_v54 }
 0x83a   :  { %4552 = vmatpush1.msra.mxu0 %v11368_v4  ;;  %4597 = vmatprep.mubr.f32.mxu0 %v12909_v9 }
 0x83b   :  { %4554 = vmatprep.subr.mxu0 %v11379_v42 }
 0x83c   :  { %4556 = vmatpush1.msra.mxu0 %v11390_v16 }
 0x83d   :  { %4558 = vmatprep.subr.mxu0 %v11413_v31 }
 0x83e   :  { %4560 = vmatpush1.msra.mxu0 %v11424_v35 }
 0x83f   :  { %4562 = vmatprep.subr.mxu0 %v11435_v1 }
 0x840   :  { %4564 = vmatpush1.msra.mxu0 %v11447_v30 }
 0x841   :  { %4779 = vmatprep.subr.mxu0 %v12981_v21 }
 0x8c5   :  { %v4070_v45 = vpop.f32.mrf.mxu1 }
 0x8c7   :  { %v4072_v34 = vpop.f32.mrf.mxu1 }
 0x8cd   :  { %v3918_v50 = vpop.f32.mrf.mxu0 }
 0x8ce   :  { %v4071_v19 = vadd.f32 %v4070_v45, %v3918_v50 }
 0x8cf   :  { %v3920_v55 = vpop.f32.mrf.mxu0 }
 0x8d0   :  { %v4073_v49 = vadd.f32 %v4072_v34, %v3920_v55 }
 0x8d5   :  { %v4265_v43 = vpop.f32.mrf.mxu1 }
 0x8d7   :  { %v4267_v0 = vpop.f32.mrf.mxu1 }
 0x8de   :  { %v4175_v40 = vpop.f32.mrf.mxu0 }
 0x8df   :  { %v4176_v51 = vadd.f32 %v4175_v40, %v4071_v19 }
 0x8e0   :  { %v4177_v14 = vpop.f32.mrf.mxu0 }
 0x8e1   :  { %v4266_v6 = vadd.f32 %v4265_v43, %v4176_v51  ;;  %v4178_v18 = vadd.f32 %v4177_v14, %v4073_v49 }
 0x8e3   :  { %v4268_v8 = vadd.f32 %v4267_v0, %v4178_v18 }
 0x8e7   :  { %v4473_v17 = vpop.f32.mrf.mxu1 }
 0x8e9   :  { %v4475_v48 = vpop.f32.mrf.mxu1 }
 0x8ef   :  { %v4385_v22 = vpop.f32.mrf.mxu0 }
 0x8f0   :  { %v4386_v24 = vadd.f32 %v4385_v22, %v4266_v6 }
 0x8f1   :  { %v4387_v12 = vpop.f32.mrf.mxu0 }
 0x8f2   :  { %v4474_v2 = vadd.f32 %v4473_v17, %v4386_v24  ;;  %v4388_v21 = vadd.f32 %v4387_v12, %v4268_v8 }
 0x8f4   :  { %v4476_v5 = vadd.f32 %v4475_v48, %v4388_v21  ;;  %v4478_v43 = vadd.f32 %v4474_v2, %v11272_v63 }
 0x8f6   :  { %v4479_v50 = vadd.f32 %v4476_v5, %v11278_v41  ;;  %v8573_v51 = vmul.f32 -1.442695, %v4478_v43  ;;  %v12982_v43 = vld [vmem:[#allocation31_spill] sm:$0xff] }
 0x8f8   :  { %9322 = vtanh.f32 %v4479_v50  ;;  %v8574_v2 = vmul.f32 -1.442695, %v4479_v50 }
 0x8f9   :  { %9324 = vpow2.f32 %v8573_v51  ;;  %v12983_v51 = vld [vmem:[#allocation22_spill] sm:$0xff] }
 0x905   :  { %v9323_v45 = vpop.eup %9322 }
 0x906   :  { %4495 = vrot.lane.b32.xlu0 %v9323_v45, %s9534_s9  ;;  %v9325_v49 = vpop.eup %9324 }
 0x907   :  { %v4486_v14 = vadd.f32 1.0, %v9325_v49  ;;  %v12984_v49 = vld [vmem:[#allocation24_spill] sm:$0xff] }
 0x909   :  { %9326 = vrcp.f32 %v4486_v14  ;;  %v12985_v14 = vld [vmem:[#allocation26_spill] sm:$0xff] }
 0x916   :  { %v9327_v22 = vpop.eup %9326 }
 0x917   :  { %v4493_v48 = vmul.f32 %v9327_v22, %v11628_v3 }
 0x978   :  { %v4496_v0 = vpop.permute.xlu0 %4495 }
 0x979   :  { %v4498_v18 = vmul.f32 %v9327_v22, %v4496_v0  ;;  %v12986_v22 = vld [vmem:[#allocation20_spill] sm:$0xff]  ;;  %v12987_v0 = vld [vmem:[#allocation39_spill] sm:$0xff] }
 0x97b   :  { %4500 = vrot.lane.b32.xlu1 %v4498_v18, %s9534_s9  ;;  %v12988_v18 = vld [vmem:[#allocation28_spill] sm:$0xff] }
 0x9ed   :  { %v4501_v12 = vpop.permute.xlu1 %4500 }
 0x9ee   :  { %v11750_v5 = vadd.f32 %v4501_v12, %v4493_v48  ;;  %v12989_v48 = vld [vmem:[#allocation33_spill] sm:$0xff] }
 0x9ef   :  { %v12990_v12 = vld [vmem:[#allocation29_spill] sm:$0xff] }
 0x9f0   :  { %9328 = vtanh.f32 %v11750_v5 }
 0x9f1   :  { %9330 = vpow2.f32 %v8574_v2  ;;  %v12992_v2 = vld [vmem:[#allocation21_spill] sm:$0xff] }
 0x9fd   :  { %v9329_v8 = vpop.eup %9328 }
 0x9fe   :  { %4506 = vrot.lane.b32.xlu0 %v9329_v8, %s9534_s9  ;;  %v9331_v24 = vpop.eup %9330  ;;  %v12991_v8 = vld [vmem:[#allocation17_spill] sm:$0xff] }
 0x9ff   :  { %v4487_v17 = vadd.f32 1.0, %v9331_v24  ;;  %v12993_v24 = vld [vmem:[#allocation37_spill] sm:$0xff] }
 0xa01   :  { %9332 = vrcp.f32 %v4487_v17  ;;  %v12994_v17 = vld [vmem:[#allocation30_spill] sm:$0xff] }
 0xa0e   :  { %v9333_v6 = vpop.eup %9332 }
 0xa70   :  { %v4507_v40 = vpop.permute.xlu0 %4506 }
 0xa71   :  { %v4509_v21 = vmul.f32 %v9333_v6, %v4507_v40  ;;  %v12995_v6 = vld [vmem:[#allocation41_spill] sm:$0xff]  ;;  %v12996_v40 = vld [vmem:[#allocation32_spill] sm:$0xff] }
 0xa73   :  { %4510 = vst.msk [vmem:[#allocation2 + $0x2] sm:$0x1] %vm3129_vm4, %v4509_v21  ;;  %v4515_v3 = vsel %vm3137_vm3, %v4509_v21, 0 }
 0xa74   :  { %4511 = vst.msk [vmem:[#allocation2 + $0x5] sm:$0x1] %vm3131_vm5, %v4509_v21  ;;  %v11759_v34 = vand.u32 4294901760, %v4515_v3 }
 0xa75   :  { %4512 = vst.msk [vmem:[#allocation2 + $0x9] sm:$0x2] %vm3133_vm6, %v4509_v21 }
 0xa76   :  { %4513 = vst.msk [vmem:[#allocation2 + $0xc] sm:$0x2] %vm3135_vm7, %v4509_v21  ;;  %v4599_v55 = vsub.f32 %v4515_v3, %v11759_v34  ;;  %4755 = vmatmul.mubr.f32.vlgmr.msra.gmra.mxu1 %v11759_v34  ;;  %v12997_v21 = vld [vmem:[#allocation34_spill] sm:$0xff] }
 0xa77   :  { %4885 = vmatpush1.msra.mxu1 %v11276_v60  ;;  %4946 = vmatprep.mubr.f32.mxu1 %v12909_v9  ;;  %v12998_v3 = vld [vmem:[#allocation38_spill] sm:$0xff] }
 0xa78   :  { %4887 = vmatprep.subr.mxu1 %v11283_v28  ;;  %v4600_v19 = vand.u32 4294901760, %v4599_v55 }
 0xa79   :  { %4889 = vmatpush1.msra.mxu1 %v11289_v33 }
 0xa7a   :  { %4891 = vmatprep.subr.mxu1 %v11306_v13  ;;  %v4601_v50 = vsub.f32 %v4599_v55, %v4600_v19 }
 0xa7b   :  { %4893 = vmatpush1.msra.mxu1 %v11314_v20 }
 0xa7c   :  { %4895 = vmatprep.subr.mxu1 %v11324_v52  ;;  %v4602_v45 = vand.u32 4294901760, %v4601_v50  ;;  %v13001_v50 = vld [vmem:[#allocation35_spill] sm:$0xff] }
 0xa7d   :  { %4897 = vmatpush1.msra.mxu1 %v11334_v44 }
 0xa7e   :  { %4899 = vmatprep.subr.mxu1 %v11357_v10  ;;  %4603 = vmatmul.mubr.f32.vlgmr.msra.gmra.mxu0 %v4602_v45  ;;  %v13002_v45 = vld [vmem:[#allocation36_spill] sm:$0xff] }
 0xa7f   :  { %4782 = vmatpush1.msra.mxu0 %v11287_v57  ;;  %4901 = vmatpush1.msra.mxu1 %v11368_v4 }
 0xa80   :  { %4785 = vmatprep.subr.mxu0 %v11297_v58  ;;  %4903 = vmatprep.subr.mxu1 %v11379_v42 }
 0xa81   :  { %4788 = vmatpush1.msra.mxu0 %v11304_v26  ;;  %4905 = vmatpush1.msra.mxu1 %v11390_v16 }
 0xa82   :  { %4791 = vmatprep.subr.mxu0 %v11322_v32  ;;  %4907 = vmatprep.subr.mxu1 %v11413_v31 }
 0xa83   :  { %4794 = vmatpush1.msra.mxu0 %v11332_v25  ;;  %4909 = vmatpush1.msra.mxu1 %v11424_v35 }
 0xa84   :  { %4797 = vmatprep.subr.mxu0 %v11345_v38  ;;  %4911 = vmatprep.subr.mxu1 %v11435_v1 }
 0xa85   :  { %4800 = vmatpush1.msra.mxu0 %v11355_v36  ;;  %4913 = vmatpush1.msra.mxu1 %v11447_v30 }
 0xa86   :  { %4803 = vmatprep.subr.mxu0 %v11377_v15  ;;  %4950 = vmatmul.mubr.f32.vlgmr.msra.gmra.mxu1 %v4600_v19  ;;  %v13000_v19 = vld [vmem:[#allocation18_spill] sm:$0xff] }
 0xa87   :  { %5093 = vmatprep.subr.mxu1 %v11274_v54  ;;  %4806 = vmatpush1.msra.mxu0 %v11388_v37 }
 0xa88   :  { %5095 = vmatpush1.msra.mxu1 %v11276_v60  ;;  %4809 = vmatprep.subr.mxu0 %v11401_v27 }
 0xa89   :  { %5097 = vmatprep.subr.mxu1 %v11283_v28  ;;  %4812 = vmatpush1.msra.mxu0 %v11411_v61 }
 0xa8a   :  { %5099 = vmatpush1.msra.mxu1 %v11289_v33  ;;  %4815 = vmatprep.subr.mxu0 %v11433_v53 }
 0xa8b   :  { %5101 = vmatprep.subr.mxu1 %v11306_v13  ;;  %4818 = vmatpush1.msra.mxu0 %v11445_v23 }
 0xa8c   :  { %5103 = vmatpush1.msra.mxu1 %v11314_v20  ;;  %4821 = vmatprep.subr.mxu0 %v11464_v7 }
 0xa8d   :  { %5105 = vmatprep.subr.mxu1 %v11324_v52  ;;  %4824 = vmatpush1.msra.mxu0 %v11473_v62 }
 0xa8e   :  { %4857 = vmatprep.mubr.f32.mxu0 %v12909_v9  ;;  %5107 = vmatpush1.msra.mxu1 %v11334_v44 }
 0xa8f   :  { %4860 = vmatmul.mubr.f32.vlgmr.msra.gmra.mxu0 %v4599_v55  ;;  %4975 = vmatprep.subr.mxu0 %v11294_v11  ;;  %v12999_v55 = vld [vmem:[#allocation27_spill] sm:$0xff] }
 0xa90   :  { %5109 = vmatprep.subr.mxu1 %v11357_v10  ;;  %4979 = vmatpush1.msra.mxu0 %v11301_v56 }
 0xa91   :  { %5111 = vmatpush1.msra.mxu1 %v11368_v4  ;;  %4983 = vmatprep.subr.mxu0 %v11312_v47 }
 0xa92   :  { %5113 = vmatprep.subr.mxu1 %v11379_v42  ;;  %4987 = vmatpush1.msra.mxu0 %v11319_v46 }
 0xa93   :  { %5115 = vmatpush1.msra.mxu1 %v11390_v16  ;;  %4991 = vmatprep.subr.mxu0 %v11342_v29 }
 0xa94   :  { %5117 = vmatprep.subr.mxu1 %v11413_v31  ;;  %4995 = vmatpush1.msra.mxu0 %v11352_v39 }
 0xa95   :  { %5119 = vmatpush1.msra.mxu1 %v11424_v35  ;;  %4999 = vmatprep.subr.mxu0 %v11366_v59 }
 0xa96   :  { %5121 = vmatprep.subr.mxu1 %v11435_v1  ;;  %5003 = vmatpush1.msra.mxu0 %v12982_v43 }
 0xa97   :  { %5123 = vmatpush1.msra.mxu1 %v11447_v30  ;;  %5156 = vmatprep.mubr.f32.mxu1 %v12909_v9 }
 0xa98   :  { %5007 = vmatprep.subr.mxu0 %v12983_v51  ;;  %5158 = vmatmul.mubr.f32.vlgmr.msra.gmra.mxu1 %v11759_v34 }
 0xa99   :  { %5011 = vmatpush1.msra.mxu0 %v12984_v49  ;;  %5068 = vmatprep.mubr.f32.mxu0 %v12909_v9 }
 0xa9a   :  { %5015 = vmatprep.subr.mxu0 %v12985_v14  ;;  %5316 = vmatprep.subr.mxu1 %v12986_v22 }
 0xa9b   :  { %5019 = vmatpush1.msra.mxu0 %v12987_v0  ;;  %5322 = vmatpush1.msra.mxu1 %v12988_v18 }
 0xa9c   :  { %5023 = vmatprep.subr.mxu0 %v12989_v48  ;;  %5328 = vmatprep.subr.mxu1 %v12990_v12 }
 0xa9d   :  { %5027 = vmatpush1.msra.mxu0 %v12991_v8  ;;  %5334 = vmatpush1.msra.mxu1 %v12992_v2 }
 0xa9e   :  { %5031 = vmatprep.subr.mxu0 %v12993_v24  ;;  %5340 = vmatprep.subr.mxu1 %v12994_v17 }
 0xa9f   :  { %5035 = vmatpush1.msra.mxu0 %v12995_v6  ;;  %5346 = vmatpush1.msra.mxu1 %v12996_v40 }
 0xaa0   :  { %5070 = vmatmul.mubr.f32.vlgmr.msra.gmra.mxu0 %v11759_v34  ;;  %5352 = vmatprep.subr.mxu1 %v12997_v21  ;;  %v13003_v34 = vld [vmem:[#allocation40_spill] sm:$0xff] }
 0xaa1   :  { %5358 = vmatpush1.msra.mxu1 %v12998_v3  ;;  %5220 = vmatprep.subr.mxu0 %v11274_v54  ;;  %v13004_v3 = vld [vmem:[#allocation25_spill] sm:$0xff] }
 0xaa2   :  { %5364 = vmatprep.subr.mxu1 %v12999_v55  ;;  %5222 = vmatpush1.msra.mxu0 %v11276_v60  ;;  %v13005_v55 = vld [vmem:[#allocation42_spill] sm:$0xff] }
 0xaa3   :  { %5370 = vmatpush1.msra.mxu1 %v13000_v19  ;;  %5224 = vmatprep.subr.mxu0 %v11283_v28  ;;  %v13006_v19 = vld [vmem:[#allocation43_spill] sm:$0xff] }
 0xaa4   :  { %5376 = vmatprep.subr.mxu1 %v13001_v50  ;;  %5226 = vmatpush1.msra.mxu0 %v11289_v33 }
 0xaa5   :  { %5382 = vmatpush1.msra.mxu1 %v13002_v45  ;;  %5228 = vmatprep.subr.mxu0 %v11306_v13 }
 0xaa6   :  { %5388 = vmatprep.subr.mxu1 %v13003_v34  ;;  %5230 = vmatpush1.msra.mxu0 %v11314_v20 }
 0xaa7   :  { %5394 = vmatpush1.msra.mxu1 %v13004_v3  ;;  %5232 = vmatprep.subr.mxu0 %v11324_v52 }
 0xaa8   :  { %5400 = vmatprep.subr.mxu1 %v13005_v55  ;;  %5234 = vmatpush1.msra.mxu0 %v11334_v44 }
 0xaa9   :  { %5406 = vmatpush1.msra.mxu1 %v13006_v19  ;;  %5236 = vmatprep.subr.mxu0 %v11357_v10  ;;  %v13007_v19 = vld [vmem:[#allocation19_spill] sm:$0xff] }
 0xaaa   :  { %5439 = vmatprep.mubr.f32.mxu1 %v12909_v9  ;;  %5569 = vmatprep.subr.mxu1 %v11274_v54 }
 0xaab   :  { %5238 = vmatpush1.msra.mxu0 %v11368_v4  ;;  %5283 = vmatprep.mubr.f32.mxu0 %v12909_v9 }
 0xaac   :  { %5240 = vmatprep.subr.mxu0 %v11379_v42 }
 0xaad   :  { %5242 = vmatpush1.msra.mxu0 %v11390_v16 }
 0xaae   :  { %5244 = vmatprep.subr.mxu0 %v11413_v31 }
 0xaaf   :  { %5246 = vmatpush1.msra.mxu0 %v11424_v35 }
 0xab0   :  { %5248 = vmatprep.subr.mxu0 %v11435_v1 }
 0xab1   :  { %5250 = vmatpush1.msra.mxu0 %v11447_v30 }
 0xab2   :  { %5465 = vmatprep.subr.mxu0 %v13007_v19 }
 0xb36   :  { %v4756_v55 = vpop.f32.mrf.mxu1 }
 0xb38   :  { %v4758_v50 = vpop.f32.mrf.mxu1 }
 0xb3e   :  { %v4604_v3 = vpop.f32.mrf.mxu0 }
 0xb3f   :  { %v4757_v34 = vadd.f32 %v4756_v55, %v4604_v3 }
 0xb40   :  { %v4606_v45 = vpop.f32.mrf.mxu0 }
 0xb41   :  { %v4759_v2 = vadd.f32 %v4758_v50, %v4606_v45 }
 0xb46   :  { %v4951_v6 = vpop.f32.mrf.mxu1 }
 0xb48   :  { %v4953_v12 = vpop.f32.mrf.mxu1 }
 0xb4f   :  { %v4861_v21 = vpop.f32.mrf.mxu0 }
 0xb50   :  { %v4862_v40 = vadd.f32 %v4861_v21, %v4757_v34 }
 0xb51   :  { %v4863_v24 = vpop.f32.mrf.mxu0 }
 0xb52   :  { %v4952_v17 = vadd.f32 %v4951_v6, %v4862_v40  ;;  %v4864_v8 = vadd.f32 %v4863_v24, %v4759_v2 }
 0xb54   :  { %v4954_v22 = vadd.f32 %v4953_v12, %v4864_v8 }
 0xb58   :  { %v5159_v48 = vpop.f32.mrf.mxu1 }
 0xb5a   :  { %v5161_v51 = vpop.f32.mrf.mxu1 }
 0xb60   :  { %v5071_v18 = vpop.f32.mrf.mxu0 }
 0xb61   :  { %v5072_v0 = vadd.f32 %v5071_v18, %v4952_v17 }
 0xb62   :  { %v5073_v14 = vpop.f32.mrf.mxu0 }
 0xb63   :  { %v5160_v49 = vadd.f32 %v5159_v48, %v5072_v0  ;;  %v5074_v19 = vadd.f32 %v5073_v14, %v4954_v22 }
 0xb65   :  { %v5162_v43 = vadd.f32 %v5161_v51, %v5074_v19  ;;  %v5164_v6 = vadd.f32 %v5160_v49, %v11272_v63 }
 0xb67   :  { %v5165_v3 = vadd.f32 %v5162_v43, %v11278_v41  ;;  %v8575_v40 = vmul.f32 -1.442695, %v5164_v6  ;;  %v13008_v6 = vld [vmem:[#allocation31_spill] sm:$0xff] }
 0xb69   :  { %9334 = vtanh.f32 %v5165_v3  ;;  %v8576_v49 = vmul.f32 -1.442695, %v5165_v3 }
 0xb6a   :  { %9336 = vpow2.f32 %v8575_v40  ;;  %v13009_v40 = vld [vmem:[#allocation22_spill] sm:$0xff] }
 0xb76   :  { %v9335_v55 = vpop.eup %9334 }
 0xb77   :  { %5181 = vrot.lane.b32.xlu1 %v9335_v55, %s9534_s9  ;;  %v9337_v2 = vpop.eup %9336 }
 0xb78   :  { %v5172_v24 = vadd.f32 1.0, %v9337_v2  ;;  %v13010_v2 = vld [vmem:[#allocation24_spill] sm:$0xff] }
 0xb7a   :  { %9338 = vrcp.f32 %v5172_v24  ;;  %v13011_v24 = vld [vmem:[#allocation26_spill] sm:$0xff] }
 0xb87   :  { %v9339_v18 = vpop.eup %9338 }
 0xb88   :  { %v5179_v51 = vmul.f32 %v9339_v18, %v11750_v5 }
 0xbe9   :  { %v5182_v12 = vpop.permute.xlu1 %5181 }
 0xbea   :  { %v5184_v8 = vmul.f32 %v9339_v18, %v5182_v12  ;;  %v13012_v18 = vld [vmem:[#allocation20_spill] sm:$0xff]  ;;  %v13013_v12 = vld [vmem:[#allocation39_spill] sm:$0xff] }
 0xbec   :  { %5186 = vrot.lane.b32.xlu0 %v5184_v8, %s9534_s9  ;;  %v13014_v8 = vld [vmem:[#allocation28_spill] sm:$0xff] }
 0xc5e   :  { %v5187_v14 = vpop.permute.xlu0 %5186 }
 0xc5f   :  { %v11872_v43 = vadd.f32 %v5187_v14, %v5179_v51  ;;  %v13015_v51 = vld [vmem:[#allocation33_spill] sm:$0xff] }
 0xc60   :  { %v13016_v14 = vld [vmem:[#allocation29_spill] sm:$0xff] }
 0xc61   :  { %9340 = vtanh.f32 %v11872_v43 }
 0xc62   :  { %9342 = vpow2.f32 %v8576_v49  ;;  %v13018_v49 = vld [vmem:[#allocation21_spill] sm:$0xff] }
 0xc6e   :  { %v9341_v22 = vpop.eup %9340 }
 0xc6f   :  { %5192 = vrot.lane.b32.xlu1 %v9341_v22, %s9534_s9  ;;  %v9343_v0 = vpop.eup %9342  ;;  %v13017_v22 = vld [vmem:[#allocation17_spill] sm:$0xff] }
 0xc70   :  { %v5173_v48 = vadd.f32 1.0, %v9343_v0  ;;  %v13019_v0 = vld [vmem:[#allocation37_spill] sm:$0xff] }
 0xc72   :  { %9344 = vrcp.f32 %v5173_v48  ;;  %v13020_v48 = vld [vmem:[#allocation30_spill] sm:$0xff] }
 0xc7f   :  { %v9345_v17 = vpop.eup %9344 }
 0xce1   :  { %v5193_v21 = vpop.permute.xlu1 %5192 }
 0xce2   :  { %v5195_v19 = vmul.f32 %v9345_v17, %v5193_v21  ;;  %v13021_v17 = vld [vmem:[#allocation41_spill] sm:$0xff]  ;;  %v13022_v21 = vld [vmem:[#allocation32_spill] sm:$0xff] }
 0xce4   :  { %5196 = vst.msk [vmem:[#allocation2 + $0x3] sm:$0x1] %vm3129_vm4, %v5195_v19  ;;  %v5201_v5 = vsel %vm3137_vm3, %v5195_v19, 0 }
 0xce5   :  { %5197 = vst.msk [vmem:[#allocation2 + $0x4] sm:$0x1] %vm3131_vm5, %v5195_v19  ;;  %v11881_v50 = vand.u32 4294901760, %v5201_v5 }
 0xce6   :  { %5198 = vst.msk [vmem:[#allocation2 + $0xa] sm:$0x2] %vm3133_vm6, %v5195_v19 }
 0xce7   :  { %5199 = vst.msk [vmem:[#allocation2 + $0xb] sm:$0x2] %vm3135_vm7, %v5195_v19  ;;  %v5285_v45 = vsub.f32 %v5201_v5, %v11881_v50  ;;  %5441 = vmatmul.mubr.f32.vlgmr.msra.gmra.mxu1 %v11881_v50  ;;  %v13023_v19 = vld [vmem:[#allocation34_spill] sm:$0xff] }
 0xce8   :  { %5571 = vmatpush1.msra.mxu1 %v11276_v60  ;;  %5632 = vmatprep.mubr.f32.mxu1 %v12909_v9  ;;  %v13024_v5 = vld [vmem:[#allocation38_spill] sm:$0xff] }
 0xce9   :  { %5573 = vmatprep.subr.mxu1 %v11283_v28  ;;  %v5286_v34 = vand.u32 4294901760, %v5285_v45 }
 0xcea   :  { %5575 = vmatpush1.msra.mxu1 %v11289_v33 }
 0xceb   :  { %5577 = vmatprep.subr.mxu1 %v11306_v13  ;;  %v5287_v3 = vsub.f32 %v5285_v45, %v5286_v34 }
 0xcec   :  { %5579 = vmatpush1.msra.mxu1 %v11314_v20 }
 0xced   :  { %5581 = vmatprep.subr.mxu1 %v11324_v52  ;;  %v5288_v55 = vand.u32 4294901760, %v5287_v3  ;;  %v13027_v3 = vld [vmem:[#allocation35_spill] sm:$0xff] }
 0xcee   :  { %5583 = vmatpush1.msra.mxu1 %v11334_v44 }
 0xcef   :  { %5585 = vmatprep.subr.mxu1 %v11357_v10  ;;  %5289 = vmatmul.mubr.f32.vlgmr.msra.gmra.mxu0 %v5288_v55  ;;  %v13028_v55 = vld [vmem:[#allocation36_spill] sm:$0xff] }
 0xcf0   :  { %5468 = vmatpush1.msra.mxu0 %v11287_v57  ;;  %5587 = vmatpush1.msra.mxu1 %v11368_v4 }
 0xcf1   :  { %5471 = vmatprep.subr.mxu0 %v11297_v58  ;;  %5589 = vmatprep.subr.mxu1 %v11379_v42 }
 0xcf2   :  { %5474 = vmatpush1.msra.mxu0 %v11304_v26  ;;  %5591 = vmatpush1.msra.mxu1 %v11390_v16 }
 0xcf3   :  { %5477 = vmatprep.subr.mxu0 %v11322_v32  ;;  %5593 = vmatprep.subr.mxu1 %v11413_v31 }
 0xcf4   :  { %5480 = vmatpush1.msra.mxu0 %v11332_v25  ;;  %5595 = vmatpush1.msra.mxu1 %v11424_v35 }
 0xcf5   :  { %5483 = vmatprep.subr.mxu0 %v11345_v38  ;;  %5597 = vmatprep.subr.mxu1 %v11435_v1 }
 0xcf6   :  { %5486 = vmatpush1.msra.mxu0 %v11355_v36  ;;  %5599 = vmatpush1.msra.mxu1 %v11447_v30 }
 0xcf7   :  { %5489 = vmatprep.subr.mxu0 %v11377_v15  ;;  %5636 = vmatmul.mubr.f32.vlgmr.msra.gmra.mxu1 %v5286_v34  ;;  %v13026_v34 = vld [vmem:[#allocation18_spill] sm:$0xff] }
 0xcf8   :  { %5779 = vmatprep.subr.mxu1 %v11274_v54  ;;  %5492 = vmatpush1.msra.mxu0 %v11388_v37 }
 0xcf9   :  { %5781 = vmatpush1.msra.mxu1 %v11276_v60  ;;  %5495 = vmatprep.subr.mxu0 %v11401_v27 }
 0xcfa   :  { %5783 = vmatprep.subr.mxu1 %v11283_v28  ;;  %5498 = vmatpush1.msra.mxu0 %v11411_v61 }
 0xcfb   :  { %5785 = vmatpush1.msra.mxu1 %v11289_v33  ;;  %5501 = vmatprep.subr.mxu0 %v11433_v53 }
 0xcfc   :  { %5787 = vmatprep.subr.mxu1 %v11306_v13  ;;  %5504 = vmatpush1.msra.mxu0 %v11445_v23 }
 0xcfd   :  { %5789 = vmatpush1.msra.mxu1 %v11314_v20  ;;  %5507 = vmatprep.subr.mxu0 %v11464_v7 }
 0xcfe   :  { %5791 = vmatprep.subr.mxu1 %v11324_v52  ;;  %5510 = vmatpush1.msra.mxu0 %v11473_v62 }
 0xcff   :  { %5543 = vmatprep.mubr.f32.mxu0 %v12909_v9  ;;  %5793 = vmatpush1.msra.mxu1 %v11334_v44 }
 0xd00   :  { %5546 = vmatmul.mubr.f32.vlgmr.msra.gmra.mxu0 %v5285_v45  ;;  %5661 = vmatprep.subr.mxu0 %v11294_v11  ;;  %v13025_v45 = vld [vmem:[#allocation27_spill] sm:$0xff] }
 0xd01   :  { %5795 = vmatprep.subr.mxu1 %v11357_v10  ;;  %5665 = vmatpush1.msra.mxu0 %v11301_v56 }
 0xd02   :  { %5797 = vmatpush1.msra.mxu1 %v11368_v4  ;;  %5669 = vmatprep.subr.mxu0 %v11312_v47 }
 0xd03   :  { %5799 = vmatprep.subr.mxu1 %v11379_v42  ;;  %5673 = vmatpush1.msra.mxu0 %v11319_v46 }
 0xd04   :  { %5801 = vmatpush1.msra.mxu1 %v11390_v16  ;;  %5677 = vmatprep.subr.mxu0 %v11342_v29 }
 0xd05   :  { %5803 = vmatprep.subr.mxu1 %v11413_v31  ;;  %5681 = vmatpush1.msra.mxu0 %v11352_v39 }
 0xd06   :  { %5805 = vmatpush1.msra.mxu1 %v11424_v35  ;;  %5685 = vmatprep.subr.mxu0 %v11366_v59 }
 0xd07   :  { %5807 = vmatprep.subr.mxu1 %v11435_v1  ;;  %5689 = vmatpush1.msra.mxu0 %v13008_v6 }
 0xd08   :  { %5809 = vmatpush1.msra.mxu1 %v11447_v30  ;;  %5842 = vmatprep.mubr.f32.mxu1 %v12909_v9 }
 0xd09   :  { %5693 = vmatprep.subr.mxu0 %v13009_v40  ;;  %5844 = vmatmul.mubr.f32.vlgmr.msra.gmra.mxu1 %v11881_v50 }
 0xd0a   :  { %5697 = vmatpush1.msra.mxu0 %v13010_v2  ;;  %5754 = vmatprep.mubr.f32.mxu0 %v12909_v9 }
 0xd0b   :  { %5701 = vmatprep.subr.mxu0 %v13011_v24  ;;  %6002 = vmatprep.subr.mxu1 %v13012_v18 }
 0xd0c   :  { %5705 = vmatpush1.msra.mxu0 %v13013_v12  ;;  %6008 = vmatpush1.msra.mxu1 %v13014_v8 }
 0xd0d   :  { %5709 = vmatprep.subr.mxu0 %v13015_v51  ;;  %6014 = vmatprep.subr.mxu1 %v13016_v14 }
 0xd0e   :  { %5713 = vmatpush1.msra.mxu0 %v13017_v22  ;;  %6020 = vmatpush1.msra.mxu1 %v13018_v49 }
 0xd0f   :  { %5717 = vmatprep.subr.mxu0 %v13019_v0  ;;  %6026 = vmatprep.subr.mxu1 %v13020_v48 }
 0xd10   :  { %5721 = vmatpush1.msra.mxu0 %v13021_v17  ;;  %6032 = vmatpush1.msra.mxu1 %v13022_v21 }
 0xd11   :  { %5756 = vmatmul.mubr.f32.vlgmr.msra.gmra.mxu0 %v11881_v50  ;;  %6038 = vmatprep.subr.mxu1 %v13023_v19  ;;  %v13029_v50 = vld [vmem:[#allocation40_spill] sm:$0xff] }
 0xd12   :  { %6044 = vmatpush1.msra.mxu1 %v13024_v5  ;;  %5906 = vmatprep.subr.mxu0 %v11274_v54  ;;  %v13030_v5 = vld [vmem:[#allocation25_spill] sm:$0xff] }
 0xd13   :  { %6050 = vmatprep.subr.mxu1 %v13025_v45  ;;  %5908 = vmatpush1.msra.mxu0 %v11276_v60  ;;  %v13031_v45 = vld [vmem:[#allocation42_spill] sm:$0xff] }
 0xd14   :  { %6056 = vmatpush1.msra.mxu1 %v13026_v34  ;;  %5910 = vmatprep.subr.mxu0 %v11283_v28  ;;  %v13032_v34 = vld [vmem:[#allocation43_spill] sm:$0xff] }
 0xd15   :  { %6062 = vmatprep.subr.mxu1 %v13027_v3  ;;  %5912 = vmatpush1.msra.mxu0 %v11289_v33 }
 0xd16   :  { %6068 = vmatpush1.msra.mxu1 %v13028_v55  ;;  %5914 = vmatprep.subr.mxu0 %v11306_v13 }
 0xd17   :  { %6074 = vmatprep.subr.mxu1 %v13029_v50  ;;  %5916 = vmatpush1.msra.mxu0 %v11314_v20 }
 0xd18   :  { %6080 = vmatpush1.msra.mxu1 %v13030_v5  ;;  %5918 = vmatprep.subr.mxu0 %v11324_v52 }
 0xd19   :  { %6086 = vmatprep.subr.mxu1 %v13031_v45  ;;  %5920 = vmatpush1.msra.mxu0 %v11334_v44 }
 0xd1a   :  { %6092 = vmatpush1.msra.mxu1 %v13032_v34  ;;  %5922 = vmatprep.subr.mxu0 %v11357_v10  ;;  %v13033_v34 = vld [vmem:[#allocation19_spill] sm:$0xff] }
 0xd1b   :  { %6125 = vmatprep.mubr.f32.mxu1 %v12909_v9  ;;  %6255 = vmatprep.subr.mxu1 %v11274_v54 }
 0xd1c   :  { %5924 = vmatpush1.msra.mxu0 %v11368_v4  ;;  %5969 = vmatprep.mubr.f32.mxu0 %v12909_v9 }
 0xd1d   :  { %5926 = vmatprep.subr.mxu0 %v11379_v42 }
 0xd1e   :  { %5928 = vmatpush1.msra.mxu0 %v11390_v16 }
 0xd1f   :  { %5930 = vmatprep.subr.mxu0 %v11413_v31 }
 0xd20   :  { %5932 = vmatpush1.msra.mxu0 %v11424_v35 }
 0xd21   :  { %5934 = vmatprep.subr.mxu0 %v11435_v1 }
 0xd22   :  { %5936 = vmatpush1.msra.mxu0 %v11447_v30 }
 0xd23   :  { %6151 = vmatprep.subr.mxu0 %v13033_v34 }
 0xda7   :  { %v5442_v45 = vpop.f32.mrf.mxu1 }
 0xda9   :  { %v5444_v3 = vpop.f32.mrf.mxu1 }
 0xdaf   :  { %v5290_v5 = vpop.f32.mrf.mxu0 }
 0xdb0   :  { %v5443_v50 = vadd.f32 %v5442_v45, %v5290_v5 }
 0xdb1   :  { %v5292_v55 = vpop.f32.mrf.mxu0 }
 0xdb2   :  { %v5445_v49 = vadd.f32 %v5444_v3, %v5292_v55 }
 0xdb7   :  { %v5637_v17 = vpop.f32.mrf.mxu1 }
 0xdb9   :  { %v5639_v14 = vpop.f32.mrf.mxu1 }
 0xdc0   :  { %v5547_v19 = vpop.f32.mrf.mxu0 }
 0xdc1   :  { %v5548_v21 = vadd.f32 %v5547_v19, %v5443_v50 }
 0xdc2   :  { %v5549_v0 = vpop.f32.mrf.mxu0 }
 0xdc3   :  { %v5638_v48 = vadd.f32 %v5637_v17, %v5548_v21  ;;  %v5550_v22 = vadd.f32 %v5549_v0, %v5445_v49 }
 0xdc5   :  { %v5640_v18 = vadd.f32 %v5639_v14, %v5550_v22 }
 0xdc9   :  { %v5845_v51 = vpop.f32.mrf.mxu1 }
 0xdcb   :  { %v5847_v40 = vpop.f32.mrf.mxu1 }
 0xdd1   :  { %v5757_v8 = vpop.f32.mrf.mxu0 }
 0xdd2   :  { %v5758_v12 = vadd.f32 %v5757_v8, %v5638_v48 }
 0xdd3   :  { %v5759_v24 = vpop.f32.mrf.mxu0 }
 0xdd4   :  { %v5846_v2 = vadd.f32 %v5845_v51, %v5758_v12  ;;  %v5760_v34 = vadd.f32 %v5759_v24, %v5640_v18 }
 0xdd6   :  { %v5848_v6 = vadd.f32 %v5847_v40, %v5760_v34  ;;  %v5850_v17 = vadd.f32 %v5846_v2, %v11272_v63 }
 0xdd8   :  { %v5851_v5 = vadd.f32 %v5848_v6, %v11278_v41  ;;  %v8577_v21 = vmul.f32 -1.442695, %v5850_v17  ;;  %v13034_v17 = vld [vmem:[#allocation31_spill] sm:$0xff] }
 0xdda   :  { %9346 = vtanh.f32 %v5851_v5  ;;  %v8578_v2 = vmul.f32 -1.442695, %v5851_v5 }
 0xddb   :  { %9348 = vpow2.f32 %v8577_v21  ;;  %v13035_v21 = vld [vmem:[#allocation22_spill] sm:$0xff] }
 0xde7   :  { %v9347_v45 = vpop.eup %9346 }
 0xde8   :  { %5867 = vrot.lane.b32.xlu0 %v9347_v45, %s9534_s9  ;;  %v9349_v49 = vpop.eup %9348 }
 0xde9   :  { %v5858_v0 = vadd.f32 1.0, %v9349_v49  ;;  %v13036_v49 = vld [vmem:[#allocation24_spill] sm:$0xff] }
 0xdeb   :  { %9350 = vrcp.f32 %v5858_v0  ;;  %v13037_v0 = vld [vmem:[#allocation26_spill] sm:$0xff] }
 0xdf8   :  { %v9351_v8 = vpop.eup %9350 }
 0xdf9   :  { %v5865_v40 = vmul.f32 %v9351_v8, %v11872_v43 }
 0xe5a   :  { %v5868_v14 = vpop.permute.xlu0 %5867 }
 0xe5b   :  { %v5870_v22 = vmul.f32 %v9351_v8, %v5868_v14  ;;  %v13038_v8 = vld [vmem:[#allocation20_spill] sm:$0xff]  ;;  %v13039_v14 = vld [vmem:[#allocation39_spill] sm:$0xff] }
 0xe5d   :  { %5872 = vrot.lane.b32.xlu1 %v5870_v22, %s9534_s9  ;;  %v13040_v22 = vld [vmem:[#allocation28_spill] sm:$0xff] }
 0xecf   :  { %v5873_v24 = vpop.permute.xlu1 %5872 }
 0xed0   :  { %v11994_v6 = vadd.f32 %v5873_v24, %v5865_v40  ;;  %v13041_v40 = vld [vmem:[#allocation33_spill] sm:$0xff] }
 0xed1   :  { %v13042_v24 = vld [vmem:[#allocation29_spill] sm:$0xff] }
 0xed2   :  { %9352 = vtanh.f32 %v11994_v6 }
 0xed3   :  { %9354 = vpow2.f32 %v8578_v2  ;;  %v13044_v2 = vld [vmem:[#allocation21_spill] sm:$0xff] }
 0xedf   :  { %v9353_v18 = vpop.eup %9352 }
 0xee0   :  { %5878 = vrot.lane.b32.xlu0 %v9353_v18, %s9534_s9  ;;  %v9355_v12 = vpop.eup %9354  ;;  %v13043_v18 = vld [vmem:[#allocation17_spill] sm:$0xff] }
 0xee1   :  { %v5859_v51 = vadd.f32 1.0, %v9355_v12  ;;  %v13045_v12 = vld [vmem:[#allocation37_spill] sm:$0xff] }
 0xee3   :  { %9356 = vrcp.f32 %v5859_v51  ;;  %v13046_v51 = vld [vmem:[#allocation30_spill] sm:$0xff] }
 0xef0   :  { %v9357_v48 = vpop.eup %9356 }
 0xf52   :  { %v5879_v19 = vpop.permute.xlu0 %5878 }
 0xf53   :  { %v5881_v34 = vmul.f32 %v9357_v48, %v5879_v19  ;;  %v13047_v48 = vld [vmem:[#allocation41_spill] sm:$0xff]  ;;  %v13048_v19 = vld [vmem:[#allocation32_spill] sm:$0xff] }
 0xf55   :  { %5882 = vst.msk [vmem:[#allocation2 + $0x4] sm:$0x1] %vm3129_vm4, %v5881_v34  ;;  %v5887_v43 = vsel %vm3137_vm3, %v5881_v34, 0 }
 0xf56   :  { %5883 = vst.msk [vmem:[#allocation2 + $0x3] sm:$0x1] %vm3131_vm5, %v5881_v34  ;;  %v12003_v3 = vand.u32 4294901760, %v5887_v43 }
 0xf57   :  { %5884 = vst.msk [vmem:[#allocation2 + $0xb] sm:$0x2] %vm3133_vm6, %v5881_v34 }
 0xf58   :  { %5885 = vst.msk [vmem:[#allocation2 + $0xa] sm:$0x2] %vm3135_vm7, %v5881_v34  ;;  %v5971_v55 = vsub.f32 %v5887_v43, %v12003_v3  ;;  %6127 = vmatmul.mubr.f32.vlgmr.msra.gmra.mxu1 %v12003_v3  ;;  %v13049_v34 = vld [vmem:[#allocation34_spill] sm:$0xff] }
 0xf59   :  { %6257 = vmatpush1.msra.mxu1 %v11276_v60  ;;  %6318 = vmatprep.mubr.f32.mxu1 %v12909_v9  ;;  %v13050_v43 = vld [vmem:[#allocation38_spill] sm:$0xff] }
 0xf5a   :  { %6259 = vmatprep.subr.mxu1 %v11283_v28  ;;  %v5972_v50 = vand.u32 4294901760, %v5971_v55 }
 0xf5b   :  { %6261 = vmatpush1.msra.mxu1 %v11289_v33 }
 0xf5c   :  { %6263 = vmatprep.subr.mxu1 %v11306_v13  ;;  %v5973_v5 = vsub.f32 %v5971_v55, %v5972_v50 }
 0xf5d   :  { %6265 = vmatpush1.msra.mxu1 %v11314_v20 }
 0xf5e   :  { %6267 = vmatprep.subr.mxu1 %v11324_v52  ;;  %v5974_v45 = vand.u32 4294901760, %v5973_v5  ;;  %v13053_v5 = vld [vmem:[#allocation35_spill] sm:$0xff] }
 0xf5f   :  { %6269 = vmatpush1.msra.mxu1 %v11334_v44 }
 0xf60   :  { %6271 = vmatprep.subr.mxu1 %v11357_v10  ;;  %5975 = vmatmul.mubr.f32.vlgmr.msra.gmra.mxu0 %v5974_v45  ;;  %v13054_v45 = vld [vmem:[#allocation36_spill] sm:$0xff] }
 0xf61   :  { %6154 = vmatpush1.msra.mxu0 %v11287_v57  ;;  %6273 = vmatpush1.msra.mxu1 %v11368_v4 }
 0xf62   :  { %6157 = vmatprep.subr.mxu0 %v11297_v58  ;;  %6275 = vmatprep.subr.mxu1 %v11379_v42 }
 0xf63   :  { %6160 = vmatpush1.msra.mxu0 %v11304_v26  ;;  %6277 = vmatpush1.msra.mxu1 %v11390_v16 }
 0xf64   :  { %6163 = vmatprep.subr.mxu0 %v11322_v32  ;;  %6279 = vmatprep.subr.mxu1 %v11413_v31 }
 0xf65   :  { %6166 = vmatpush1.msra.mxu0 %v11332_v25  ;;  %6281 = vmatpush1.msra.mxu1 %v11424_v35 }
 0xf66   :  { %6169 = vmatprep.subr.mxu0 %v11345_v38  ;;  %6283 = vmatprep.subr.mxu1 %v11435_v1 }
 0xf67   :  { %6172 = vmatpush1.msra.mxu0 %v11355_v36  ;;  %6285 = vmatpush1.msra.mxu1 %v11447_v30 }
 0xf68   :  { %6175 = vmatprep.subr.mxu0 %v11377_v15  ;;  %6322 = vmatmul.mubr.f32.vlgmr.msra.gmra.mxu1 %v5972_v50  ;;  %v13052_v50 = vld [vmem:[#allocation18_spill] sm:$0xff] }
 0xf69   :  { %6465 = vmatprep.subr.mxu1 %v11274_v54  ;;  %6178 = vmatpush1.msra.mxu0 %v11388_v37 }
 0xf6a   :  { %6467 = vmatpush1.msra.mxu1 %v11276_v60  ;;  %6181 = vmatprep.subr.mxu0 %v11401_v27 }
 0xf6b   :  { %6469 = vmatprep.subr.mxu1 %v11283_v28  ;;  %6184 = vmatpush1.msra.mxu0 %v11411_v61 }
 0xf6c   :  { %6471 = vmatpush1.msra.mxu1 %v11289_v33  ;;  %6187 = vmatprep.subr.mxu0 %v11433_v53 }
 0xf6d   :  { %6473 = vmatprep.subr.mxu1 %v11306_v13  ;;  %6190 = vmatpush1.msra.mxu0 %v11445_v23 }
 0xf6e   :  { %6475 = vmatpush1.msra.mxu1 %v11314_v20  ;;  %6193 = vmatprep.subr.mxu0 %v11464_v7 }
 0xf6f   :  { %6477 = vmatprep.subr.mxu1 %v11324_v52  ;;  %6196 = vmatpush1.msra.mxu0 %v11473_v62 }
 0xf70   :  { %6229 = vmatprep.mubr.f32.mxu0 %v12909_v9  ;;  %6479 = vmatpush1.msra.mxu1 %v11334_v44 }
 0xf71   :  { %6232 = vmatmul.mubr.f32.vlgmr.msra.gmra.mxu0 %v5971_v55  ;;  %6347 = vmatprep.subr.mxu0 %v11294_v11  ;;  %v13051_v55 = vld [vmem:[#allocation27_spill] sm:$0xff] }
 0xf72   :  { %6481 = vmatprep.subr.mxu1 %v11357_v10  ;;  %6351 = vmatpush1.msra.mxu0 %v11301_v56 }
 0xf73   :  { %6483 = vmatpush1.msra.mxu1 %v11368_v4  ;;  %6355 = vmatprep.subr.mxu0 %v11312_v47 }
 0xf74   :  { %6485 = vmatprep.subr.mxu1 %v11379_v42  ;;  %6359 = vmatpush1.msra.mxu0 %v11319_v46 }
 0xf75   :  { %6487 = vmatpush1.msra.mxu1 %v11390_v16  ;;  %6363 = vmatprep.subr.mxu0 %v11342_v29 }
 0xf76   :  { %6489 = vmatprep.subr.mxu1 %v11413_v31  ;;  %6367 = vmatpush1.msra.mxu0 %v11352_v39 }
 0xf77   :  { %6491 = vmatpush1.msra.mxu1 %v11424_v35  ;;  %6371 = vmatprep.subr.mxu0 %v11366_v59 }
 0xf78   :  { %6493 = vmatprep.subr.mxu1 %v11435_v1  ;;  %6375 = vmatpush1.msra.mxu0 %v13034_v17 }
 0xf79   :  { %6495 = vmatpush1.msra.mxu1 %v11447_v30  ;;  %6528 = vmatprep.mubr.f32.mxu1 %v12909_v9 }
 0xf7a   :  { %6379 = vmatprep.subr.mxu0 %v13035_v21  ;;  %6530 = vmatmul.mubr.f32.vlgmr.msra.gmra.mxu1 %v12003_v3 }
 0xf7b   :  { %6383 = vmatpush1.msra.mxu0 %v13036_v49  ;;  %6440 = vmatprep.mubr.f32.mxu0 %v12909_v9 }
 0xf7c   :  { %6387 = vmatprep.subr.mxu0 %v13037_v0  ;;  %6688 = vmatprep.subr.mxu1 %v13038_v8 }
 0xf7d   :  { %6391 = vmatpush1.msra.mxu0 %v13039_v14  ;;  %6694 = vmatpush1.msra.mxu1 %v13040_v22 }
 0xf7e   :  { %6395 = vmatprep.subr.mxu0 %v13041_v40  ;;  %6700 = vmatprep.subr.mxu1 %v13042_v24 }
 0xf7f   :  { %6399 = vmatpush1.msra.mxu0 %v13043_v18  ;;  %6706 = vmatpush1.msra.mxu1 %v13044_v2 }
 0xf80   :  { %6403 = vmatprep.subr.mxu0 %v13045_v12  ;;  %6712 = vmatprep.subr.mxu1 %v13046_v51 }
 0xf81   :  { %6407 = vmatpush1.msra.mxu0 %v13047_v48  ;;  %6718 = vmatpush1.msra.mxu1 %v13048_v19 }
 0xf82   :  { %6442 = vmatmul.mubr.f32.vlgmr.msra.gmra.mxu0 %v12003_v3  ;;  %6724 = vmatprep.subr.mxu1 %v13049_v34  ;;  %v13055_v3 = vld [vmem:[#allocation40_spill] sm:$0xff] }
 0xf83   :  { %6730 = vmatpush1.msra.mxu1 %v13050_v43  ;;  %6592 = vmatprep.subr.mxu0 %v11274_v54  ;;  %v13056_v43 = vld [vmem:[#allocation25_spill] sm:$0xff] }
 0xf84   :  { %6736 = vmatprep.subr.mxu1 %v13051_v55  ;;  %6594 = vmatpush1.msra.mxu0 %v11276_v60  ;;  %v13057_v55 = vld [vmem:[#allocation42_spill] sm:$0xff] }
 0xf85   :  { %6742 = vmatpush1.msra.mxu1 %v13052_v50  ;;  %6596 = vmatprep.subr.mxu0 %v11283_v28  ;;  %v13058_v50 = vld [vmem:[#allocation43_spill] sm:$0xff] }
 0xf86   :  { %6748 = vmatprep.subr.mxu1 %v13053_v5  ;;  %6598 = vmatpush1.msra.mxu0 %v11289_v33 }
 0xf87   :  { %6754 = vmatpush1.msra.mxu1 %v13054_v45  ;;  %6600 = vmatprep.subr.mxu0 %v11306_v13 }
 0xf88   :  { %6760 = vmatprep.subr.mxu1 %v13055_v3  ;;  %6602 = vmatpush1.msra.mxu0 %v11314_v20 }
 0xf89   :  { %6766 = vmatpush1.msra.mxu1 %v13056_v43  ;;  %6604 = vmatprep.subr.mxu0 %v11324_v52 }
 0xf8a   :  { %6772 = vmatprep.subr.mxu1 %v13057_v55  ;;  %6606 = vmatpush1.msra.mxu0 %v11334_v44 }
 0xf8b   :  { %6778 = vmatpush1.msra.mxu1 %v13058_v50  ;;  %6608 = vmatprep.subr.mxu0 %v11357_v10  ;;  %v13059_v50 = vld [vmem:[#allocation19_spill] sm:$0xff] }
 0xf8c   :  { %6811 = vmatprep.mubr.f32.mxu1 %v12909_v9  ;;  %6941 = vmatprep.subr.mxu1 %v11274_v54 }
 0xf8d   :  { %6610 = vmatpush1.msra.mxu0 %v11368_v4  ;;  %6655 = vmatprep.mubr.f32.mxu0 %v12909_v9 }
 0xf8e   :  { %6612 = vmatprep.subr.mxu0 %v11379_v42 }
 0xf8f   :  { %6614 = vmatpush1.msra.mxu0 %v11390_v16 }
 0xf90   :  { %6616 = vmatprep.subr.mxu0 %v11413_v31 }
 0xf91   :  { %6618 = vmatpush1.msra.mxu0 %v11424_v35 }
 0xf92   :  { %6620 = vmatprep.subr.mxu0 %v11435_v1 }
 0xf93   :  { %6622 = vmatpush1.msra.mxu0 %v11447_v30 }
 0xf94   :  { %6837 = vmatprep.subr.mxu0 %v13059_v50 }
0x1018   :  { %v6128_v55 = vpop.f32.mrf.mxu1 }
0x101a   :  { %v6130_v5 = vpop.f32.mrf.mxu1 }
0x1020   :  { %v5976_v43 = vpop.f32.mrf.mxu0 }
0x1021   :  { %v6129_v3 = vadd.f32 %v6128_v55, %v5976_v43 }
0x1022   :  { %v5978_v45 = vpop.f32.mrf.mxu0 }
0x1023   :  { %v6131_v2 = vadd.f32 %v6130_v5, %v5978_v45 }
0x1028   :  { %v6323_v48 = vpop.f32.mrf.mxu1 }
0x102a   :  { %v6325_v24 = vpop.f32.mrf.mxu1 }
0x1031   :  { %v6233_v34 = vpop.f32.mrf.mxu0 }
0x1032   :  { %v6234_v19 = vadd.f32 %v6233_v34, %v6129_v3 }
0x1033   :  { %v6235_v12 = vpop.f32.mrf.mxu0 }
0x1034   :  { %v6324_v51 = vadd.f32 %v6323_v48, %v6234_v19  ;;  %v6236_v18 = vadd.f32 %v6235_v12, %v6131_v2 }
0x1036   :  { %v6326_v8 = vadd.f32 %v6325_v24, %v6236_v18 }
0x103a   :  { %v6531_v40 = vpop.f32.mrf.mxu1 }
0x103c   :  { %v6533_v21 = vpop.f32.mrf.mxu1 }
0x1042   :  { %v6443_v22 = vpop.f32.mrf.mxu0 }
0x1043   :  { %v6444_v14 = vadd.f32 %v6443_v22, %v6324_v51 }
0x1044   :  { %v6445_v0 = vpop.f32.mrf.mxu0 }
0x1045   :  { %v6532_v49 = vadd.f32 %v6531_v40, %v6444_v14  ;;  %v6446_v50 = vadd.f32 %v6445_v0, %v6326_v8 }
0x1047   :  { %v6534_v17 = vadd.f32 %v6533_v21, %v6446_v50  ;;  %v6536_v48 = vadd.f32 %v6532_v49, %v11272_v63 }
0x1049   :  { %v6537_v43 = vadd.f32 %v6534_v17, %v11278_v41  ;;  %v8579_v19 = vmul.f32 -1.442695, %v6536_v48  ;;  %v13060_v48 = vld [vmem:[#allocation31_spill] sm:$0xff] }
0x104b   :  { %9358 = vtanh.f32 %v6537_v43  ;;  %v8580_v49 = vmul.f32 -1.442695, %v6537_v43 }
0x104c   :  { %9360 = vpow2.f32 %v8579_v19  ;;  %v13061_v19 = vld [vmem:[#allocation22_spill] sm:$0xff] }
0x1058   :  { %v9359_v55 = vpop.eup %9358 }
0x1059   :  { %6553 = vrot.lane.b32.xlu1 %v9359_v55, %s9534_s9  ;;  %v9361_v2 = vpop.eup %9360 }
0x105a   :  { %v6544_v12 = vadd.f32 1.0, %v9361_v2  ;;  %v13062_v2 = vld [vmem:[#allocation24_spill] sm:$0xff] }
0x105c   :  { %9362 = vrcp.f32 %v6544_v12  ;;  %v13063_v12 = vld [vmem:[#allocation26_spill] sm:$0xff] }
0x1069   :  { %v9363_v22 = vpop.eup %9362 }
0x106a   :  { %v6551_v21 = vmul.f32 %v9363_v22, %v11994_v6 }
0x10cb   :  { %v6554_v24 = vpop.permute.xlu1 %6553 }
0x10cc   :  { %v6556_v18 = vmul.f32 %v9363_v22, %v6554_v24  ;;  %v13064_v22 = vld [vmem:[#allocation20_spill] sm:$0xff]  ;;  %v13065_v24 = vld [vmem:[#allocation39_spill] sm:$0xff] }
0x10ce   :  { %6558 = vrot.lane.b32.xlu0 %v6556_v18, %s9534_s9  ;;  %v13066_v18 = vld [vmem:[#allocation28_spill] sm:$0xff] }
0x1140   :  { %v6559_v0 = vpop.permute.xlu0 %6558 }
0x1141   :  { %v12116_v17 = vadd.f32 %v6559_v0, %v6551_v21  ;;  %v13067_v21 = vld [vmem:[#allocation33_spill] sm:$0xff] }
0x1142   :  { %v13068_v0 = vld [vmem:[#allocation29_spill] sm:$0xff] }
0x1143   :  { %9364 = vtanh.f32 %v12116_v17 }
0x1144   :  { %9366 = vpow2.f32 %v8580_v49  ;;  %v13070_v49 = vld [vmem:[#allocation21_spill] sm:$0xff] }
0x1150   :  { %v9365_v8 = vpop.eup %9364 }
0x1151   :  { %6564 = vrot.lane.b32.xlu1 %v9365_v8, %s9534_s9  ;;  %v9367_v14 = vpop.eup %9366  ;;  %v13069_v8 = vld [vmem:[#allocation17_spill] sm:$0xff] }
0x1152   :  { %v6545_v40 = vadd.f32 1.0, %v9367_v14  ;;  %v13071_v14 = vld [vmem:[#allocation37_spill] sm:$0xff] }
0x1154   :  { %9368 = vrcp.f32 %v6545_v40  ;;  %v13072_v40 = vld [vmem:[#allocation30_spill] sm:$0xff] }
0x1161   :  { %v9369_v51 = vpop.eup %9368 }
0x11c3   :  { %v6565_v34 = vpop.permute.xlu1 %6564 }
0x11c4   :  { %v6567_v50 = vmul.f32 %v9369_v51, %v6565_v34  ;;  %v13073_v51 = vld [vmem:[#allocation41_spill] sm:$0xff]  ;;  %v13074_v34 = vld [vmem:[#allocation32_spill] sm:$0xff] }
0x11c6   :  { %6568 = vst.msk [vmem:[#allocation2 + $0x5] sm:$0x1] %vm3129_vm4, %v6567_v50  ;;  %v6573_v6 = vsel %vm3137_vm3, %v6567_v50, 0 }
0x11c7   :  { %6569 = vst.msk [vmem:[#allocation2 + $0x2] sm:$0x1] %vm3131_vm5, %v6567_v50  ;;  %v12125_v5 = vand.u32 4294901760, %v6573_v6 }
0x11c8   :  { %6570 = vst.msk [vmem:[#allocation2 + $0xc] sm:$0x2] %vm3133_vm6, %v6567_v50 }
0x11c9   :  { %6571 = vst.msk [vmem:[#allocation2 + $0x9] sm:$0x2] %vm3135_vm7, %v6567_v50  ;;  %v6657_v45 = vsub.f32 %v6573_v6, %v12125_v5  ;;  %6813 = vmatmul.mubr.f32.vlgmr.msra.gmra.mxu1 %v12125_v5  ;;  %v13075_v50 = vld [vmem:[#allocation34_spill] sm:$0xff] }
0x11ca   :  { %6943 = vmatpush1.msra.mxu1 %v11276_v60  ;;  %7004 = vmatprep.mubr.f32.mxu1 %v12909_v9  ;;  %v13076_v6 = vld [vmem:[#allocation38_spill] sm:$0xff] }
0x11cb   :  { %6945 = vmatprep.subr.mxu1 %v11283_v28  ;;  %v6658_v3 = vand.u32 4294901760, %v6657_v45 }
0x11cc   :  { %6947 = vmatpush1.msra.mxu1 %v11289_v33 }
0x11cd   :  { %6949 = vmatprep.subr.mxu1 %v11306_v13  ;;  %v6659_v43 = vsub.f32 %v6657_v45, %v6658_v3 }
0x11ce   :  { %6951 = vmatpush1.msra.mxu1 %v11314_v20 }
0x11cf   :  { %6953 = vmatprep.subr.mxu1 %v11324_v52  ;;  %v6660_v55 = vand.u32 4294901760, %v6659_v43  ;;  %v13079_v43 = vld [vmem:[#allocation35_spill] sm:$0xff] }
0x11d0   :  { %6955 = vmatpush1.msra.mxu1 %v11334_v44 }
0x11d1   :  { %6957 = vmatprep.subr.mxu1 %v11357_v10  ;;  %6661 = vmatmul.mubr.f32.vlgmr.msra.gmra.mxu0 %v6660_v55  ;;  %v13080_v55 = vld [vmem:[#allocation36_spill] sm:$0xff] }
0x11d2   :  { %6840 = vmatpush1.msra.mxu0 %v11287_v57  ;;  %6959 = vmatpush1.msra.mxu1 %v11368_v4 }
0x11d3   :  { %6843 = vmatprep.subr.mxu0 %v11297_v58  ;;  %6961 = vmatprep.subr.mxu1 %v11379_v42 }
0x11d4   :  { %6846 = vmatpush1.msra.mxu0 %v11304_v26  ;;  %6963 = vmatpush1.msra.mxu1 %v11390_v16 }
0x11d5   :  { %6849 = vmatprep.subr.mxu0 %v11322_v32  ;;  %6965 = vmatprep.subr.mxu1 %v11413_v31 }
0x11d6   :  { %6852 = vmatpush1.msra.mxu0 %v11332_v25  ;;  %6967 = vmatpush1.msra.mxu1 %v11424_v35 }
0x11d7   :  { %6855 = vmatprep.subr.mxu0 %v11345_v38  ;;  %6969 = vmatprep.subr.mxu1 %v11435_v1 }
0x11d8   :  { %6858 = vmatpush1.msra.mxu0 %v11355_v36  ;;  %6971 = vmatpush1.msra.mxu1 %v11447_v30 }
0x11d9   :  { %6861 = vmatprep.subr.mxu0 %v11377_v15  ;;  %7008 = vmatmul.mubr.f32.vlgmr.msra.gmra.mxu1 %v6658_v3  ;;  %v13078_v3 = vld [vmem:[#allocation18_spill] sm:$0xff] }
0x11da   :  { %7151 = vmatprep.subr.mxu1 %v11274_v54  ;;  %6864 = vmatpush1.msra.mxu0 %v11388_v37 }
0x11db   :  { %7153 = vmatpush1.msra.mxu1 %v11276_v60  ;;  %6867 = vmatprep.subr.mxu0 %v11401_v27 }
0x11dc   :  { %7155 = vmatprep.subr.mxu1 %v11283_v28  ;;  %6870 = vmatpush1.msra.mxu0 %v11411_v61 }
0x11dd   :  { %7157 = vmatpush1.msra.mxu1 %v11289_v33  ;;  %6873 = vmatprep.subr.mxu0 %v11433_v53 }
0x11de   :  { %7159 = vmatprep.subr.mxu1 %v11306_v13  ;;  %6876 = vmatpush1.msra.mxu0 %v11445_v23 }
0x11df   :  { %7161 = vmatpush1.msra.mxu1 %v11314_v20  ;;  %6879 = vmatprep.subr.mxu0 %v11464_v7 }
0x11e0   :  { %7163 = vmatprep.subr.mxu1 %v11324_v52  ;;  %6882 = vmatpush1.msra.mxu0 %v11473_v62 }
0x11e1   :  { %6915 = vmatprep.mubr.f32.mxu0 %v12909_v9  ;;  %7165 = vmatpush1.msra.mxu1 %v11334_v44 }
0x11e2   :  { %6918 = vmatmul.mubr.f32.vlgmr.msra.gmra.mxu0 %v6657_v45  ;;  %7033 = vmatprep.subr.mxu0 %v11294_v11  ;;  %v13077_v45 = vld [vmem:[#allocation27_spill] sm:$0xff] }
0x11e3   :  { %7167 = vmatprep.subr.mxu1 %v11357_v10  ;;  %7037 = vmatpush1.msra.mxu0 %v11301_v56 }
0x11e4   :  { %7169 = vmatpush1.msra.mxu1 %v11368_v4  ;;  %7041 = vmatprep.subr.mxu0 %v11312_v47 }
0x11e5   :  { %7171 = vmatprep.subr.mxu1 %v11379_v42  ;;  %7045 = vmatpush1.msra.mxu0 %v11319_v46 }
0x11e6   :  { %7173 = vmatpush1.msra.mxu1 %v11390_v16  ;;  %7049 = vmatprep.subr.mxu0 %v11342_v29 }
0x11e7   :  { %7175 = vmatprep.subr.mxu1 %v11413_v31  ;;  %7053 = vmatpush1.msra.mxu0 %v11352_v39 }
0x11e8   :  { %7177 = vmatpush1.msra.mxu1 %v11424_v35  ;;  %7057 = vmatprep.subr.mxu0 %v11366_v59 }
0x11e9   :  { %7179 = vmatprep.subr.mxu1 %v11435_v1  ;;  %7061 = vmatpush1.msra.mxu0 %v13060_v48 }
0x11ea   :  { %7181 = vmatpush1.msra.mxu1 %v11447_v30  ;;  %7214 = vmatprep.mubr.f32.mxu1 %v12909_v9 }
0x11eb   :  { %7065 = vmatprep.subr.mxu0 %v13061_v19  ;;  %7216 = vmatmul.mubr.f32.vlgmr.msra.gmra.mxu1 %v12125_v5 }
0x11ec   :  { %7069 = vmatpush1.msra.mxu0 %v13062_v2  ;;  %7126 = vmatprep.mubr.f32.mxu0 %v12909_v9 }
0x11ed   :  { %7073 = vmatprep.subr.mxu0 %v13063_v12  ;;  %7374 = vmatprep.subr.mxu1 %v13064_v22  ;;  %v13082_v22 = vld [vmem:[#allocation25_spill] sm:$0xff] }
0x11ee   :  { %7077 = vmatpush1.msra.mxu0 %v13065_v24  ;;  %7380 = vmatpush1.msra.mxu1 %v13066_v18  ;;  %v13083_v18 = vld [vmem:[#allocation42_spill] sm:$0xff] }
0x11ef   :  { %7081 = vmatprep.subr.mxu0 %v13067_v21  ;;  %7386 = vmatprep.subr.mxu1 %v13068_v0  ;;  %v13084_v0 = vld [vmem:[#allocation43_spill] sm:$0xff] }
0x11f0   :  { %7085 = vmatpush1.msra.mxu0 %v13069_v8  ;;  %7392 = vmatpush1.msra.mxu1 %v13070_v49  ;;  %v13085_v49 = vld [vmem:[#allocation19_spill] sm:$0xff] }
0x11f1   :  { %7089 = vmatprep.subr.mxu0 %v13071_v14  ;;  %7398 = vmatprep.subr.mxu1 %v13072_v40 }
0x11f2   :  { %7093 = vmatpush1.msra.mxu0 %v13073_v51  ;;  %7404 = vmatpush1.msra.mxu1 %v13074_v34 }
0x11f3   :  { %7128 = vmatmul.mubr.f32.vlgmr.msra.gmra.mxu0 %v12125_v5  ;;  %7410 = vmatprep.subr.mxu1 %v13075_v50  ;;  %v13081_v5 = vld [vmem:[#allocation40_spill] sm:$0xff] }
0x11f4   :  { %7416 = vmatpush1.msra.mxu1 %v13076_v6  ;;  %7278 = vmatprep.subr.mxu0 %v11274_v54 }
0x11f5   :  { %7422 = vmatprep.subr.mxu1 %v13077_v45  ;;  %7280 = vmatpush1.msra.mxu0 %v11276_v60 }
0x11f6   :  { %7428 = vmatpush1.msra.mxu1 %v13078_v3  ;;  %7282 = vmatprep.subr.mxu0 %v11283_v28 }
0x11f7   :  { %7434 = vmatprep.subr.mxu1 %v13079_v43  ;;  %7284 = vmatpush1.msra.mxu0 %v11289_v33 }
0x11f8   :  { %7440 = vmatpush1.msra.mxu1 %v13080_v55  ;;  %7286 = vmatprep.subr.mxu0 %v11306_v13 }
0x11f9   :  { %7446 = vmatprep.subr.mxu1 %v13081_v5  ;;  %7288 = vmatpush1.msra.mxu0 %v11314_v20 }
0x11fa   :  { %7452 = vmatpush1.msra.mxu1 %v13082_v22  ;;  %7290 = vmatprep.subr.mxu0 %v11324_v52 }
0x11fb   :  { %7458 = vmatprep.subr.mxu1 %v13083_v18  ;;  %7292 = vmatpush1.msra.mxu0 %v11334_v44 }
0x11fc   :  { %7464 = vmatpush1.msra.mxu1 %v13084_v0  ;;  %7294 = vmatprep.subr.mxu0 %v11357_v10 }
0x11fd   :  { %7497 = vmatprep.mubr.f32.mxu1 %v12909_v9  ;;  %7627 = vmatprep.subr.mxu1 %v11274_v54 }
0x11fe   :  { %7296 = vmatpush1.msra.mxu0 %v11368_v4  ;;  %7341 = vmatprep.mubr.f32.mxu0 %v12909_v9 }
0x11ff   :  { %7298 = vmatprep.subr.mxu0 %v11379_v42 }
0x1200   :  { %7300 = vmatpush1.msra.mxu0 %v11390_v16 }
0x1201   :  { %7302 = vmatprep.subr.mxu0 %v11413_v31 }
0x1202   :  { %7304 = vmatpush1.msra.mxu0 %v11424_v35 }
0x1203   :  { %7306 = vmatprep.subr.mxu0 %v11435_v1 }
0x1204   :  { %7308 = vmatpush1.msra.mxu0 %v11447_v30 }
0x1205   :  { %7523 = vmatprep.subr.mxu0 %v13085_v49 }
0x1289   :  { %v6814_v40 = vpop.f32.mrf.mxu1 }
0x128b   :  { %v6816_v45 = vpop.f32.mrf.mxu1 }
0x1291   :  { %v6662_v34 = vpop.f32.mrf.mxu0 }
0x1292   :  { %v6815_v50 = vadd.f32 %v6814_v40, %v6662_v34 }
0x1293   :  { %v6664_v6 = vpop.f32.mrf.mxu0 }
0x1294   :  { %v6817_v18 = vadd.f32 %v6816_v45, %v6664_v6 }
0x1299   :  { %v7009_v55 = vpop.f32.mrf.mxu1 }
0x129b   :  { %v7011_v51 = vpop.f32.mrf.mxu1 }
0x12a2   :  { %v6919_v3 = vpop.f32.mrf.mxu0 }
0x12a3   :  { %v6920_v43 = vadd.f32 %v6919_v3, %v6815_v50 }
0x12a4   :  { %v6921_v22 = vpop.f32.mrf.mxu0 }
0x12a5   :  { %v7010_v5 = vadd.f32 %v7009_v55, %v6920_v43  ;;  %v6922_v0 = vadd.f32 %v6921_v22, %v6817_v18 }
0x12a7   :  { %v7012_v24 = vadd.f32 %v7011_v51, %v6922_v0 }
0x12ab   :  { %v7217_v14 = vpop.f32.mrf.mxu1 }
0x12ad   :  { %v7219_v19 = vpop.f32.mrf.mxu1 }
0x12b3   :  { %v7129_v8 = vpop.f32.mrf.mxu0 }
0x12b4   :  { %v7130_v21 = vadd.f32 %v7129_v8, %v7010_v5 }
0x12b5   :  { %v7131_v12 = vpop.f32.mrf.mxu0 }
0x12b6   :  { %v7218_v2 = vadd.f32 %v7217_v14, %v7130_v21  ;;  %v7132_v49 = vadd.f32 %v7131_v12, %v7012_v24 }
0x12b8   :  { %v7220_v48 = vadd.f32 %v7219_v19, %v7132_v49  ;;  %v7222_v50 = vadd.f32 %v7218_v2, %v11272_v63 }
0x12ba   :  { %v7223_v40 = vadd.f32 %v7220_v48, %v11278_v41  ;;  %v8581_v6 = vmul.f32 -1.442695, %v7222_v50 }
0x12bc   :  { %9370 = vtanh.f32 %v7223_v40  ;;  %v8582_v2 = vmul.f32 -1.442695, %v7223_v40 }
0x12bd   :  { %9372 = vpow2.f32 %v8581_v6  ;;  %v7952_v6 = vld [vmem:[%s12548_s11 + $0x30] sm:$0xff] }
0x12c9   :  { %v9371_v34 = vpop.eup %9370 }
0x12ca   :  { %7239 = vrot.lane.b32.xlu0 %v9371_v34, %s9534_s9  ;;  %v9373_v45 = vpop.eup %9372 }
0x12cb   :  { %v7230_v3 = vadd.f32 1.0, %v9373_v45 }
0x12cd   :  { %9374 = vrcp.f32 %v7230_v3  ;;  %v12335_v3 = vand.u32 4294901760, %v7952_v6 }
0x12da   :  { %v9375_v8 = vpop.eup %9374 }
0x12db   :  { %v7237_v19 = vmul.f32 %v9375_v8, %v12116_v17 }
0x133c   :  { %v7240_v51 = vpop.permute.xlu0 %7239 }
0x133d   :  { %v7242_v43 = vmul.f32 %v9375_v8, %v7240_v51  ;;  %v12341_v51 = vsub.f32 %v7952_v6, %v12335_v3 }
0x133f   :  { %7244 = vrot.lane.b32.xlu1 %v7242_v43, %s9534_s9 }
0x13b1   :  { %v7245_v12 = vpop.permute.xlu1 %7244 }
0x13b2   :  { %v12238_v48 = vadd.f32 %v7245_v12, %v7237_v19  ;;  %v12349_v19 = vand.u32 4294901760, %v12341_v51 }
0x13b4   :  { %9376 = vtanh.f32 %v12238_v48 }
0x13b5   :  { %9378 = vpow2.f32 %v8582_v2 }
0x13c1   :  { %v9377_v24 = vpop.eup %9376 }
0x13c2   :  { %7250 = vrot.lane.b32.xlu0 %v9377_v24, %s9534_s9  ;;  %v9379_v21 = vpop.eup %9378  ;;  %v8082_v24 = vsub.f32 %v12341_v51, %v12349_v19 }
0x13c3   :  { %v7231_v14 = vadd.f32 1.0, %v9379_v21 }
0x13c4   :  { %v8083_v21 = vand.u32 4294901760, %v8082_v24 }
0x13c5   :  { %9380 = vrcp.f32 %v7231_v14  ;;  %v7951_v14 = vld [vmem:[%s12548_s11 + $0x28] sm:$0xff] }
0x13d2   :  { %v9381_v55 = vpop.eup %9380 }
0x1434   :  { %v7251_v5 = vpop.permute.xlu0 %7250 }
0x1435   :  { %v7253_v22 = vmul.f32 %v9381_v55, %v7251_v5  ;;  %v12360_v55 = vand.u32 4294901760, %v7951_v14  ;;  %v7950_v5 = vld [vmem:[%s12548_s11 + $0x20] sm:$0xff] }
0x1437   :  { %7254 = vst.msk [vmem:[#allocation2 + $0x6] sm:$0x1] %vm3129_vm4, %v7253_v22  ;;  %v7259_v17 = vsel %vm3137_vm3, %v7253_v22, 0 }
0x1438   :  { %7255 = vst.msk [vmem:[#allocation2 + $0x1] sm:$0x1] %vm3131_vm5, %v7253_v22  ;;  %v12247_v18 = vand.u32 4294901760, %v7259_v17 }
0x1439   :  { %7256 = vst.msk [vmem:[#allocation2 + $0xd] sm:$0x2] %vm3133_vm6, %v7253_v22 }
0x143a   :  { %7257 = vst.msk [vmem:[#allocation2 + $0x8] sm:$0x2] %vm3135_vm7, %v7253_v22  ;;  %v7343_v0 = vsub.f32 %v7259_v17, %v12247_v18  ;;  %7499 = vmatmul.mubr.f32.vlgmr.msra.gmra.mxu1 %v12247_v18  ;;  %v12366_v22 = vsub.f32 %v7951_v14, %v12360_v55  ;;  %v12368_v17 = vand.u32 4294901760, %v7950_v5 }
0x143b   :  { %7629 = vmatpush1.msra.mxu1 %v11276_v60  ;;  %7690 = vmatprep.mubr.f32.mxu1 %v12909_v9 }
0x143c   :  { %7631 = vmatprep.subr.mxu1 %v11283_v28  ;;  %v7344_v49 = vand.u32 4294901760, %v7343_v0 }
0x143d   :  { %7633 = vmatpush1.msra.mxu1 %v11289_v33 }
0x143e   :  { %7635 = vmatprep.subr.mxu1 %v11306_v13  ;;  %v7345_v40 = vsub.f32 %v7343_v0, %v7344_v49 }
0x143f   :  { %7637 = vmatpush1.msra.mxu1 %v11314_v20 }
0x1440   :  { %7639 = vmatprep.subr.mxu1 %v11324_v52  ;;  %v7346_v34 = vand.u32 4294901760, %v7345_v40  ;;  %v12380_v40 = vsub.f32 %v7950_v5, %v12368_v17 }
0x1441   :  { %7641 = vmatpush1.msra.mxu1 %v11334_v44 }
0x1442   :  { %7643 = vmatprep.subr.mxu1 %v11357_v10  ;;  %7347 = vmatmul.mubr.f32.vlgmr.msra.gmra.mxu0 %v7346_v34 }
0x1443   :  { %7526 = vmatpush1.msra.mxu0 %v11287_v57  ;;  %7645 = vmatpush1.msra.mxu1 %v11368_v4  ;;  %v13089_v57 = vld [vmem:[#allocation26_spill] sm:$0xff] }
0x1444   :  { %7529 = vmatprep.subr.mxu0 %v11297_v58  ;;  %7647 = vmatprep.subr.mxu1 %v11379_v42  ;;  %v13092_v58 = vld [vmem:[#allocation17_spill] sm:$0xff] }
0x1445   :  { %7532 = vmatpush1.msra.mxu0 %v11304_v26  ;;  %7649 = vmatpush1.msra.mxu1 %v11390_v16  ;;  %v13094_v26 = vld [vmem:[#allocation41_spill] sm:$0xff] }
0x1446   :  { %7535 = vmatprep.subr.mxu0 %v11322_v32  ;;  %7651 = vmatprep.subr.mxu1 %v11413_v31 }
0x1447   :  { %7538 = vmatpush1.msra.mxu0 %v11332_v25  ;;  %7653 = vmatpush1.msra.mxu1 %v11424_v35 }
0x1448   :  { %7541 = vmatprep.subr.mxu0 %v11345_v38  ;;  %7655 = vmatprep.subr.mxu1 %v11435_v1 }
0x1449   :  { %7544 = vmatpush1.msra.mxu0 %v11355_v36  ;;  %7657 = vmatpush1.msra.mxu1 %v11447_v30 }
0x144a   :  { %7547 = vmatprep.subr.mxu0 %v11377_v15  ;;  %7694 = vmatmul.mubr.f32.vlgmr.msra.gmra.mxu1 %v7344_v49  ;;  %v12377_v49 = vand.u32 4294901760, %v12366_v22 }
0x144b   :  { %7837 = vmatprep.subr.mxu1 %v11274_v54  ;;  %7550 = vmatpush1.msra.mxu0 %v11388_v37  ;;  %v13086_v54 = vld [vmem:[#allocation31_spill] sm:$0xff] }
0x144c   :  { %7839 = vmatpush1.msra.mxu1 %v11276_v60  ;;  %7553 = vmatprep.subr.mxu0 %v11401_v27  ;;  %v13087_v60 = vld [vmem:[#allocation22_spill] sm:$0xff] }
0x144d   :  { %7841 = vmatprep.subr.mxu1 %v11283_v28  ;;  %7556 = vmatpush1.msra.mxu0 %v11411_v61  ;;  %v13088_v28 = vld [vmem:[#allocation24_spill] sm:$0xff] }
0x144e   :  { %7843 = vmatpush1.msra.mxu1 %v11289_v33  ;;  %7559 = vmatprep.subr.mxu0 %v11433_v53  ;;  %v13090_v33 = vld [vmem:[#allocation39_spill] sm:$0xff] }
0x144f   :  { %7845 = vmatprep.subr.mxu1 %v11306_v13  ;;  %7562 = vmatpush1.msra.mxu0 %v11445_v23 }
0x1450   :  { %7847 = vmatpush1.msra.mxu1 %v11314_v20  ;;  %7565 = vmatprep.subr.mxu0 %v11464_v7 }
0x1451   :  { %7849 = vmatprep.subr.mxu1 %v11324_v52  ;;  %7568 = vmatpush1.msra.mxu0 %v11473_v62 }
0x1452   :  { %7601 = vmatprep.mubr.f32.mxu0 %v12909_v9  ;;  %7851 = vmatpush1.msra.mxu1 %v11334_v44 }
0x1453   :  { %7604 = vmatmul.mubr.f32.vlgmr.msra.gmra.mxu0 %v7343_v0  ;;  %7719 = vmatprep.subr.mxu0 %v11294_v11  ;;  %v13091_v11 = vld [vmem:[#allocation33_spill] sm:$0xff] }
0x1454   :  { %7853 = vmatprep.subr.mxu1 %v11357_v10  ;;  %7723 = vmatpush1.msra.mxu0 %v11301_v56  ;;  %v13093_v56 = vld [vmem:[#allocation37_spill] sm:$0xff] }
0x1455   :  { %7855 = vmatpush1.msra.mxu1 %v11368_v4  ;;  %7727 = vmatprep.subr.mxu0 %v11312_v47 }
0x1456   :  { %7857 = vmatprep.subr.mxu1 %v11379_v42  ;;  %7731 = vmatpush1.msra.mxu0 %v11319_v46 }
0x1457   :  { %7859 = vmatpush1.msra.mxu1 %v11390_v16  ;;  %7735 = vmatprep.subr.mxu0 %v11342_v29 }
0x1458   :  { %7861 = vmatprep.subr.mxu1 %v11413_v31  ;;  %7739 = vmatpush1.msra.mxu0 %v11352_v39 }
0x1459   :  { %7863 = vmatpush1.msra.mxu1 %v11424_v35  ;;  %7743 = vmatprep.subr.mxu0 %v11366_v59 }
0x145a   :  { %7865 = vmatprep.subr.mxu1 %v11435_v1  ;;  %7747 = vmatpush1.msra.mxu0 %v13086_v54 }
0x145b   :  { %7867 = vmatpush1.msra.mxu1 %v11447_v30  ;;  %7900 = vmatprep.mubr.f32.mxu1 %v12909_v9 }
0x145c   :  { %7751 = vmatprep.subr.mxu0 %v13087_v60  ;;  %7902 = vmatmul.mubr.f32.vlgmr.msra.gmra.mxu1 %v12247_v18  ;;  %v7948_v60 = vld [vmem:[%s12548_s11 + $0x10] sm:$0xff] }
0x145d   :  { %7755 = vmatpush1.msra.mxu0 %v13088_v28  ;;  %7812 = vmatprep.mubr.f32.mxu0 %v12909_v9 }
0x145e   :  { %7759 = vmatprep.subr.mxu0 %v13089_v57  ;;  %v12392_v57 = vand.u32 4294901760, %v12380_v40 }
0x145f   :  { %7763 = vmatpush1.msra.mxu0 %v13090_v33 }
0x1460   :  { %7767 = vmatprep.subr.mxu0 %v13091_v11  ;;  %v12398_v11 = vand.u32 4294901760, %v7948_v60 }
0x1461   :  { %7771 = vmatpush1.msra.mxu0 %v13092_v58  ;;  %v7947_v58 = vld [vmem:[%s12548_s11 + $0x8] sm:$0xff] }
0x1462   :  { %7775 = vmatprep.subr.mxu0 %v13093_v56 }
0x1463   :  { %7779 = vmatpush1.msra.mxu0 %v13094_v26  ;;  %v8096_v26 = vsub.f32 %v12380_v40, %v12392_v57 }
0x1464   :  { %7814 = vmatmul.mubr.f32.vlgmr.msra.gmra.mxu0 %v12247_v18  ;;  %v7949_v18 = vld [vmem:[%s12548_s11 + $0x18] sm:$0xff] }
0x1465   :  { %v12382_v34 = vand.u32 4294901760, %v7949_v18 }
0x1467   :  { %v12395_v33 = vsub.f32 %v7949_v18, %v12382_v34 }
0x14fa   :  { %v7500_v13 = vpop.f32.mrf.mxu1 }
0x14fc   :  { %v7502_v32 = vpop.f32.mrf.mxu1 }
0x1502   :  { %v7348_v47 = vpop.f32.mrf.mxu0 }
0x1503   :  { %v7501_v20 = vadd.f32 %v7500_v13, %v7348_v47  ;;  %v12407_v13 = vand.u32 4294901760, %v12395_v33 }
0x1504   :  { %v7350_v46 = vpop.f32.mrf.mxu0 }
0x1505   :  { %v7503_v38 = vadd.f32 %v7502_v32, %v7350_v46  ;;  %v12412_v46 = vand.u32 4294901760, %v7947_v58  ;;  %v7946_v32 = vld [vmem:[%s12548_s11] sm:$0xff] }
0x150a   :  { %v7695_v25 = vpop.f32.mrf.mxu1 }
0x150c   :  { %v7697_v36 = vpop.f32.mrf.mxu1 }
0x1513   :  { %v7605_v9 = vpop.f32.mrf.mxu0 }
0x1514   :  { %v7606_v52 = vadd.f32 %v7605_v9, %v7501_v20  ;;  %v12410_v20 = vsub.f32 %v7948_v60, %v12398_v11  ;;  %v8097_v9 = vand.u32 4294901760, %v8096_v26 }
0x1515   :  { %v7607_v29 = vpop.f32.mrf.mxu0 }
0x1516   :  { %v7696_v44 = vadd.f32 %v7695_v25, %v7606_v52  ;;  %v7608_v39 = vadd.f32 %v7607_v29, %v7503_v38  ;;  %v8103_v52 = vsub.f32 %v12395_v33, %v12407_v13  ;;  %v12423_v25 = vand.u32 4294901760, %v7946_v32 }
0x1517   :  { %v12430_v29 = vsub.f32 %v7947_v58, %v12412_v46 }
0x1518   :  { %v7698_v15 = vadd.f32 %v7697_v36, %v7608_v39  ;;  %v8104_v38 = vand.u32 4294901760, %v8103_v52  ;;  %v12434_v39 = vsub.f32 %v7946_v32, %v12423_v25 }
0x151c   :  { %v7903_v10 = vpop.f32.mrf.mxu1 }
0x151e   :  { %v7905_v27 = vpop.f32.mrf.mxu1 }
0x1524   :  { %v7815_v59 = vpop.f32.mrf.mxu0 }
0x1525   :  { %v7816_v4 = vadd.f32 %v7815_v59, %v7696_v44  ;;  %v12427_v44 = vand.u32 4294901760, %v12410_v20  ;;  %v12444_v59 = vand.u32 4294901760, %v12434_v39 }
0x1526   :  { %v7817_v42 = vpop.f32.mrf.mxu0 }
0x1527   :  { %v7904_v37 = vadd.f32 %v7903_v10, %v7816_v4  ;;  %v7818_v16 = vadd.f32 %v7817_v42, %v7698_v15  ;;  %v8110_v36 = vsub.f32 %v12410_v20, %v12427_v44  ;;  %v12440_v10 = vand.u32 4294901760, %v12430_v29 }
0x1528   :  { %v8124_v42 = vsub.f32 %v12434_v39, %v12444_v59 }
0x1529   :  { %v7906_v62 = vadd.f32 %v7905_v27, %v7818_v16  ;;  %v7908_v35 = vadd.f32 %v7904_v37, %v11272_v63  ;;  %v13095_v63 = vld [vmem:[#allocation23_spill] sm:$0xff]  ;;  %v8111_v4 = vand.u32 4294901760, %v8110_v36  ;;  %v8117_v15 = vsub.f32 %v12430_v29, %v12440_v10 }
0x152a   :  { %v8125_v16 = vand.u32 4294901760, %v8124_v42 }
0x152b   :  { %v12320_v61 = vadd.f32 %v7906_v62, %v11278_v41  ;;  %v8583_v53 = vmul.f32 -1.442695, %v7908_v35  ;;  %v7953_v41 = vld [vmem:[%s12548_s11 + $0x38] sm:$0xff]  ;;  %v8118_v37 = vand.u32 4294901760, %v8117_v15  ;;  %s9536_s11 = smov [#allocation12]  }
0x152c   :  { %v12333_v45 = vand.u32 4294901760, %v7953_v41 }
0x152d   :  { %9382 = vtanh.f32 %v12320_v61  ;;  %v8584_v62 = vmul.f32 -1.442695, %v12320_v61 }
0x152e   :  { %9384 = vpow2.f32 %v8583_v53  ;;  %v12338_v8 = vsub.f32 %v7953_v41, %v12333_v45  ;;  %9167 = vmatprep.subr.mxu0 %v12333_v45 }
0x152f   :  { %9168 = vmatpush3.msra.mxu0 %v12333_v45 }
0x1530   :  { %v12346_v43 = vand.u32 4294901760, %v12338_v8  ;;  %9169 = vmatprep.subr.mxu0 %v12335_v3 }
0x1531   :  { %9170 = vmatpush3.msra.mxu0 %v12335_v3 }
0x1532   :  { %v8075_v12 = vsub.f32 %v12338_v8, %v12346_v43  ;;  %9171 = vmatprep.subr.mxu0 %v12360_v55 }
0x1533   :  { %9172 = vmatpush3.msra.mxu0 %v12360_v55 }
0x1534   :  { %v8076_v2 = vand.u32 4294901760, %v8075_v12  ;;  %9173 = vmatprep.subr.mxu0 %v12368_v17 }
0x1535   :  { %9174 = vmatpush3.msra.mxu0 %v12368_v17 }
0x1536   :  { %9186 = vmatprep.subr.mxu1 %v8076_v2  ;;  %9175 = vmatprep.subr.mxu0 %v12382_v34 }
0x1537   :  { %9187 = vmatpush3.msra.mxu1 %v8076_v2  ;;  %9176 = vmatpush3.msra.mxu0 %v12382_v34 }
0x1538   :  { %9188 = vmatprep.subr.mxu1 %v8083_v21  ;;  %9177 = vmatprep.subr.mxu0 %v12398_v11 }
0x1539   :  { %9189 = vmatpush3.msra.mxu1 %v8083_v21  ;;  %9178 = vmatpush3.msra.mxu0 %v12398_v11 }
0x153a   :  { %v9383_v31 = vpop.eup %9382  ;;  %9179 = vmatprep.subr.mxu0 %v12412_v46 }
0x153b   :  { %7925 = vrot.lane.b32.xlu1 %v9383_v31, %s9534_s9  ;;  %v9385_v1 = vpop.eup %9384  ;;  %9180 = vmatpush3.msra.mxu0 %v12412_v46 }
0x153c   :  { %v7916_v23 = vadd.f32 1.0, %v9385_v1  ;;  %9181 = vmatprep.subr.mxu0 %v12423_v25 }
0x153d   :  { %9182 = vmatpush3.msra.mxu0 %v12423_v25 }
0x153e   :  { %9386 = vrcp.f32 %v7916_v23  ;;  %9205 = vmatprep.subr.mxu0 %v12338_v8 }
0x154b   :  { %v9387_v30 = vpop.eup %9386 }
0x154c   :  { %v7923_v0 = vmul.f32 %v9387_v30, %v12238_v48  ;;  %v8089_v48 = vsub.f32 %v12366_v22, %v12377_v49 }
0x154e   :  { %v8090_v56 = vand.u32 4294901760, %v8089_v48 }
0x1550   :  { %9190 = vmatprep.subr.mxu1 %v8090_v56 }
0x1551   :  { %9191 = vmatpush3.msra.mxu1 %v8090_v56 }
0x1552   :  { %9192 = vmatprep.subr.mxu1 %v8097_v9 }
0x1553   :  { %9193 = vmatpush3.msra.mxu1 %v8097_v9 }
0x1554   :  { %9194 = vmatprep.subr.mxu1 %v8104_v38 }
0x1555   :  { %9195 = vmatpush3.msra.mxu1 %v8104_v38 }
0x1556   :  { %9196 = vmatprep.subr.mxu1 %v8111_v4 }
0x1557   :  { %9197 = vmatpush3.msra.mxu1 %v8111_v4 }
0x1558   :  { %9198 = vmatprep.subr.mxu1 %v8118_v37 }
0x1559   :  { %9199 = vmatpush3.msra.mxu1 %v8118_v37 }
0x155a   :  { %9200 = vmatprep.subr.mxu1 %v8125_v16 }
0x155b   :  { %9201 = vmatpush3.msra.mxu1 %v8125_v16 }
0x155c   :  { %9224 = vmatprep.subr.mxu1 %v12333_v45 }
0x15ad   :  { %v7926_v7 = vpop.permute.xlu1 %7925 }
0x15ae   :  { %v7928_v50 = vmul.f32 %v9387_v30, %v7926_v7 }
0x15b0   :  { %7930 = vrot.lane.b32.xlu0 %v7928_v50, %s9534_s9 }
0x15b4   :  { %2578 = vrot.lane.b32.xlu0 %v13095_v63, %s9535_s26 }
0x1622   :  { %v7931_v54 = vpop.permute.xlu0 %7930 }
0x1623   :  { %v7933_v28 = vadd.f32 %v7931_v54, %v7923_v0 }
0x1625   :  { %9388 = vtanh.f32 %v7933_v28 }
0x1626   :  { %v2579_v47 = vpop.permute.xlu0 %2578  ;;  %9390 = vpow2.f32 %v8584_v62 }
0x1627   :  { %2582 = vst.msk [vmem:[%s12551_s14] sm:$0x3] %vm2581_vm8, %v2579_v47  ;;  %s8549_s14 = sshll.u32 %s9536_s11, 4  ;;  %s8550_s14 = int_to_ptr.vmem [resolvable:$true] %s8549_s14 }
0x1628   :  { %s9494_s2 = scalar_lea.vmem %s8550_s14, 256  ;;  %p9499_p12 = scmp.lt.s32.totalorder %s8550_s14, %s8550_s14 }
0x1629   :  { %p9495_p11 = scmp.ne.s32.totalorder %s8550_s14, %s9494_s2  ;;  %p9500_p13 = scmp.lt.s32.totalorder %s9494_s2, %s9494_s2 }
0x162b   :  { %p9501_p0 = por %p9500_p13, %p9499_p12 }
0x162d   :  { %p9502_p1 = pnand %p9501_p0, %p9495_p11 }
0x1632   :  { %v9389_v27 = vpop.eup %9388 }
0x1633   :  { %7936 = vrot.lane.b32.xlu1 %v9389_v27, %s9534_s9  ;;  %v9391_v31 = vpop.eup %9390 }
0x1634   :  { %v7917_v35 = vadd.f32 1.0, %v9391_v31 }
0x1636   :  { %9392 = vrcp.f32 %v7917_v35 }
0x1643   :  { %v9393_v53 = vpop.eup %9392 }
0x16a5   :  { %v7937_v1 = vpop.permute.xlu1 %7936 }
0x16a6   :  { %v7939_v23 = vmul.f32 %v9393_v53, %v7937_v1 }
0x16a8   :  { %7940 = vst.msk [vmem:[#allocation2 + $0x7] sm:$0x1] %vm3129_vm4, %v7939_v23 }
0x16a9   :  { %7941 = vst.msk [vmem:[#allocation2] sm:$0x1] %vm3131_vm5, %v7939_v23 }
0x16aa   :  { %7942 = vst.msk [vmem:[#allocation2 + $0xe] sm:$0x2] %vm3133_vm6, %v7939_v23 }
0x16ab   :  { %7943 = vst.msk [vmem:[#allocation2 + $0x7] sm:$0x2] %vm3135_vm7, %v7939_v23 }
0x16b0   :  { %v7944_v30 = vld [vmem:[#allocation2] sm:$0xff] }
0x16b1   :  { %v7957_v50 = vsel %vm3137_vm3, %v7944_v30, 0 }
0x16b2   :  { %v7945_v7 = vld [vmem:[#allocation2 + $0x8] sm:$0xff]  ;;  %v8035_v41 = vand.u32 4294901760, %v7957_v50 }
0x16b3   :  { %v7960_v61 = vsel %vm3137_vm3, %v7945_v7, 0 }
0x16b4   :  { %v12461_v6 = vand.u32 4294901760, %v7960_v61  ;;  %9202 = vmatprep.mubr.f32.mxu1 %v8035_v41  ;;  %v8036_v12 = vsub.f32 %v7957_v50, %v8035_v41 }
0x16b6   :  { %v8046_v63 = vsub.f32 %v7960_v61, %v12461_v6  ;;  %9203 = vmatmul.mubr.f32.vlgmr.msra.gmra.mxu1 %v12461_v6  ;;  %v8037_v24 = vand.u32 4294901760, %v8036_v12 }
0x16b7   :  { %9225 = vmatpush3.msra.mxu1 %v12333_v45 }
0x16b8   :  { %v8047_v2 = vand.u32 4294901760, %v8046_v63  ;;  %9226 = vmatprep.subr.mxu1 %v12335_v3  ;;  %9240 = vmatprep.mubr.f32.mxu1 %v8037_v24  ;;  %v8038_v21 = vsub.f32 %v8036_v12, %v8037_v24 }
0x16b9   :  { %9227 = vmatpush3.msra.mxu1 %v12335_v3 }
0x16ba   :  { %v8048_v14 = vsub.f32 %v8046_v63, %v8047_v2  ;;  %9228 = vmatprep.subr.mxu1 %v12360_v55  ;;  %v8039_v5 = vand.u32 4294901760, %v8038_v21 }
0x16bb   :  { %9229 = vmatpush3.msra.mxu1 %v12360_v55 }
0x16bc   :  { %v8049_v18 = vand.u32 4294901760, %v8048_v14  ;;  %9230 = vmatprep.subr.mxu1 %v12368_v17  ;;  %9183 = vmatprep.mubr.f32.mxu0 %v8039_v5 }
0x16bd   :  { %9231 = vmatpush3.msra.mxu1 %v12368_v17 }
0x16be   :  { %9232 = vmatprep.subr.mxu1 %v12382_v34  ;;  %9184 = vmatmul.mubr.f32.vlgmr.msra.gmra.mxu0 %v8049_v18 }
0x16bf   :  { %9206 = vmatpush3.msra.mxu0 %v12338_v8  ;;  %9233 = vmatpush3.msra.mxu1 %v12382_v34 }
0x16c0   :  { %9207 = vmatprep.subr.mxu0 %v12341_v51  ;;  %9221 = vmatprep.mubr.f32.mxu0 %v8036_v12 }
0x16c1   :  { %9234 = vmatprep.subr.mxu1 %v12398_v11  ;;  %9208 = vmatpush3.msra.mxu0 %v12341_v51 }
0x16c2   :  { %9235 = vmatpush3.msra.mxu1 %v12398_v11  ;;  %9209 = vmatprep.subr.mxu0 %v12366_v22 }
0x16c3   :  { %9236 = vmatprep.subr.mxu1 %v12412_v46  ;;  %9210 = vmatpush3.msra.mxu0 %v12366_v22 }
0x16c4   :  { %9237 = vmatpush3.msra.mxu1 %v12412_v46  ;;  %9211 = vmatprep.subr.mxu0 %v12380_v40 }
0x16c5   :  { %9238 = vmatprep.subr.mxu1 %v12423_v25  ;;  %9212 = vmatpush3.msra.mxu0 %v12380_v40 }
0x16c6   :  { %9239 = vmatpush3.msra.mxu1 %v12423_v25  ;;  %9213 = vmatprep.subr.mxu0 %v12395_v33 }
0x16c7   :  { %9241 = vmatmul.mubr.f32.vlgmr.msra.gmra.mxu1 %v8047_v2  ;;  %9262 = vmatprep.subr.mxu1 %v12333_v45 }
0x16c8   :  { %9214 = vmatpush3.msra.mxu0 %v12395_v33  ;;  %9263 = vmatpush3.msra.mxu1 %v12333_v45 }
0x16c9   :  { %9278 = vmatprep.mubr.f32.mxu1 %v8035_v41  ;;  %9215 = vmatprep.subr.mxu0 %v12410_v20 }
0x16ca   :  { %9264 = vmatprep.subr.mxu1 %v12335_v3  ;;  %9216 = vmatpush3.msra.mxu0 %v12410_v20 }
0x16cb   :  { %9265 = vmatpush3.msra.mxu1 %v12335_v3  ;;  %9217 = vmatprep.subr.mxu0 %v12430_v29  ;;  %v7955_v3 = vld [vmem:[#allocation11 + $0x8] sm:$0xff] }
0x16cc   :  { %9266 = vmatprep.subr.mxu1 %v12360_v55  ;;  %9218 = vmatpush3.msra.mxu0 %v12430_v29 }
0x16cd   :  { %9267 = vmatpush3.msra.mxu1 %v12360_v55  ;;  %9219 = vmatprep.subr.mxu0 %v12434_v39 }
0x16ce   :  { %9268 = vmatprep.subr.mxu1 %v12368_v17  ;;  %9220 = vmatpush3.msra.mxu0 %v12434_v39 }
0x16cf   :  { %9269 = vmatpush3.msra.mxu1 %v12368_v17  ;;  %9222 = vmatmul.mubr.f32.vlgmr.msra.gmra.mxu0 %v8046_v63 }
0x16d0   :  { %9243 = vmatprep.subr.mxu0 %v12346_v43  ;;  %9270 = vmatprep.subr.mxu1 %v12382_v34 }
0x16d1   :  { %9244 = vmatpush3.msra.mxu0 %v12346_v43  ;;  %9259 = vmatprep.mubr.f32.mxu0 %v8035_v41  ;;  %v7954_v43 = vld [vmem:[#allocation11] sm:$0xff] }
0x16d2   :  { %9271 = vmatpush3.msra.mxu1 %v12382_v34  ;;  %9245 = vmatprep.subr.mxu0 %v12349_v19 }
0x16d3   :  { %9272 = vmatprep.subr.mxu1 %v12398_v11  ;;  %9246 = vmatpush3.msra.mxu0 %v12349_v19 }
0x16d4   :  { %9273 = vmatpush3.msra.mxu1 %v12398_v11  ;;  %9247 = vmatprep.subr.mxu0 %v12377_v49 }
0x16d5   :  { %9274 = vmatprep.subr.mxu1 %v12412_v46  ;;  %9248 = vmatpush3.msra.mxu0 %v12377_v49 }
0x16d6   :  { %9275 = vmatpush3.msra.mxu1 %v12412_v46  ;;  %9249 = vmatprep.subr.mxu0 %v12392_v57 }
0x16d7   :  { %9276 = vmatprep.subr.mxu1 %v12423_v25  ;;  %9250 = vmatpush3.msra.mxu0 %v12392_v57 }
0x16d8   :  { %9277 = vmatpush3.msra.mxu1 %v12423_v25  ;;  %9251 = vmatprep.subr.mxu0 %v12407_v13 }
0x16d9   :  { %9279 = vmatmul.mubr.f32.vlgmr.msra.gmra.mxu1 %v12461_v6  ;;  %9252 = vmatpush3.msra.mxu0 %v12407_v13 }
0x16da   :  { %9253 = vmatprep.subr.mxu0 %v12427_v44 }
0x16db   :  { %9254 = vmatpush3.msra.mxu0 %v12427_v44 }
0x16dc   :  { %9255 = vmatprep.subr.mxu0 %v12440_v10 }
0x16dd   :  { %9256 = vmatpush3.msra.mxu0 %v12440_v10 }
0x16de   :  { %9257 = vmatprep.subr.mxu0 %v12444_v59 }
0x16df   :  { %9258 = vmatpush3.msra.mxu0 %v12444_v59 }
0x16e0   :  { %9260 = vmatmul.mubr.f32.vlgmr.msra.gmra.mxu0 %v12461_v6 }
0x1776   :  { %v9204_v8 = vpop.f32.mrf.mxu1 }
0x1778   :  { %v8162_v17 = vpop.f32.mrf.mxu1 }
0x177e   :  { %v9185_v45 = vpop.f32.mrf.mxu0 }
0x177f   :  { %v8052_v19 = vadd.f32 %v9185_v45, %v7955_v3 }
0x1780   :  { %v8041_v51 = vpop.f32.mrf.mxu0 }
0x1781   :  { %v8042_v22 = vadd.f32 %v8041_v51, %v7954_v43  ;;  %v8169_v0 = vadd.f32 %v9204_v8, %v8052_v19 }
0x1783   :  { %v8163_v54 = vadd.f32 %v8162_v17, %v8042_v22 }
0x1787   :  { %v9242_v49 = vpop.f32.mrf.mxu1 }
0x1789   :  { %v8344_v28 = vpop.f32.mrf.mxu1 }
0x178f   :  { %v9223_v55 = vpop.f32.mrf.mxu0 }
0x1790   :  { %v8264_v34 = vadd.f32 %v9223_v55, %v8169_v0 }
0x1791   :  { %v8256_v40 = vpop.f32.mrf.mxu0 }
0x1792   :  { %v8257_v60 = vadd.f32 %v8256_v40, %v8163_v54  ;;  %v8353_v48 = vadd.f32 %v9242_v49, %v8264_v34 }
0x1794   :  { %v8345_v58 = vadd.f32 %v8344_v28, %v8257_v60 }
0x1799   :  { %v9280_v57 = vpop.f32.mrf.mxu1 }
0x179b   :  { %v8532_v47 = vpop.f32.mrf.mxu1 }
0x17a0   :  { %v9261_v33 = vpop.f32.mrf.mxu0 }
0x17a1   :  { %v8454_v11 = vadd.f32 %v9261_v33, %v8353_v48 }
0x17a2   :  { %v8447_v56 = vpop.f32.mrf.mxu0 }
0x17a3   :  { %v8539_v26 = vadd.f32 %v9280_v57, %v8454_v11  ;;  %v8448_v13 = vadd.f32 %v8447_v56, %v8345_v58 }
0x17a5   :  { %8543 = vst.msk [vmem:[#allocation12 + $0x8] sm:$0xff] %vm2599_vm2, %v8539_v26  ;;  %v8533_v20 = vadd.f32 %v8532_v47, %v8448_v13 }
0x17a7   :  { %8542 = vst.msk [vmem:[#allocation12] sm:$0xff] %vm2599_vm2, %v8533_v20 }
0x17a8   :  { %9505 = shalt.err (!%p9502_p1)
}
0x17a9   :  { %8555 = dma.vmem_to_hbm [thread:$0]  %s8550_s14, 256, %s12550_s13, [#allocation5], %s9529_s6, %s9529_s6, %s9530_s20  }
0x17aa   :  { %9520 = dma.done.wait [#allocation5], 256  }
0x17ab   :  { %9521 = vsyncadd [#allocation5], 4294967040 }
0x17ac   :  { %8563 = vsyncpa [#allocation4], 1 }
0x17ad   :  { %8564 = vsyncpa [#allocation7], 1 }
0x17ae   :  { %8565 = vsyncpa [#allocation10], 1 }
0x17af   :  { %8566 = vsyncpa [#allocation5], 1 }

</bundles_post_ra>
